<compile_context>
chip_gen: v7x
topology: tpu7x:2x2x1
jax: 0.10.0
libtpu: 0.0.40
codegen_flags: <defaults>
</compile_context>

<pallas_src>
import jax
import jax.numpy as jnp
from jax.experimental import pallas as pl
from jax.experimental.pallas import tpu as pltpu


def mlp_kernel(x_ref, w1_ref, b1_ref, w2_ref, b2_ref, w3_ref, b3_ref,
               w4h_ref, b4_ref, o_ref):
    # x_ref   : (TB, 10)        f32   batch tile
    # w1_ref  : (10, 256)       f32   resident (VPU rank-1 updates, not MXU)
    # b1..b3  : (1, 256)        f32   resident
    # w2, w3  : (256, 256)      bf16  resident (MXU)
    # w4h_ref : (1, 256)        f32   resident (= 0.5 * fc4 weight row)
    # b4_ref  : (1, 1)          f32   resident
    # o_ref   : (TB//128, 128)  f32   lane-dense output: row c, lane r <-> batch c*128+r

    x = x_ref[...]                              # (TB, 10) f32
    w1 = w1_ref[...]                            # (10, 256) f32

    # ---- fc1 (K=10): rank-1 updates on the VPU in f32; keeps the MXU for fc2/fc3 ----
    z = x[:, 0:1] * w1[0:1, :] + b1_ref[...]
    for k in range(1, 10):
        z = z + x[:, k:k + 1] * w1[k:k + 1, :]

    def sigmoid_f32(v):
        # sigmoid(v) = 0.5 * (1 + tanh(0.5 * v)): one EUP tanh + cheap VPU affine, f32.
        return jnp.tanh(v * 0.5) * 0.5 + 0.5

    # ---- fc2, fc3 on the MXU (bf16 inputs, f32 accumulation); sigmoid in f32 ----
    h = sigmoid_f32(z).astype(jnp.bfloat16)
    z = jnp.dot(h, w2_ref[...], preferred_element_type=jnp.float32) + b2_ref[...]
    h = sigmoid_f32(z).astype(jnp.bfloat16)
    z = jnp.dot(h, w3_ref[...], preferred_element_type=jnp.float32) + b3_ref[...]

    # ---- sigmoid #3 with fc4's weight folded into its affine, then the fc4 reduce ----
    # sigmoid(z) * w4 == (0.5*w4) * tanh(0.5*z) + (0.5*w4)
    w4h = w4h_ref[...]                          # (1, 256) f32
    prod = jnp.tanh(z * 0.5) * w4h + w4h        # (TB, 256) f32

    b4 = b4_ref[...]                            # (1, 1) f32
    tb = prod.shape[0]
    # Transposed (sublane-axis) reduce: 128 batch results land in the lanes of one row.
    for c in range(tb // 128):
        chunk_t = prod[c * 128:(c + 1) * 128, :].T                    # (256, 128) f32
        o_ref[c:c + 1, :] = jnp.sum(chunk_t, axis=0, keepdims=True) + b4


def mlp_base_forward(x, params, *, tile_b=2048):
    """x: (B, 10) float32 -> (B, 1) float32."""
    w1, b1, w2, b2, w3, b3, w4h, b4 = params
    B = x.shape[0]

    # Tile selection (B-aware): tiles are multiples of 128 rows (lane-dense output
    # chunks). Large B -> big tiles to amortize per-step overhead, but keep the grid
    # >= 2 steps whenever B spans more than one chunk so v7x can use both TCs.
    chunks = -(-B // 128)
    tb_chunks = min(max(tile_b // 128, 1), chunks)
    if chunks > 1:
        tb_chunks = min(tb_chunks, -(-chunks // 2))
    tb = tb_chunks * 128
    grid_steps = -(-chunks // tb_chunks)

    def resident(a):
        return pl.BlockSpec(a.shape, lambda i: (0, 0), memory_space=pltpu.VMEM)

    weights = (w1, b1, w2, b2, w3, b3, w4h, b4)
    weight_bytes = sum(int(a.size) * a.dtype.itemsize for a in weights)
    rows = grid_steps * tb
    cost = pl.CostEstimate(
        flops=2 * rows * 256 * (10 + 256 + 256 + 1),
        transcendentals=3 * rows * 256,
        bytes_accessed=rows * (10 * 4 + 4) + weight_bytes,
    )

    out3 = pl.pallas_call(
        mlp_kernel,
        out_shape=jax.ShapeDtypeStruct((grid_steps, tb_chunks, 128), jnp.float32),
        grid=(grid_steps,),
        in_specs=[
            pl.BlockSpec((tb, 10), lambda i: (i, 0), memory_space=pltpu.VMEM),
            resident(w1), resident(b1),
            resident(w2), resident(b2),
            resident(w3), resident(b3),
            resident(w4h), resident(b4),
        ],
        out_specs=pl.BlockSpec((None, tb_chunks, 128), lambda i: (i, 0, 0),
                               memory_space=pltpu.VMEM),
        compiler_params=pltpu.CompilerParams(
            dimension_semantics=("parallel",),
            vmem_limit_bytes=32 * 1024 * 1024,
        ),
        cost_estimate=cost,
    )(x, w1, b1, w2, b2, w3, b3, w4h, b4)

    # Lane-dense (grid, tb/128, 128) -> (B, 1); contiguous reshape + tiny slice.
    return out3.reshape(-1)[:B][:, None]


def init_params_f32(key):
    """PyTorch Linear default init (uniform +-1/sqrt(fan_in)); weights stored (in, out)."""
    dims = [(10, 256), (256, 256), (256, 256), (256, 1)]
    params = []
    for fan_in, fan_out in dims:
        key, kw, kb = jax.random.split(key, 3)
        bound = 1.0 / jnp.sqrt(fan_in)
        w = jax.random.uniform(kw, (fan_in, fan_out), jnp.float32, -bound, bound)
        b = jax.random.uniform(kb, (1, fan_out), jnp.float32, -bound, bound)
        params += [w, b]
    return tuple(params)


def pack_params_for_kernel(params_f32):
    """Kernel layout: w1 f32 (rank-1 VPU), w2/w3 bf16 (MXU), biases f32,
    fc4 weight pre-halved as a f32 row (folded into sigmoid #3's affine)."""
    w1, b1, w2, b2, w3, b3, w4, b4 = params_f32
    return (w1, b1,
            w2.astype(jnp.bfloat16), b2,
            w3.astype(jnp.bfloat16), b3,
            0.5 * w4.T,            # (1, 256) f32
            b4)                    # (1, 1)   f32


def reference_forward(x, params_f32):
    w1, b1, w2, b2, w3, b3, w4, b4 = params_f32
    h = jax.nn.sigmoid(x @ w1 + b1)
    h = jax.nn.sigmoid(h @ w2 + b2)
    h = jax.nn.sigmoid(h @ w3 + b3)
    return h @ w4 + b4


if __name__ == "__main__":
    key = jax.random.PRNGKey(0)
    key, kx = jax.random.split(key)
    B = 8
    x = jax.random.normal(kx, (B, 10), jnp.float32)

    params_f32 = init_params_f32(key)
    params_kernel = pack_params_for_kernel(params_f32)

    out = mlp_base_forward(x, params_kernel)
    out = jax.block_until_ready(out)

    ref = reference_forward(x, params_f32)
    assert out.shape == (B, 1)
    # fc2/fc3 use bf16 MXU inputs (f32 accumulation); everything else is f32.
    assert jnp.allclose(out, ref, atol=2e-2, rtol=2e-2), (out, ref)
    print("KERNEL_OK")
</pallas_src>

<mosaic_0001>
module attributes {stable_mosaic.version = 11 : i64} {
  func.func @mlp_kernel(%arg0: i32, %arg1: memref<128x10xf32, #tpu.memory_space<vmem>>, %arg2: memref<10x256xf32, #tpu.memory_space<vmem>>, %arg3: memref<1x256xf32, #tpu.memory_space<vmem>>, %arg4: memref<256x256xbf16, #tpu.memory_space<vmem>>, %arg5: memref<1x256xf32, #tpu.memory_space<vmem>>, %arg6: memref<256x256xbf16, #tpu.memory_space<vmem>>, %arg7: memref<1x256xf32, #tpu.memory_space<vmem>>, %arg8: memref<1x256xf32, #tpu.memory_space<vmem>>, %arg9: memref<1x1xf32, #tpu.memory_space<vmem>>, %arg10: memref<1x1x128xf32, #tpu.memory_space<vmem>>) attributes {dimension_semantics = [#tpu.dimension_semantics<parallel>], iteration_bounds = array<i64: 1>, scalar_prefetch = 0 : i64, scratch_operands = 0 : i64, tpu.core_type = #tpu.core_type<tc>, window_params = [{transform_indices = @transform_0, window_bounds = array<i64: 128, 10>}, {pipeline_mode = #tpu.pipeline_mode<synchronous>, transform_indices = @transform_1, window_bounds = array<i64: 10, 256>}, {pipeline_mode = #tpu.pipeline_mode<synchronous>, transform_indices = @transform_2, window_bounds = array<i64: 1, 256>}, {pipeline_mode = #tpu.pipeline_mode<synchronous>, transform_indices = @transform_3, window_bounds = array<i64: 256, 256>}, {pipeline_mode = #tpu.pipeline_mode<synchronous>, transform_indices = @transform_4, window_bounds = array<i64: 1, 256>}, {pipeline_mode = #tpu.pipeline_mode<synchronous>, transform_indices = @transform_5, window_bounds = array<i64: 256, 256>}, {pipeline_mode = #tpu.pipeline_mode<synchronous>, transform_indices = @transform_6, window_bounds = array<i64: 1, 256>}, {pipeline_mode = #tpu.pipeline_mode<synchronous>, transform_indices = @transform_7, window_bounds = array<i64: 1, 256>}, {pipeline_mode = #tpu.pipeline_mode<synchronous>, transform_indices = @transform_8, window_bounds = array<i64: 1, 1>}, {transform_indices = @transform_9, window_bounds = array<i64: 1, 1, 128>}]} {
    %c0 = arith.constant 0 : index
    %c0_0 = arith.constant 0 : index
    %0 = vector.load %arg1[%c0, %c0_0] : memref<128x10xf32, #tpu.memory_space<vmem>>, vector<128x10xf32>
    %c0_1 = arith.constant 0 : index
    %c0_2 = arith.constant 0 : index
    %1 = vector.load %arg2[%c0_1, %c0_2] : memref<10x256xf32, #tpu.memory_space<vmem>>, vector<10x256xf32>
    %2 = vector.extract_strided_slice %0 {offsets = [0, 0], sizes = [128, 1], strides = [1, 1]} : vector<128x10xf32> to vector<128x1xf32>
    %3 = vector.extract_strided_slice %1 {offsets = [0, 0], sizes = [1, 256], strides = [1, 1]} : vector<10x256xf32> to vector<1x256xf32>
    %4 = vector.broadcast %2 : vector<128x1xf32> to vector<128x256xf32>
    %5 = vector.broadcast %3 : vector<1x256xf32> to vector<128x256xf32>
    %6 = arith.mulf %4, %5 : vector<128x256xf32>
    %c0_3 = arith.constant 0 : index
    %c0_4 = arith.constant 0 : index
    %7 = vector.load %arg3[%c0_3, %c0_4] : memref<1x256xf32, #tpu.memory_space<vmem>>, vector<1x256xf32>
    %8 = vector.broadcast %7 : vector<1x256xf32> to vector<128x256xf32>
    %9 = arith.addf %6, %8 : vector<128x256xf32>
    %10 = vector.extract_strided_slice %0 {offsets = [0, 1], sizes = [128, 1], strides = [1, 1]} : vector<128x10xf32> to vector<128x1xf32>
    %11 = vector.extract_strided_slice %1 {offsets = [1, 0], sizes = [1, 256], strides = [1, 1]} : vector<10x256xf32> to vector<1x256xf32>
    %12 = vector.broadcast %10 : vector<128x1xf32> to vector<128x256xf32>
    %13 = vector.broadcast %11 : vector<1x256xf32> to vector<128x256xf32>
    %14 = arith.mulf %12, %13 : vector<128x256xf32>
    %15 = arith.addf %9, %14 : vector<128x256xf32>
    %16 = vector.extract_strided_slice %0 {offsets = [0, 2], sizes = [128, 1], strides = [1, 1]} : vector<128x10xf32> to vector<128x1xf32>
    %17 = vector.extract_strided_slice %1 {offsets = [2, 0], sizes = [1, 256], strides = [1, 1]} : vector<10x256xf32> to vector<1x256xf32>
    %18 = vector.broadcast %16 : vector<128x1xf32> to vector<128x256xf32>
    %19 = vector.broadcast %17 : vector<1x256xf32> to vector<128x256xf32>
    %20 = arith.mulf %18, %19 : vector<128x256xf32>
    %21 = arith.addf %15, %20 : vector<128x256xf32>
    %22 = vector.extract_strided_slice %0 {offsets = [0, 3], sizes = [128, 1], strides = [1, 1]} : vector<128x10xf32> to vector<128x1xf32>
    %23 = vector.extract_strided_slice %1 {offsets = [3, 0], sizes = [1, 256], strides = [1, 1]} : vector<10x256xf32> to vector<1x256xf32>
    %24 = vector.broadcast %22 : vector<128x1xf32> to vector<128x256xf32>
    %25 = vector.broadcast %23 : vector<1x256xf32> to vector<128x256xf32>
    %26 = arith.mulf %24, %25 : vector<128x256xf32>
    %27 = arith.addf %21, %26 : vector<128x256xf32>
    %28 = vector.extract_strided_slice %0 {offsets = [0, 4], sizes = [128, 1], strides = [1, 1]} : vector<128x10xf32> to vector<128x1xf32>
    %29 = vector.extract_strided_slice %1 {offsets = [4, 0], sizes = [1, 256], strides = [1, 1]} : vector<10x256xf32> to vector<1x256xf32>
    %30 = vector.broadcast %28 : vector<128x1xf32> to vector<128x256xf32>
    %31 = vector.broadcast %29 : vector<1x256xf32> to vector<128x256xf32>
    %32 = arith.mulf %30, %31 : vector<128x256xf32>
    %33 = arith.addf %27, %32 : vector<128x256xf32>
    %34 = vector.extract_strided_slice %0 {offsets = [0, 5], sizes = [128, 1], strides = [1, 1]} : vector<128x10xf32> to vector<128x1xf32>
    %35 = vector.extract_strided_slice %1 {offsets = [5, 0], sizes = [1, 256], strides = [1, 1]} : vector<10x256xf32> to vector<1x256xf32>
    %36 = vector.broadcast %34 : vector<128x1xf32> to vector<128x256xf32>
    %37 = vector.broadcast %35 : vector<1x256xf32> to vector<128x256xf32>
    %38 = arith.mulf %36, %37 : vector<128x256xf32>
    %39 = arith.addf %33, %38 : vector<128x256xf32>
    %40 = vector.extract_strided_slice %0 {offsets = [0, 6], sizes = [128, 1], strides = [1, 1]} : vector<128x10xf32> to vector<128x1xf32>
    %41 = vector.extract_strided_slice %1 {offsets = [6, 0], sizes = [1, 256], strides = [1, 1]} : vector<10x256xf32> to vector<1x256xf32>
    %42 = vector.broadcast %40 : vector<128x1xf32> to vector<128x256xf32>
    %43 = vector.broadcast %41 : vector<1x256xf32> to vector<128x256xf32>
    %44 = arith.mulf %42, %43 : vector<128x256xf32>
    %45 = arith.addf %39, %44 : vector<128x256xf32>
    %46 = vector.extract_strided_slice %0 {offsets = [0, 7], sizes = [128, 1], strides = [1, 1]} : vector<128x10xf32> to vector<128x1xf32>
    %47 = vector.extract_strided_slice %1 {offsets = [7, 0], sizes = [1, 256], strides = [1, 1]} : vector<10x256xf32> to vector<1x256xf32>
    %48 = vector.broadcast %46 : vector<128x1xf32> to vector<128x256xf32>
    %49 = vector.broadcast %47 : vector<1x256xf32> to vector<128x256xf32>
    %50 = arith.mulf %48, %49 : vector<128x256xf32>
    %51 = arith.addf %45, %50 : vector<128x256xf32>
    %52 = vector.extract_strided_slice %0 {offsets = [0, 8], sizes = [128, 1], strides = [1, 1]} : vector<128x10xf32> to vector<128x1xf32>
    %53 = vector.extract_strided_slice %1 {offsets = [8, 0], sizes = [1, 256], strides = [1, 1]} : vector<10x256xf32> to vector<1x256xf32>
    %54 = vector.broadcast %52 : vector<128x1xf32> to vector<128x256xf32>
    %55 = vector.broadcast %53 : vector<1x256xf32> to vector<128x256xf32>
    %56 = arith.mulf %54, %55 : vector<128x256xf32>
    %57 = arith.addf %51, %56 : vector<128x256xf32>
    %58 = vector.extract_strided_slice %0 {offsets = [0, 9], sizes = [128, 1], strides = [1, 1]} : vector<128x10xf32> to vector<128x1xf32>
    %59 = vector.extract_strided_slice %1 {offsets = [9, 0], sizes = [1, 256], strides = [1, 1]} : vector<10x256xf32> to vector<1x256xf32>
    %60 = vector.broadcast %58 : vector<128x1xf32> to vector<128x256xf32>
    %61 = vector.broadcast %59 : vector<1x256xf32> to vector<128x256xf32>
    %62 = arith.mulf %60, %61 : vector<128x256xf32>
    %63 = arith.addf %57, %62 : vector<128x256xf32>
    %cst = arith.constant 5.000000e-01 : f32
    %64 = vector.broadcast %cst : f32 to vector<128x256xf32>
    %65 = arith.mulf %63, %64 : vector<128x256xf32>
    %66 = math.tanh %65 : vector<128x256xf32>
    %cst_5 = arith.constant 5.000000e-01 : f32
    %67 = vector.broadcast %cst_5 : f32 to vector<128x256xf32>
    %68 = arith.mulf %66, %67 : vector<128x256xf32>
    %cst_6 = arith.constant 5.000000e-01 : f32
    %69 = vector.broadcast %cst_6 : f32 to vector<128x256xf32>
    %70 = arith.addf %68, %69 : vector<128x256xf32>
    %71 = arith.truncf %70 : vector<128x256xf32> to vector<128x256xbf16>
    %c0_7 = arith.constant 0 : index
    %c0_8 = arith.constant 0 : index
    %72 = vector.load %arg4[%c0_7, %c0_8] : memref<256x256xbf16, #tpu.memory_space<vmem>>, vector<256x256xbf16>
    %cst_9 = arith.constant dense<0.000000e+00> : vector<128x256xf32>
    %73 = tpu.matmul %71, %72, %cst_9 {dimension_numbers = #tpu.dot_dimension_numbers<[1], [0], [0], [1], [0, 0, 1, 1], [], []>} : vector<128x256xbf16>, vector<256x256xbf16>, vector<128x256xf32> -> vector<128x256xf32>
    %c0_10 = arith.constant 0 : index
    %c0_11 = arith.constant 0 : index
    %74 = vector.load %arg5[%c0_10, %c0_11] : memref<1x256xf32, #tpu.memory_space<vmem>>, vector<1x256xf32>
    %75 = vector.broadcast %74 : vector<1x256xf32> to vector<128x256xf32>
    %76 = arith.addf %73, %75 : vector<128x256xf32>
    %cst_12 = arith.constant 5.000000e-01 : f32
    %77 = vector.broadcast %cst_12 : f32 to vector<128x256xf32>
    %78 = arith.mulf %76, %77 : vector<128x256xf32>
    %79 = math.tanh %78 : vector<128x256xf32>
    %cst_13 = arith.constant 5.000000e-01 : f32
    %80 = vector.broadcast %cst_13 : f32 to vector<128x256xf32>
    %81 = arith.mulf %79, %80 : vector<128x256xf32>
    %cst_14 = arith.constant 5.000000e-01 : f32
    %82 = vector.broadcast %cst_14 : f32 to vector<128x256xf32>
    %83 = arith.addf %81, %82 : vector<128x256xf32>
    %84 = arith.truncf %83 : vector<128x256xf32> to vector<128x256xbf16>
    %c0_15 = arith.constant 0 : index
    %c0_16 = arith.constant 0 : index
    %85 = vector.load %arg6[%c0_15, %c0_16] : memref<256x256xbf16, #tpu.memory_space<vmem>>, vector<256x256xbf16>
    %cst_17 = arith.constant dense<0.000000e+00> : vector<128x256xf32>
    %86 = tpu.matmul %84, %85, %cst_17 {dimension_numbers = #tpu.dot_dimension_numbers<[1], [0], [0], [1], [0, 0, 1, 1], [], []>} : vector<128x256xbf16>, vector<256x256xbf16>, vector<128x256xf32> -> vector<128x256xf32>
    %c0_18 = arith.constant 0 : index
    %c0_19 = arith.constant 0 : index
    %87 = vector.load %arg7[%c0_18, %c0_19] : memref<1x256xf32, #tpu.memory_space<vmem>>, vector<1x256xf32>
    %88 = vector.broadcast %87 : vector<1x256xf32> to vector<128x256xf32>
    %89 = arith.addf %86, %88 : vector<128x256xf32>
    %c0_20 = arith.constant 0 : index
    %c0_21 = arith.constant 0 : index
    %90 = vector.load %arg8[%c0_20, %c0_21] : memref<1x256xf32, #tpu.memory_space<vmem>>, vector<1x256xf32>
    %cst_22 = arith.constant 5.000000e-01 : f32
    %91 = vector.broadcast %cst_22 : f32 to vector<128x256xf32>
    %92 = arith.mulf %89, %91 : vector<128x256xf32>
    %93 = math.tanh %92 : vector<128x256xf32>
    %94 = vector.broadcast %90 : vector<1x256xf32> to vector<128x256xf32>
    %95 = arith.mulf %93, %94 : vector<128x256xf32>
    %96 = vector.broadcast %90 : vector<1x256xf32> to vector<128x256xf32>
    %97 = arith.addf %95, %96 : vector<128x256xf32>
    %c0_23 = arith.constant 0 : index
    %c0_24 = arith.constant 0 : index
    %98 = vector.load %arg9[%c0_23, %c0_24] : memref<1x1xf32, #tpu.memory_space<vmem>>, vector<1x1xf32>
    %99 = tpu.transpose %97, [1, 0] : vector<128x256xf32> -> vector<256x128xf32>
    %cst_25 = arith.constant dense<0.000000e+00> : vector<128xf32>
    %100 = vector.multi_reduction <add>, %99, %cst_25 [0] : vector<256x128xf32> to vector<128xf32>
    %101 = vector.shape_cast %100 : vector<128xf32> to vector<1x128xf32>
    %102 = vector.broadcast %98 : vector<1x1xf32> to vector<1x128xf32>
    %103 = arith.addf %101, %102 : vector<1x128xf32>
    %c0_26 = arith.constant 0 : index
    %c0_27 = arith.constant 0 : index
    %c0_28 = arith.constant 0 : index
    %104 = vector.load %arg10[%c0_26, %c0_27, %c0_28] : memref<1x1x128xf32, #tpu.memory_space<vmem>>, vector<1x1x128xf32>
    %105 = vector.shape_cast %104 : vector<1x1x128xf32> to vector<1x128xf32>
    %106 = vector.shape_cast %103 : vector<1x128xf32> to vector<1x1x128xf32>
    tpu.vector_store %arg10[%c0_26, %c0_27, %c0_28], %106 {strides = array<i32>} : memref<1x1x128xf32, #tpu.memory_space<vmem>>, vector<1x1x128xf32>,
    return
  }
  func.func @transform_0(%arg0: i32) -> (i32, i32) {
    %c0_i32 = arith.constant 0 : i32
    %c0_i32_0 = arith.constant 0 : i32
    return %arg0, %c0_i32 : i32, i32
  }
  func.func @transform_1(%arg0: i32) -> (i32, i32) {
    %c0_i32 = arith.constant 0 : i32
    %c0_i32_0 = arith.constant 0 : i32
    %c0_i32_1 = arith.constant 0 : i32
    return %c0_i32, %c0_i32_0 : i32, i32
  }
  func.func @transform_2(%arg0: i32) -> (i32, i32) {
    %c0_i32 = arith.constant 0 : i32
    %c0_i32_0 = arith.constant 0 : i32
    %c0_i32_1 = arith.constant 0 : i32
    return %c0_i32, %c0_i32_0 : i32, i32
  }
  func.func @transform_3(%arg0: i32) -> (i32, i32) {
    %c0_i32 = arith.constant 0 : i32
    %c0_i32_0 = arith.constant 0 : i32
    %c0_i32_1 = arith.constant 0 : i32
    return %c0_i32, %c0_i32_0 : i32, i32
  }
  func.func @transform_4(%arg0: i32) -> (i32, i32) {
    %c0_i32 = arith.constant 0 : i32
    %c0_i32_0 = arith.constant 0 : i32
    %c0_i32_1 = arith.constant 0 : i32
    return %c0_i32, %c0_i32_0 : i32, i32
  }
  func.func @transform_5(%arg0: i32) -> (i32, i32) {
    %c0_i32 = arith.constant 0 : i32
    %c0_i32_0 = arith.constant 0 : i32
    %c0_i32_1 = arith.constant 0 : i32
    return %c0_i32, %c0_i32_0 : i32, i32
  }
  func.func @transform_6(%arg0: i32) -> (i32, i32) {
    %c0_i32 = arith.constant 0 : i32
    %c0_i32_0 = arith.constant 0 : i32
    %c0_i32_1 = arith.constant 0 : i32
    return %c0_i32, %c0_i32_0 : i32, i32
  }
  func.func @transform_7(%arg0: i32) -> (i32, i32) {
    %c0_i32 = arith.constant 0 : i32
    %c0_i32_0 = arith.constant 0 : i32
    %c0_i32_1 = arith.constant 0 : i32
    return %c0_i32, %c0_i32_0 : i32, i32
  }
  func.func @transform_8(%arg0: i32) -> (i32, i32) {
    %c0_i32 = arith.constant 0 : i32
    %c0_i32_0 = arith.constant 0 : i32
    %c0_i32_1 = arith.constant 0 : i32
    return %c0_i32, %c0_i32_0 : i32, i32
  }
  func.func @transform_9(%arg0: i32) -> (i32, i32, i32) {
    %c0_i32 = arith.constant 0 : i32
    %c0_i32_0 = arith.constant 0 : i32
    %c0_i32_1 = arith.constant 0 : i32
    return %arg0, %c0_i32, %c0_i32_0 : i32, i32, i32
  }
}

</mosaic_0001>

<bundles_post_ra>
// kernel: tpu_custom_call.1
= control target key start
LH: loop header
LB: loop body
LE: loop exit
PB: predicated region body
PF: predicated region fallthrough
CT: control target
= control target key end

     0   :  { %s4873_s0 = inlined_call_operand.hbm [shape: f32[8,10], index: 0, kind: input, shape index: {}]   ;;  %s4874_s1 = inlined_call_operand.hbm [shape: f32[10,256], index: 1, kind: input, shape index: {}]   ;;  %s4875_s2 = inlined_call_operand.vmem [shape: f32[1,256], index: 2, kind: input, shape index: {}]   ;;  %s4876_s3 = inlined_call_operand.hbm [shape: bf16[256,256], index: 3, kind: input, shape index: {}]   ;;  %s4877_s4 = inlined_call_operand.vmem [shape: f32[1,256], index: 4, kind: input, shape index: {}]   ;;  %s4878_s5 = inlined_call_operand.hbm [shape: bf16[256,256], index: 5, kind: input, shape index: {}]   ;;  %s4879_s6 = inlined_call_operand.vmem [shape: f32[1,256], index: 6, kind: input, shape index: {}]   ;;  %s4880_s7 = inlined_call_operand.vmem [shape: f32[1,256], index: 7, kind: input, shape index: {}]   ;;  %s4881_s8 = inlined_call_operand.<no memory space> [shape: f32[1,1], index: 8, kind: input, shape index: {}]   ;;  %s4882_s9 = inlined_call_operand.hbm [shape: f32[1,1,128], index: 9, kind: output, shape index: {}]  }
   0x1   :  { %v14_v0 = vstv %s4881_s8 }
   0x2   :  { %15 = vst [vmem:[#allocation2] sm:$0x1] %v14_v0 }
   0x3   :  { %16 = vsyncpa [#allocation4], 0 }
   0x4   :  { %17 = vsyncpa [#allocation7], 0 }
   0x5   :  { %18 = vsyncpa [#allocation10], 0 }
   0x6   :  { %19 = vsyncpa [#allocation5], 0 }
   0x7   :  { %24 = vsyncadd [#allocation4], 1920  ;;  %s3281_s11 = smov [#allocation6]   ;;  %s3163_s15 = scalar_lea.hbm %s4874_s1, 512 }
   0x8   :  { %s37_s12 = sshll.u32 %s3281_s11, 4  ;;  %p3164_p0 = scmp.ne.s32.totalorder %s4874_s1, %s3163_s15  ;;  %s38_s12 = int_to_ptr.vmem [resolvable:$true] %s37_s12 }
   0x9   :  { %p3167_p1 = scmp.lt.u32.totalorder %s3163_s15, %s4874_s1 }
   0xb   :  { %p3169_p2 = pnand %p3167_p1, %p3164_p0 }
   0xd   :  { %3172 = shalt.err (!%p3169_p2)
}
   0xe   :  { %s3173_s8 = scalar_lea.vmem %s38_s12, 512  ;;  %p3178_p4 = scmp.lt.s32.totalorder %s38_s12, %s38_s12 }
   0xf   :  { %p3174_p3 = scmp.ne.s32.totalorder %s38_s12, %s3173_s8  ;;  %p3179_p5 = scmp.lt.s32.totalorder %s3173_s8, %s3173_s8 }
  0x11   :  { %p3180_p6 = por %p3179_p5, %p3178_p4 }
  0x13   :  { %p3181_p7 = pnand %p3180_p6, %p3174_p3 }
  0x15   :  { %3184 = shalt.err (!%p3181_p7)
}
  0x16   :  { %s3282_s20 = smov 256   ;;  %s3283_s21 = smov 16  }
  0x17   :  { %43 = dma.hbm_to_vmem [thread:$0]  %s4874_s1, 512, %s38_s12, [#allocation7], %s3282_s20, %s3282_s20, %s3283_s21  }
  0x18   :  { %s3284_s24 = smov [#allocation3]   ;;  %s3185_s28 = scalar_lea.hbm %s4873_s0, 128 }
  0x19   :  { %s25_s25 = sshll.u32 %s3284_s24, 4  ;;  %p3186_p8 = scmp.ne.s32.totalorder %s4873_s0, %s3185_s28  ;;  %s26_s25 = int_to_ptr.vmem [resolvable:$true] %s25_s25 }
  0x1a   :  { %p3189_p9 = scmp.lt.u32.totalorder %s3185_s28, %s4873_s0 }
  0x1c   :  { %p3191_p10 = pnand %p3189_p9, %p3186_p8 }
  0x1e   :  { %3194 = shalt.err (!%p3191_p10)
}
  0x1f   :  { %s3195_s13 = scalar_lea.vmem %s26_s25, 128  ;;  %s3199_s1 = scalar_lea.vmem %s26_s25, 2048 }
  0x20   :  { %p3196_p11 = scmp.ne.s32.totalorder %s26_s25, %s3195_s13  ;;  %p3200_p12 = scmp.lt.s32.totalorder %s26_s25, %s26_s25 }
  0x21   :  { %p3201_p13 = scmp.lt.s32.totalorder %s3199_s1, %s3195_s13 }
  0x23   :  { %p3202_p0 = por %p3201_p13, %p3200_p12 }
  0x25   :  { %p3203_p1 = pnand %p3202_p0, %p3196_p11 }
  0x27   :  { %3206 = shalt.err (!%p3203_p1)
}
  0x28   :  { %s3285_s12 = smov 128   ;;  %s3286_s14 = smov 8  }
  0x29   :  { %31 = dma.hbm_to_vmem [thread:$0]  %s4873_s0, 128, %s26_s25, [#allocation4], %s3285_s12, %s3285_s12, %s3286_s14  }
  0x2a   :  { %s3287_s17 = smov [#allocation8]   ;;  %s3288_s19 = smov [#allocation9]  }
  0x2b   :  { %s51_s18 = sshll.u32 %s3287_s17, 4  ;;  %s65_s8 = sshll.u32 %s3288_s19, 4  ;;  %s52_s18 = int_to_ptr.vmem [resolvable:$true] %s51_s18  ;;  %s3380_s8 = int_to_ptr.vmem [resolvable:$true] %s65_s8 }
  0x2c   :  { %s3207_s22 = scalar_lea.hbm %s4876_s3, 4096 }
  0x2d   :  { %p3208_p2 = scmp.ne.s32.totalorder %s4876_s3, %s3207_s22  ;;  %p3211_p3 = scmp.lt.u32.totalorder %s3207_s22, %s4876_s3 }
  0x2f   :  { %p3213_p4 = pnand %p3211_p3, %p3208_p2 }
  0x31   :  { %3216 = shalt.err (!%p3213_p4)
}
  0x32   :  { %s3217_s0 = scalar_lea.vmem %s52_s18, 4096  ;;  %p3222_p6 = scmp.lt.s32.totalorder %s52_s18, %s52_s18 }
  0x33   :  { %p3218_p5 = scmp.ne.s32.totalorder %s52_s18, %s3217_s0  ;;  %p3223_p7 = scmp.lt.s32.totalorder %s3217_s0, %s3217_s0 }
  0x35   :  { %p3224_p8 = por %p3223_p7, %p3222_p6 }
  0x37   :  { %p3225_p9 = pnand %p3224_p8, %p3218_p5 }
  0x39   :  { %3228 = shalt.err (!%p3225_p9)
}
  0x3a   :  { %57 = dma.hbm_to_vmem [thread:$0]  %s4876_s3, 4096, %s52_s18, [#allocation7], %s3285_s12, %s3285_s12, %s3286_s14  }
  0x3b   :  { %s3229_s10 = scalar_lea.hbm %s4878_s5, 4096 }
  0x3c   :  { %p3230_p10 = scmp.ne.s32.totalorder %s4878_s5, %s3229_s10  ;;  %p3233_p11 = scmp.lt.u32.totalorder %s3229_s10, %s4878_s5 }
  0x3e   :  { %p3235_p12 = pnand %p3233_p11, %p3230_p10 }
  0x40   :  { %3238 = shalt.err (!%p3235_p12)
}
  0x41   :  { %s3239_s16 = scalar_lea.vmem %s3380_s8, 4096  ;;  %p3244_p0 = scmp.lt.s32.totalorder %s3380_s8, %s3380_s8 }
  0x42   :  { %p3240_p13 = scmp.ne.s32.totalorder %s3380_s8, %s3239_s16  ;;  %p3245_p1 = scmp.lt.s32.totalorder %s3239_s16, %s3239_s16 }
  0x44   :  { %p3246_p2 = por %p3245_p1, %p3244_p0 }
  0x46   :  { %p3247_p3 = pnand %p3246_p2, %p3240_p13 }
  0x48   :  { %3250 = shalt.err (!%p3247_p3)
}
  0x49   :  { %71 = dma.hbm_to_vmem [thread:$0]  %s4878_s5, 4096, %s3380_s8, [#allocation10], %s3285_s12, %s3285_s12, %s3286_s14  }
  0x4a   :  { %3273 = dma.done.wait [#allocation4], 2048  }
  0x4b   :  { %3274 = vsyncadd [#allocation4], 4294965248 }
  0x4c   :  { %3275 = dma.done.wait [#allocation7], 4608  }
  0x4d   :  { %3276 = vsyncadd [#allocation7], 4294962688 }
  0x4e   :  { %3277 = dma.done.wait [#allocation10], 4096  }
  0x4f   :  { %3278 = vsyncadd [#allocation10], 4294963200  ;;  %v4899_v1 = vmov 9   ;;  %v4891_v2 = vmov 1   ;;  %v3419_v3 = vld [vmem:[#allocation3] sm:$0xff]  ;;  %v3423_v4 = vld [vmem:[#allocation3 + $0x18] sm:$0xff] }
  0x50   :  { %2789 = vset.pattern.permute.xlu0 %v4899_v1  ;;  %2773 = vset.pattern.permute.xlu1 %v4891_v2  ;;  %v3425_v5 = vld [vmem:[#allocation3 + $0x8] sm:$0xff]  ;;  %v3429_v6 = vld [vmem:[#allocation3 + $0x30] sm:$0xff]  ;;  %v4887_v7 = vmov 2   ;;  %v4895_v8 = vmov 7   ;;  %v4883_v9 = vmov 3   ;;  %v4893_v11 = vmov 0  }
  0x51   :  { %1363 = vperm.xlu0 %2789, %v3419_v3   ;;  %275 = vperm.xlu1 %2773, %v3419_v3   ;;  %v3438_v10 = vld [vmem:[#allocation3 + $0x10] sm:$0xff]  ;;  %v3443_v12 = vld [vmem:[#allocation3 + $0x48] sm:$0xff]  ;;  %v4901_v13 = vmov 4   ;;  %v4897_v14 = vmov 8   ;;  %v4889_v15 = vmov 5   ;;  %v3464_v16 = vld [vmem:[#allocation3 + $0x20] sm:$0xff] }
  0x52   :  { %v4885_v17 = vmov 6   ;;  %v3469_v18 = vld [vmem:[#allocation3 + $0x38] sm:$0xff]  ;;  %v3473_v19 = vld [vmem:[#allocation3 + $0x50] sm:$0xff]  ;;  %v3477_v20 = vld [vmem:[#allocation3 + $0x68] sm:$0xff] }
  0x53   :  { %v3488_v21 = vld [vmem:[#allocation3 + $0x28] sm:$0xff]  ;;  %v3493_v22 = vld [vmem:[#allocation3 + $0x40] sm:$0xff]  ;;  %v101_v23 = vld [vmem:[#allocation3 + $0x58] sm:$0xff] }
  0x54   :  { %v3499_v24 = vld [vmem:[#allocation3 + $0x70] sm:$0xff]  ;;  %v2866_v27 = vld [vmem:[#allocation8 + $0x4] ss:$8 sps:$4 sm:$0xff]   ;;  %v2868_v28 = vld [vmem:[#allocation8] ss:$8 sps:$4 sm:$0xff]  }
  0x55   :  { %1375 = vperm.xlu0 %2789, %v3423_v4   ;;  %279 = vperm.xlu1 %2773, %v3425_v5   ;;  %v2869_v31 = vld [vmem:[#allocation8 + $0x14] ss:$8 sps:$4 sm:$0xff]   ;;  %v2871_v32 = vld [vmem:[#allocation8 + $0x10] ss:$8 sps:$4 sm:$0xff]   ;;  %v2872_v35 = vld [vmem:[#allocation8 + $0x24] ss:$8 sps:$4 sm:$0xff]  }
  0x56   :  { %1846 = vmatprep.subr.bf16.mxu0 %v2866_v27  ;;  %v2874_v36 = vld [vmem:[#allocation8 + $0x20] ss:$8 sps:$4 sm:$0xff]   ;;  %v2875_v39 = vld [vmem:[#allocation8 + $0x34] ss:$8 sps:$4 sm:$0xff]   ;;  %v2877_v40 = vld [vmem:[#allocation8 + $0x30] ss:$8 sps:$4 sm:$0xff]  }
  0x57   :  { %1847 = vmatpush1.bf16.msra.mxu0 %v2868_v28  ;;  %v2878_v42 = vld [vmem:[#allocation8 + $0x44] ss:$8 sps:$4 sm:$0xff]   ;;  %v2880_v44 = vld [vmem:[#allocation8 + $0x40] ss:$8 sps:$4 sm:$0xff]   ;;  %v2881_v46 = vld [vmem:[#allocation8 + $0x54] ss:$8 sps:$4 sm:$0xff]  }
  0x58   :  { %1848 = vmatprep.subr.bf16.mxu0 %v2869_v31  ;;  %v2883_v47 = vld [vmem:[#allocation8 + $0x50] ss:$8 sps:$4 sm:$0xff]   ;;  %v2884_v50 = vld [vmem:[#allocation8 + $0x64] ss:$8 sps:$4 sm:$0xff]   ;;  %v2886_v51 = vld [vmem:[#allocation8 + $0x60] ss:$8 sps:$4 sm:$0xff]  }
  0x59   :  { %1387 = vperm.xlu0 %2789, %v3429_v6   ;;  %2774 = vset.pattern.permute.xlu1 %v4887_v7  ;;  %v2887_v54 = vld [vmem:[#allocation8 + $0x74] ss:$8 sps:$4 sm:$0xff]   ;;  %v2889_v55 = vld [vmem:[#allocation8 + $0x70] ss:$8 sps:$4 sm:$0xff]   ;;  %v2890_v58 = vld [vmem:[#allocation8 + $0x84] ss:$8 sps:$4 sm:$0xff]  }
  0x5a   :  { %415 = vperm.xlu1 %2774, %v3425_v5   ;;  %v2892_v59 = vld [vmem:[#allocation8 + $0x80] ss:$8 sps:$4 sm:$0xff]   ;;  %v2893_v62 = vld [vmem:[#allocation8 + $0x94] ss:$8 sps:$4 sm:$0xff]   ;;  %v2895_v63 = vld [vmem:[#allocation8 + $0x90] ss:$8 sps:$4 sm:$0xff]  }
  0x5b   :  { %1849 = vmatpush1.bf16.msra.mxu0 %v2871_v32  ;;  %v2899_v27 = vld [vmem:[#allocation8 + $0xb4] ss:$8 sps:$4 sm:$0xff]   ;;  %v2901_v28 = vld [vmem:[#allocation8 + $0xb0] ss:$8 sps:$4 sm:$0xff]  }
  0x5c   :  { %1850 = vmatprep.subr.bf16.mxu0 %v2872_v35  ;;  %v3604_v31 = vld [vmem:[#allocation3 + $0x78] sm:$0xff]  ;;  %v2902_v35 = vld [vmem:[#allocation8 + $0xc4] ss:$8 sps:$4 sm:$0xff]  }
  0x5d   :  { %2820 = vset.pattern.permute.xlu0 %v4895_v8 }
  0x5e   :  { %1091 = vperm.xlu0 %2820, %v3419_v3   ;;  %2775 = vset.pattern.permute.xlu1 %v4883_v9 }
  0x5f   :  { %547 = vperm.xlu1 %2775, %v3419_v3   ;;  %1851 = vmatpush1.bf16.msra.mxu0 %v2874_v36 }
  0x60   :  { %1852 = vmatprep.subr.bf16.mxu0 %v2875_v39  ;;  %v2904_v39 = vld [vmem:[#allocation8 + $0xc0] ss:$8 sps:$4 sm:$0xff]  }
  0x62   :  { %1103 = vperm.xlu0 %2820, %v3423_v4  }
  0x63   :  { %2776 = vset.pattern.permute.xlu1 %v4893_v11  ;;  %1853 = vmatpush1.bf16.msra.mxu0 %v2877_v40 }
  0x64   :  { %122 = vperm.xlu1 %2776, %v3438_v10   ;;  %1854 = vmatprep.subr.bf16.mxu0 %v2878_v42  ;;  %v2905_v42 = vld [vmem:[#allocation8 + $0xd4] ss:$8 sps:$4 sm:$0xff]  }
  0x66   :  { %1115 = vperm.xlu0 %2820, %v3429_v6  }
  0x67   :  { %1855 = vmatpush1.bf16.msra.mxu0 %v2880_v44  ;;  %v2907_v44 = vld [vmem:[#allocation8 + $0xd0] ss:$8 sps:$4 sm:$0xff]  }
  0x68   :  { %127 = vperm.xlu1 %2776, %v3423_v4   ;;  %1856 = vmatprep.subr.bf16.mxu0 %v2881_v46 }
  0x6a   :  { %1127 = vperm.xlu0 %2820, %v3443_v12  }
  0x6b   :  { %1857 = vmatpush1.bf16.msra.mxu0 %v2883_v47  ;;  %v190_v47 = vlaneseq }
  0x6c   :  { %2777 = vset.pattern.permute.xlu1 %v4901_v13  ;;  %1858 = vmatprep.subr.bf16.mxu0 %v2884_v50 }
  0x6d   :  { %687 = vperm.xlu1 %2777, %v3425_v5  }
  0x6e   :  { %2826 = vset.pattern.permute.xlu0 %v4897_v14 }
  0x6f   :  { %1227 = vperm.xlu0 %2826, %v3419_v3   ;;  %1859 = vmatpush1.bf16.msra.mxu0 %v2886_v51  ;;  %v2908_v51 = vld [vmem:[#allocation8 + $0xe4] ss:$8 sps:$4 sm:$0xff]  }
  0x70   :  { %1860 = vmatprep.subr.bf16.mxu0 %v2887_v54  ;;  %v2910_v54 = vld [vmem:[#allocation8 + $0xe0] ss:$8 sps:$4 sm:$0xff]  }
  0x71   :  { %2778 = vset.pattern.permute.xlu1 %v4891_v2 }
  0x72   :  { %283 = vperm.xlu1 %2778, %v3438_v10  }
  0x73   :  { %1239 = vperm.xlu0 %2826, %v3423_v4   ;;  %1861 = vmatpush1.bf16.msra.mxu0 %v2889_v55 }
  0x74   :  { %1862 = vmatprep.subr.bf16.mxu0 %v2890_v58  ;;  %v3627_v58 = vshrl.u32 %v190_v47, 7 }
  0x76   :  { %2779 = vset.pattern.permute.xlu1 %v4889_v15 }
  0x77   :  { %1251 = vperm.xlu0 %2826, %v3429_v6   ;;  %819 = vperm.xlu1 %2779, %v3419_v3  }
  0x78   :  { %1863 = vmatpush1.bf16.msra.mxu0 %v2892_v59 }
  0x79   :  { %1864 = vmatprep.subr.bf16.mxu0 %v2893_v62  ;;  %v2911_v62 = vld [vmem:[#allocation8 + $0xf4] ss:$8 sps:$4 sm:$0xff]  }
  0x7b   :  { %1263 = vperm.xlu0 %2826, %v3443_v12   ;;  %823 = vperm.xlu1 %2779, %v3425_v5  }
  0x7c   :  { %1865 = vmatpush1.bf16.msra.mxu0 %v2895_v63  ;;  %v2913_v63 = vld [vmem:[#allocation8 + $0xf0] ss:$8 sps:$4 sm:$0xff]  }
  0x7f   :  { %2830 = vset.pattern.permute.xlu0 %v4883_v9  ;;  %2780 = vset.pattern.permute.xlu1 %v4887_v7 }
  0x80   :  { %551 = vperm.xlu0 %2830, %v3425_v5   ;;  %423 = vperm.xlu1 %2780, %v3423_v4  }
  0x84   :  { %563 = vperm.xlu0 %2830, %v3464_v16   ;;  %2781 = vset.pattern.permute.xlu1 %v4885_v17 }
  0x85   :  { %955 = vperm.xlu1 %2781, %v3419_v3  }
  0x88   :  { %575 = vperm.xlu0 %2830, %v3469_v18  }
  0x89   :  { %2782 = vset.pattern.permute.xlu1 %v4883_v9 }
  0x8a   :  { %555 = vperm.xlu1 %2782, %v3438_v10  }
  0x8c   :  { %587 = vperm.xlu0 %2830, %v3473_v19  }
  0x8e   :  { %559 = vperm.xlu1 %2782, %v3423_v4  }
  0x90   :  { %599 = vperm.xlu0 %2830, %v3477_v20  }
  0x92   :  { %2783 = vset.pattern.permute.xlu1 %v4895_v8 }
  0x93   :  { %1095 = vperm.xlu1 %2783, %v3425_v5  }
  0x94   :  { %2837 = vset.pattern.permute.xlu0 %v4893_v11 }
  0x95   :  { %112 = vperm.xlu0 %2837, %v3419_v3  }
  0x97   :  { %2784 = vset.pattern.permute.xlu1 %v4893_v11 }
  0x98   :  { %132 = vperm.xlu1 %2784, %v3464_v16  }
  0x99   :  { %117 = vperm.xlu0 %2837, %v3425_v5  }
  0x9c   :  { %2785 = vset.pattern.permute.xlu1 %v4901_v13 }
  0x9d   :  { %137 = vperm.xlu0 %2837, %v3488_v21   ;;  %691 = vperm.xlu1 %2785, %v3438_v10  }
  0xa1   :  { %152 = vperm.xlu0 %2837, %v3493_v22   ;;  %695 = vperm.xlu1 %2785, %v3423_v4  }
  0xa5   :  { %167 = vperm.xlu0 %2837, %v101_v23   ;;  %2786 = vset.pattern.permute.xlu1 %v4897_v14 }
  0xa6   :  { %1231 = vperm.xlu1 %2786, %v3425_v5  }
  0xa9   :  { %182 = vperm.xlu0 %2837, %v3499_v24  }
  0xaa   :  { %2787 = vset.pattern.permute.xlu1 %v4891_v2 }
  0xab   :  { %291 = vperm.xlu1 %2787, %v3464_v16  }
  0xad   :  { %2839 = vset.pattern.permute.xlu0 %v4891_v2 }
  0xae   :  { %287 = vperm.xlu0 %2839, %v3423_v4  }
  0xaf   :  { %2788 = vset.pattern.permute.xlu1 %v4889_v15 }
  0xb0   :  { %827 = vperm.xlu1 %2788, %v3438_v10  }
  0xb2   :  { %295 = vperm.xlu0 %2839, %v3488_v21  }
  0xb4   :  { %831 = vperm.xlu1 %2788, %v3423_v4  }
  0xb6   :  { %307 = vperm.xlu0 %2839, %v3493_v22  }
  0xb8   :  { %2790 = vset.pattern.permute.xlu1 %v4899_v1 }
  0xb9   :  { %1367 = vperm.xlu1 %2790, %v3425_v5  }
  0xba   :  { %319 = vperm.xlu0 %2839, %v101_v23  }
  0xbd   :  { %2791 = vset.pattern.permute.xlu1 %v4887_v7 }
  0xbe   :  { %331 = vperm.xlu0 %2839, %v3499_v24   ;;  %427 = vperm.xlu1 %2791, %v3464_v16  }
  0xc2   :  { %2843 = vset.pattern.permute.xlu0 %v4887_v7  ;;  %2792 = vset.pattern.permute.xlu1 %v4885_v17 }
  0xc3   :  { %411 = vperm.xlu0 %2843, %v3419_v3   ;;  %963 = vperm.xlu1 %2792, %v3438_v10  }
  0xc7   :  { %419 = vperm.xlu0 %2843, %v3438_v10   ;;  %967 = vperm.xlu1 %2792, %v3423_v4   ;;  %v2896_v4 = vld [vmem:[#allocation8 + $0xa4] ss:$8 sps:$4 sm:$0xff]  }
  0xc8   :  { %1866 = vmatprep.subr.bf16.mxu0 %v2896_v4 }
  0xcb   :  { %431 = vperm.xlu0 %2843, %v3488_v21   ;;  %2793 = vset.pattern.permute.xlu1 %v4883_v9 }
  0xcc   :  { %567 = vperm.xlu1 %2793, %v3488_v21  }
  0xcf   :  { %443 = vperm.xlu0 %2843, %v3493_v22  }
  0xd0   :  { %2794 = vset.pattern.permute.xlu1 %v4895_v8  ;;  %v3527_v25 = vpop.permute.xlu1 %275  ;;  %v3529_v26 = vpop.permute.xlu0 %1363 }
  0xd1   :  { %1099 = vperm.xlu1 %2794, %v3438_v10  }
  0xd3   :  { %455 = vperm.xlu0 %2843, %v101_v23  }
  0xd4   :  { %v3532_v29 = vpop.permute.xlu1 %279  ;;  %v3534_v30 = vpop.permute.xlu0 %1375 }
  0xd5   :  { %2795 = vset.pattern.permute.xlu1 %v4893_v11 }
  0xd6   :  { %142 = vperm.xlu1 %2795, %v3429_v6  }
  0xd7   :  { %467 = vperm.xlu0 %2843, %v3499_v24  }
  0xd8   :  { %v3539_v33 = vpop.permute.xlu0 %1387 }
  0xd9   :  { %4975 = vst [vmem:[#allocation16_spill] sm:$0xff] %v3539_v33  ;;  %v3541_v34 = vpop.permute.xlu1 %415 }
  0xda   :  { %147 = vperm.xlu1 %2795, %v3469_v18  }
  0xdb   :  { %2847 = vset.pattern.permute.xlu0 %v4885_v17 }
  0xdc   :  { %959 = vperm.xlu0 %2847, %v3425_v5   ;;  %v2898_v5 = vld [vmem:[#allocation8 + $0xa0] ss:$8 sps:$4 sm:$0xff]  }
  0xdd   :  { %v3546_v37 = vpop.permute.xlu0 %1091  ;;  %1867 = vmatpush1.bf16.msra.mxu0 %v2898_v5  ;;  %v3636_v5 = vsub.s32 1, %v3627_v58 }
  0xde   :  { %2796 = vset.pattern.permute.xlu1 %v4901_v13  ;;  %v3549_v38 = vpop.permute.xlu1 %547  ;;  %1868 = vmatprep.subr.bf16.mxu0 %v2899_v27  ;;  %v3639_v27 = vsub.s32 0, %v3627_v58 }
  0xdf   :  { %703 = vperm.xlu1 %2796, %v3488_v21   ;;  %4990 = vst [vmem:[#allocation31_spill] sm:$0xff] %v3636_v5 }
  0xe0   :  { %971 = vperm.xlu0 %2847, %v3464_v16   ;;  %4991 = vst [vmem:[#allocation32_spill] sm:$0xff] %v3639_v27 }
  0xe1   :  { %v3553_v41 = vpop.permute.xlu0 %1103  ;;  %1869 = vmatpush1.bf16.msra.mxu0 %v2901_v28  ;;  %v3642_v28 = vld [vmem:[#allocation6] sm:$0xff] }
  0xe2   :  { %1870 = vmatprep.subr.bf16.mxu0 %v2902_v35  ;;  %v476_v35 = vsub.s32 2, %v3627_v58  ;;  %v3655_v47 = vrot.slane %v3642_v28, %v3636_v5 }
  0xe3   :  { %2797 = vset.pattern.permute.xlu1 %v4897_v14  ;;  %v3556_v43 = vpop.permute.xlu1 %122 }
  0xe4   :  { %983 = vperm.xlu0 %2847, %v3469_v18   ;;  %1235 = vperm.xlu1 %2797, %v3438_v10  }
  0xe5   :  { %v3560_v45 = vpop.permute.xlu0 %1115  ;;  %1871 = vmatpush1.bf16.msra.mxu0 %v2904_v39 }
  0xe6   :  { %4976 = vst [vmem:[#allocation17_spill] sm:$0xff] %v3560_v45  ;;  %1872 = vmatprep.subr.bf16.mxu0 %v2905_v42  ;;  %v3647_v42 = vld [vmem:[#allocation6 + $0x8] sm:$0xff]  ;;  %v4997_v45 = vmov 9  }
  0xe7   :  { %v3562_v48 = vpop.permute.xlu1 %127 }
  0xe8   :  { %995 = vperm.xlu0 %2847, %v3473_v19   ;;  %2798 = vset.pattern.permute.xlu1 %v4891_v2 }
  0xe9   :  { %299 = vperm.xlu1 %2798, %v3429_v6   ;;  %v3567_v49 = vpop.permute.xlu0 %1127  ;;  %1873 = vmatpush1.bf16.msra.mxu0 %v2907_v44  ;;  %v230_v44 = vld [vmem:[%s4875_s2] sm:$0x3] }
  0xea   :  { %4977 = vst [vmem:[#allocation18_spill] sm:$0xff] %v3567_v49  ;;  %1874 = vmatprep.subr.bf16.mxu0 %v2908_v51  ;;  %v3659_v51 = vrot.slane %v3642_v28, %v3639_v27  ;;  %v3681_v2 = vrot.slane %v230_v44, %v3639_v27  ;;  %v4995_v49 = vmov 4  }
  0xec   :  { %1007 = vperm.xlu0 %2847, %v3477_v20   ;;  %v3570_v52 = vpop.permute.xlu1 %687  ;;  %4993 = vst [vmem:[#allocation34_spill] sm:$0xff] %v3659_v51 }
  0xed   :  { %303 = vperm.xlu1 %2798, %v3469_v18   ;;  %1875 = vmatpush1.bf16.msra.mxu0 %v2910_v54  ;;  %v3663_v54 = vrot.slane %v3647_v42, %v3639_v27 }
  0xee   :  { %v3573_v53 = vpop.permute.xlu0 %1227  ;;  %1876 = vmatprep.subr.bf16.mxu0 %v2911_v62 }
  0xf0   :  { %2850 = vset.pattern.permute.xlu0 %v4901_v13 }
  0xf1   :  { %683 = vperm.xlu0 %2850, %v3419_v3   ;;  %2799 = vset.pattern.permute.xlu1 %v4889_v15  ;;  %v3578_v56 = vpop.permute.xlu1 %283 }
  0xf2   :  { %839 = vperm.xlu1 %2799, %v3488_v21   ;;  %v3581_v57 = vpop.permute.xlu0 %1239  ;;  %1877 = vmatpush1.bf16.msra.mxu0 %v2913_v63  ;;  %v3670_v63 = vrot.slane %v3647_v42, %v3636_v5 }
  0xf3   :  { %4978 = vst [vmem:[#allocation19_spill] sm:$0xff] %v3581_v57 }
  0xf5   :  { %699 = vperm.xlu0 %2850, %v3464_v16  }
  0xf6   :  { %2800 = vset.pattern.permute.xlu1 %v4899_v1  ;;  %v3585_v60 = vpop.permute.xlu1 %819  ;;  %v3587_v61 = vpop.permute.xlu0 %1251  ;;  %v349_v1 = vmul.f32 %v3670_v63, %v3532_v29 }
  0xf7   :  { %4979 = vst [vmem:[#allocation20_spill] sm:$0xff] %v3585_v60  ;;  %4980 = vst [vmem:[#allocation21_spill] sm:$0xff] %v3587_v61  ;;  %1371 = vperm.xlu1 %2800, %v3438_v10  }
  0xf9   :  { %711 = vperm.xlu0 %2850, %v3469_v18  }
  0xfa   :  { %v3591_v0 = vpop.permute.xlu1 %823  ;;  %v3593_v3 = vpop.permute.xlu0 %1263 }
  0xfb   :  { %4981 = vst [vmem:[#allocation22_spill] sm:$0xff] %v3591_v0  ;;  %4982 = vst [vmem:[#allocation23_spill] sm:$0xff] %v3593_v3  ;;  %2801 = vset.pattern.permute.xlu1 %v4887_v7  ;;  %v612_v7 = vsub.s32 3, %v3627_v58 }
  0xfc   :  { %435 = vperm.xlu1 %2801, %v3429_v6  }
  0xfd   :  { %723 = vperm.xlu0 %2850, %v3473_v19   ;;  %v3696_v3 = vrot.slane %v3642_v28, %v612_v7 }
  0xff   :  { %v3598_v10 = vpop.permute.xlu1 %423  ;;  %v3600_v23 = vpop.permute.xlu0 %551 }
 0x100   :  { %439 = vperm.xlu1 %2801, %v3469_v18  }
 0x101   :  { %735 = vperm.xlu0 %2850, %v3477_v20  }
 0x103   :  { %v3606_v32 = vpop.permute.xlu0 %563 }
 0x104   :  { %4983 = vst [vmem:[#allocation24_spill] sm:$0xff] %v3606_v32  ;;  %2802 = vset.pattern.permute.xlu1 %v4885_v17  ;;  %v3609_v36 = vpop.permute.xlu1 %955  ;;  %v3676_v17 = vrot.slane %v3647_v42, %v476_v35 }
 0x105   :  { %4984 = vst [vmem:[#allocation25_spill] sm:$0xff] %v3609_v36  ;;  %743 = vperm.xlu0 %2850, %v3604_v31   ;;  %975 = vperm.xlu1 %2802, %v3488_v21  }
 0x107   :  { %v3613_v40 = vpop.permute.xlu0 %575 }
 0x108   :  { %4985 = vst [vmem:[#allocation26_spill] sm:$0xff] %v3613_v40 }
 0x109   :  { %2854 = vset.pattern.permute.xlu0 %v4889_v15  ;;  %2803 = vset.pattern.permute.xlu1 %v4883_v9  ;;  %v3617_v46 = vpop.permute.xlu1 %555  ;;  %v3673_v9 = vrot.slane %v3642_v28, %v476_v35  ;;  %v348_v35 = vmul.f32 %v3655_v47, %v3532_v29  ;;  %v485_v29 = vmul.f32 %v3676_v17, %v3541_v34 }
 0x10a   :  { %4986 = vst [vmem:[#allocation27_spill] sm:$0xff] %v3617_v46  ;;  %835 = vperm.xlu0 %2854, %v3464_v16   ;;  %571 = vperm.xlu1 %2803, %v3429_v6  }
 0x10b   :  { %v3621_v50 = vpop.permute.xlu0 %587  ;;  %v484_v33 = vmul.f32 %v3673_v9, %v3541_v34  ;;  %v4998_v34 = vmov 8  }
 0x10c   :  { %4987 = vst [vmem:[#allocation28_spill] sm:$0xff] %v3621_v50 }
 0x10d   :  { %v3623_v55 = vpop.permute.xlu1 %559 }
 0x10e   :  { %847 = vperm.xlu0 %2854, %v3469_v18   ;;  %2804 = vset.pattern.permute.xlu1 %v4895_v8 }
 0x10f   :  { %1107 = vperm.xlu1 %2804, %v3464_v16   ;;  %v3630_v59 = vpop.permute.xlu0 %599 }
 0x110   :  { %4988 = vst [vmem:[#allocation29_spill] sm:$0xff] %v3630_v59 }
 0x112   :  { %v3632_v4 = vpop.permute.xlu1 %1095  ;;  %859 = vperm.xlu0 %2854, %v3473_v19  }
 0x113   :  { %4989 = vst [vmem:[#allocation30_spill] sm:$0xff] %v3632_v4  ;;  %1111 = vperm.xlu1 %2804, %v3488_v21  }
 0x114   :  { %v3645_v39 = vpop.permute.xlu0 %112 }
 0x115   :  { %4992 = vst [vmem:[#allocation33_spill] sm:$0xff] %v3645_v39 }
 0x116   :  { %871 = vperm.xlu0 %2854, %v3477_v20  }
 0x117   :  { %2805 = vset.pattern.permute.xlu1 %v4893_v11  ;;  %v3666_v62 = vpop.permute.xlu1 %132  ;;  %v3684_v11 = vrot.slane %v230_v44, %v3636_v5  ;;  %v3699_v44 = vrot.slane %v3647_v42, %v612_v7 }
 0x118   :  { %4994 = vst [vmem:[#allocation35_spill] sm:$0xff] %v3666_v62  ;;  %v118_v15 = vpop.permute.xlu0 %117  ;;  %157 = vperm.xlu1 %2805, %v3443_v12  }
 0x119   :  { %v200_v8 = vmul.f32 %v3659_v51, %v118_v15  ;;  %v201_v14 = vmul.f32 %v3663_v54, %v118_v15  ;;  %v621_v7 = vmul.f32 %v3699_v44, %v3600_v23 }
 0x11a   :  { %875 = vperm.xlu0 %2854, %v3499_v24  }
 0x11b   :  { %v244_v13 = vadd.f32 %v3681_v2, %v200_v8  ;;  %v245_v59 = vadd.f32 %v3684_v11, %v201_v14  ;;  %v620_v14 = vmul.f32 %v3696_v3, %v3600_v23 }
 0x11c   :  { %2806 = vset.pattern.permute.xlu1 %v4995_v49  ;;  %v3702_v15 = vpop.permute.xlu1 %691  ;;  %v138_v50 = vpop.permute.xlu0 %137 }
 0x11d   :  { %4996 = vst [vmem:[#allocation36_spill] sm:$0xff] %v3702_v15  ;;  %v380_v8 = vadd.f32 %v348_v35, %v244_v13  ;;  %v381_v61 = vadd.f32 %v349_v1, %v245_v59  ;;  %707 = vperm.xlu1 %2806, %v3429_v6  }
 0x11e   :  { %2856 = vset.pattern.permute.xlu0 %v4997_v45 }
 0x11f   :  { %v516_v32 = vadd.f32 %v484_v33, %v380_v8  ;;  %v517_v40 = vadd.f32 %v485_v29, %v381_v61  ;;  %1399 = vperm.xlu0 %2856, %v3443_v12   ;;  %v3729_v33 = vld [vmem:[#allocation3 + $0x60] sm:$0xff]  ;;  %v5003_v61 = vmov 7   ;;  %v209_v29 = vmul.f32 %v3663_v54, %v138_v50 }
 0x120   :  { %v3715_v62 = vpop.permute.xlu1 %695  ;;  %v153_v4 = vpop.permute.xlu0 %152  ;;  %5002 = vst [vmem:[#allocation40_spill] sm:$0xff] %v3729_v33 }
 0x121   :  { %2807 = vset.pattern.permute.xlu1 %v4998_v34  ;;  %v3719_v1 = vadd.f32 %v620_v14, %v516_v32  ;;  %v3721_v13 = vadd.f32 %v621_v7, %v517_v40  ;;  %v5004_v32 = vmov 1   ;;  %v5006_v14 = vmov 5  }
 0x122   :  { %1243 = vperm.xlu1 %2807, %v3464_v16   ;;  %v215_v36 = vmul.f32 %v3663_v54, %v153_v4 }
 0x123   :  { %4999 = vst [vmem:[#allocation37_spill] sm:$0xff] %v3719_v1  ;;  %5000 = vst [vmem:[#allocation38_spill] sm:$0xff] %v3721_v13  ;;  %1415 = vperm.xlu0 %2856, %v3477_v20   ;;  %v208_v20 = vmul.f32 %v3659_v51, %v138_v50  ;;  %v204_v50 = vmul.f32 %v3659_v51, %v3562_v48 }
 0x124   :  { %v3724_v23 = vpop.permute.xlu0 %167 }
 0x125   :  { %v3726_v59 = vpop.permute.xlu1 %1231  ;;  %v248_v1 = vadd.f32 %v3681_v2, %v204_v50  ;;  %v5010_v50 = vmov 2  }
 0x126   :  { %5001 = vst [vmem:[#allocation39_spill] sm:$0xff] %v3726_v59  ;;  %1247 = vperm.xlu1 %2807, %v3488_v21   ;;  %v253_v59 = vadd.f32 %v3684_v11, %v209_v29 }
 0x127   :  { %2859 = vset.pattern.permute.xlu0 %v5003_v61 }
 0x128   :  { %v3732_v35 = vpop.permute.xlu0 %182  ;;  %1139 = vperm.xlu0 %2859, %v3729_v33   ;;  %v252_v33 = vadd.f32 %v3681_v2, %v208_v20 }
 0x12a   :  { %2808 = vset.pattern.permute.xlu1 %v5004_v32  ;;  %v3736_v40 = vpop.permute.xlu1 %291  ;;  %v259_v32 = vadd.f32 %v3684_v11, %v215_v36 }
 0x12b   :  { %5005 = vst [vmem:[#allocation41_spill] sm:$0xff] %v3736_v40  ;;  %311 = vperm.xlu1 %2808, %v3443_v12   ;;  %v214_v40 = vmul.f32 %v3659_v51, %v153_v4 }
 0x12c   :  { %1147 = vperm.xlu0 %2859, %v3499_v24  }
 0x12d   :  { %v3742_v8 = vpop.permute.xlu0 %287  ;;  %v258_v4 = vadd.f32 %v3681_v2, %v214_v40 }
 0x12e   :  { %v352_v20 = vmul.f32 %v3655_v47, %v3742_v8 }
 0x12f   :  { %2809 = vset.pattern.permute.xlu1 %v5006_v14  ;;  %v3745_v7 = vpop.permute.xlu1 %827 }
 0x130   :  { %5007 = vst [vmem:[#allocation42_spill] sm:$0xff] %v3745_v7  ;;  %843 = vperm.xlu1 %2809, %v3429_v6   ;;  %2863 = vset.pattern.permute.xlu0 %v4998_v34  ;;  %v384_v46 = vadd.f32 %v352_v20, %v248_v1 }
 0x131   :  { %v296_v24 = vpop.permute.xlu0 %295  ;;  %1287 = vperm.xlu0 %2863, %v3604_v31  }
 0x132   :  { %v356_v14 = vmul.f32 %v3655_v47, %v296_v24  ;;  %v357_v7 = vmul.f32 %v3670_v63, %v296_v24 }
 0x133   :  { %v3760_v29 = vpop.permute.xlu1 %831 }
 0x134   :  { %5008 = vst [vmem:[#allocation43_spill] sm:$0xff] %v3760_v29  ;;  %v3764_v15 = vadd.f32 %v356_v14, %v252_v33  ;;  %v3766_v60 = vadd.f32 %v357_v7, %v253_v59  ;;  %2810 = vset.pattern.permute.xlu1 %v4997_v45  ;;  %v488_v59 = vmul.f32 %v3673_v9, %v3598_v10 }
 0x135   :  { %1379 = vperm.xlu1 %2810, %v3464_v16   ;;  %v308_v31 = vpop.permute.xlu0 %307  ;;  %v4926_v16 = vsub.s32 4, %v3627_v58  ;;  %v624_v7 = vmul.f32 %v3696_v3, %v3623_v55 }
 0x136   :  { %v362_v24 = vmul.f32 %v3655_v47, %v308_v31  ;;  %v363_v34 = vmul.f32 %v3670_v63, %v308_v31  ;;  %v520_v14 = vadd.f32 %v488_v59, %v384_v46  ;;  %v4929_v46 = vsub.s32 7, %v3627_v58 }
 0x137   :  { %v5013_v59 = vmov 6  }
 0x138   :  { %v3773_v0 = vadd.f32 %v362_v24, %v258_v4  ;;  %v3775_v40 = vadd.f32 %v363_v34, %v259_v32  ;;  %v3777_v36 = vpop.permute.xlu1 %1367  ;;  %v3792_v32 = vrot.slane %v3642_v28, %v4926_v16  ;;  %v656_v20 = vadd.f32 %v624_v7, %v520_v14 }
 0x139   :  { %5009 = vst [vmem:[#allocation44_spill] sm:$0xff] %v3777_v36  ;;  %1383 = vperm.xlu1 %2810, %v3488_v21   ;;  %v320_v33 = vpop.permute.xlu0 %319  ;;  %v4928_v21 = vsub.s32 5, %v3627_v58  ;;  %v4930_v4 = vsub.s32 6, %v3627_v58  ;;  %v3815_v7 = vrot.slane %v3642_v28, %v4929_v46 }
 0x13a   :  { %v760_v31 = vmul.f32 %v3792_v32, %v3715_v62 }
 0x13b   :  { %v3809_v16 = vrot.slane %v3642_v28, %v4928_v21  ;;  %v1168_v46 = vmul.f32 %v3815_v7, %v3553_v41 }
 0x13c   :  { %v792_v14 = vadd.f32 %v760_v31, %v656_v20 }
 0x13d   :  { %2811 = vset.pattern.permute.xlu1 %v5010_v50  ;;  %v3786_v1 = vpop.permute.xlu1 %427  ;;  %v332_v34 = vpop.permute.xlu0 %331  ;;  %5015 = vst [vmem:[#allocation48_spill] sm:$0xff] %v3809_v16  ;;  %v896_v45 = vmul.f32 %v3809_v16, %v3760_v29 }
 0x13e   :  { %5011 = vst [vmem:[#allocation45_spill] sm:$0xff] %v3786_v1  ;;  %447 = vperm.xlu1 %2811, %v3443_v12   ;;  %v3804_v1 = vld [vmem:[#allocation6 + $0x10] sm:$0x3] }
 0x13f   :  { %v3826_v21 = vrot.slane %v3804_v1, %v3639_v27 }
 0x142   :  { %v3799_v24 = vpop.permute.xlu0 %411  ;;  %2812 = vset.pattern.permute.xlu1 %v5013_v59  ;;  %v3802_v50 = vpop.permute.xlu1 %963  ;;  %v3820_v59 = vrot.slane %v3642_v28, %v4930_v4  ;;  %v221_v28 = vmul.f32 %v3663_v54, %v3724_v23  ;;  %v928_v4 = vadd.f32 %v896_v45, %v792_v14  ;;  %v227_v45 = vmul.f32 %v3663_v54, %v3732_v35 }
 0x143   :  { %5012 = vst [vmem:[#allocation46_spill] sm:$0xff] %v3799_v24  ;;  %5014 = vst [vmem:[#allocation47_spill] sm:$0xff] %v3802_v50  ;;  %979 = vperm.xlu1 %2812, %v3429_v6   ;;  %v220_v6 = vmul.f32 %v3659_v51, %v3724_v23  ;;  %v5018_v50 = vmov 3   ;;  %v1304_v24 = vmul.f32 %v3826_v21, %v3581_v57  ;;  %v226_v23 = vmul.f32 %v3659_v51, %v3732_v35 }
 0x144   :  { %5016 = vst [vmem:[#allocation49_spill] sm:$0xff] %v3820_v59  ;;  %v265_v39 = vadd.f32 %v3684_v11, %v221_v28  ;;  %v271_v57 = vadd.f32 %v3684_v11, %v227_v45 }
 0x145   :  { %v264_v29 = vadd.f32 %v3681_v2, %v220_v6 }
 0x146   :  { %v3830_v20 = vpop.permute.xlu0 %419  ;;  %v3832_v31 = vpop.permute.xlu1 %967 }
 0x147   :  { %5017 = vst [vmem:[#allocation50_spill] sm:$0xff] %v3832_v31  ;;  %v1032_v36 = vmul.f32 %v3820_v59, %v3832_v31  ;;  %2813 = vset.pattern.permute.xlu1 %v5018_v50  ;;  %v368_v50 = vmul.f32 %v3655_v47, %v320_v33  ;;  %v369_v31 = vmul.f32 %v3670_v63, %v320_v33 }
 0x148   :  { %579 = vperm.xlu1 %2813, %v3493_v22  }
 0x149   :  { %v1064_v16 = vadd.f32 %v1032_v36, %v928_v4 }
 0x14a   :  { %v432_v13 = vpop.permute.xlu0 %431 }
 0x14b   :  { %v1200_v14 = vadd.f32 %v1168_v46, %v1064_v16  ;;  %v3850_v59 = vpop.permute.xlu1 %567  ;;  %v492_v36 = vmul.f32 %v3673_v9, %v432_v13  ;;  %v493_v4 = vmul.f32 %v3676_v17, %v432_v13  ;;  %v205_v46 = vmul.f32 %v3663_v54, %v3562_v48 }
 0x14c   :  { %5019 = vst [vmem:[#allocation51_spill] sm:$0xff] %v3850_v59  ;;  %583 = vperm.xlu1 %2813, %v3443_v12   ;;  %v270_v13 = vadd.f32 %v3681_v2, %v226_v23 }
 0x14d   :  { %v3857_v6 = vadd.f32 %v1304_v24, %v1200_v14  ;;  %v3860_v28 = vadd.f32 %v492_v36, %v3764_v15  ;;  %v3863_v35 = vadd.f32 %v493_v4, %v3766_v60  ;;  %v400_v24 = vadd.f32 %v368_v50, %v264_v29 }
 0x14e   :  { %v444_v16 = vpop.permute.xlu0 %443  ;;  %v401_v14 = vadd.f32 %v369_v31, %v265_v39  ;;  %v374_v60 = vmul.f32 %v3655_v47, %v332_v34  ;;  %v375_v36 = vmul.f32 %v3670_v63, %v332_v34  ;;  %v353_v29 = vmul.f32 %v3670_v63, %v3742_v8 }
 0x14f   :  { %5020 = vst [vmem:[#allocation52_spill] sm:$0xff] %v3857_v6  ;;  %5021 = vst [vmem:[#allocation53_spill] sm:$0xff] %v3860_v28  ;;  %v498_v33 = vmul.f32 %v3673_v9, %v444_v16  ;;  %v499_v59 = vmul.f32 %v3676_v17, %v444_v16  ;;  %v249_v23 = vadd.f32 %v3684_v11, %v205_v46 }
 0x150   :  { %5022 = vst [vmem:[#allocation54_spill] sm:$0xff] %v3863_v35  ;;  %2814 = vset.pattern.permute.xlu1 %v5003_v61  ;;  %v3872_v15 = vpop.permute.xlu1 %1099  ;;  %v406_v45 = vadd.f32 %v374_v60, %v270_v13  ;;  %v407_v34 = vadd.f32 %v375_v36, %v271_v57  ;;  %v3900_v57 = vrot.slane %v3804_v1, %v3636_v5 }
 0x151   :  { %v3877_v48 = vadd.f32 %v498_v33, %v3773_v0  ;;  %v3880_v4 = vadd.f32 %v499_v59, %v3775_v40  ;;  %1119 = vperm.xlu1 %2814, %v3469_v18   ;;  %v5027_v40 = vmov 0   ;;  %v385_v33 = vadd.f32 %v353_v29, %v249_v23 }
 0x152   :  { %v456_v39 = vpop.permute.xlu0 %455  ;;  %v489_v46 = vmul.f32 %v3676_v17, %v3598_v10  ;;  %v203_v1 = vmul.f32 %v3663_v54, %v3556_v43 }
 0x153   :  { %5023 = vst [vmem:[#allocation55_spill] sm:$0xff] %v3877_v48  ;;  %5024 = vst [vmem:[#allocation56_spill] sm:$0xff] %v3880_v4  ;;  %v504_v50 = vmul.f32 %v3673_v9, %v456_v39  ;;  %v505_v31 = vmul.f32 %v3676_v17, %v456_v39  ;;  %v109_v4 = vld [vmem:[#allocation6 + $0x18] sm:$0x3] }
 0x154   :  { %v3905_v13 = vrot.slane %v109_v4, %v3636_v5  ;;  %v521_v23 = vadd.f32 %v489_v46, %v385_v33  ;;  %v3950_v46 = vmul.f32 %v3900_v57, %v3529_v26  ;;  %v3989_v5 = vmul.f32 %v3699_v44, %v3549_v38 }
 0x155   :  { %v3888_v16 = vadd.f32 %v504_v50, %v400_v24  ;;  %v3890_v0 = vadd.f32 %v505_v31, %v401_v14  ;;  %2815 = vset.pattern.permute.xlu1 %v5027_v40  ;;  %v3893_v59 = vpop.permute.xlu1 %142  ;;  %v5029_v24 = vsub.s32 7, %v3627_v58  ;;  %v5033_v50 = vsub.s32 4, %v3627_v58 }
 0x156   :  { %5028 = vst [vmem:[#allocation59_spill] sm:$0xff] %v3893_v59  ;;  %162 = vperm.xlu1 %2815, %v3473_v19   ;;  %v468_v8 = vpop.permute.xlu0 %467  ;;  %v3926_v31 = vrot.slane %v109_v4, %v3639_v27  ;;  %5037 = vst [vmem:[#allocation64_spill] sm:$0xff] %v3950_v46 }
 0x157   :  { %5025 = vst [vmem:[#allocation57_spill] sm:$0xff] %v3888_v16  ;;  %5026 = vst [vmem:[#allocation58_spill] sm:$0xff] %v3890_v0  ;;  %v510_v48 = vmul.f32 %v3673_v9, %v468_v8  ;;  %v511_v39 = vmul.f32 %v3676_v17, %v468_v8  ;;  %v3910_v14 = vrot.slane %v3647_v42, %v5029_v24 }
 0x158   :  { %v3923_v10 = vrot.slane %v3647_v42, %v5033_v50  ;;  %5034 = vst [vmem:[#allocation63_spill] sm:$0xff] %v3926_v31  ;;  %v351_v24 = vmul.f32 %v3670_v63, %v3578_v56  ;;  %v625_v50 = vmul.f32 %v3699_v44, %v3623_v55  ;;  %v247_v55 = vadd.f32 %v3684_v11, %v203_v1 }
 0x159   :  { %v3912_v60 = vadd.f32 %v510_v48, %v406_v45  ;;  %v3914_v36 = vadd.f32 %v511_v39, %v407_v34  ;;  %v3916_v29 = vpop.permute.xlu1 %147  ;;  %v3931_v48 = vmul.f32 %v3655_v47, %v3527_v25  ;;  %v3935_v45 = vmul.f32 %v3670_v63, %v3527_v25 }
 0x15a   :  { %5032 = vst [vmem:[#allocation62_spill] sm:$0xff] %v3916_v29  ;;  %2816 = vset.pattern.permute.xlu1 %v4995_v49  ;;  %v5035_v34 = vsub.s32 5, %v3627_v58  ;;  %v5036_v39 = vsub.s32 6, %v3627_v58  ;;  %v202_v25 = vmul.f32 %v3659_v51, %v3556_v43  ;;  %v3960_v58 = vmul.f32 %v3905_v13, %v3529_v26  ;;  %v5047_v49 = vld [vmem:[#allocation27_spill] sm:$0xff] }
 0x15b   :  { %5030 = vst [vmem:[#allocation60_spill] sm:$0xff] %v3912_v60  ;;  %5031 = vst [vmem:[#allocation61_spill] sm:$0xff] %v3914_v36  ;;  %v960_v33 = vpop.permute.xlu0 %959  ;;  %715 = vperm.xlu1 %2816, %v3493_v22   ;;  %v3972_v43 = vmul.f32 %v3815_v7, %v3546_v37  ;;  %v657_v26 = vadd.f32 %v625_v50, %v521_v23  ;;  %v487_v36 = vmul.f32 %v3676_v17, %v3830_v20 }
 0x15c   :  { %v3940_v8 = vrot.slane %v3647_v42, %v5035_v34  ;;  %v3945_v4 = vrot.slane %v3647_v42, %v5036_v39  ;;  %5038 = vst [vmem:[#allocation65_spill] sm:$0xff] %v3960_v58  ;;  %v3964_v42 = vmul.f32 %v3900_v57, %v3534_v30  ;;  %v3968_v34 = vmul.f32 %v3905_v13, %v3534_v30 }
 0x15d   :  { %v3976_v39 = vmul.f32 %v3910_v14, %v3546_v37  ;;  %v3985_v30 = vmul.f32 %v3696_v3, %v3549_v38  ;;  %v3993_v37 = vmul.f32 %v3910_v14, %v3553_v41  ;;  %v350_v1 = vmul.f32 %v3655_v47, %v3578_v56  ;;  %v5043_v56 = vld [vmem:[#allocation33_spill] sm:$0xff] }
 0x15e   :  { %5039 = vst [vmem:[#allocation66_spill] sm:$0xff] %v3964_v42  ;;  %v3981_v60 = vpop.permute.xlu1 %703  ;;  %v246_v50 = vadd.f32 %v3681_v2, %v202_v25  ;;  %v757_v27 = vmul.f32 %v3923_v10, %v3570_v52  ;;  %v383_v0 = vadd.f32 %v351_v24, %v247_v55  ;;  %v761_v38 = vmul.f32 %v3923_v10, %v3715_v62  ;;  %v5045_v62 = vld [vmem:[#allocation38_spill] sm:$0xff] }
 0x15f   :  { %5040 = vst [vmem:[#allocation67_spill] sm:$0xff] %v3981_v60  ;;  %719 = vperm.xlu1 %2816, %v3443_v12   ;;  %v3998_v23 = vpop.permute.xlu0 %971  ;;  %v756_v41 = vmul.f32 %v3792_v32, %v3570_v52  ;;  %v4009_v16 = vmul.f32 %v3826_v21, %v3573_v53  ;;  %v198_v12 = vmul.f32 %v3659_v51, %v5043_v56  ;;  %v5046_v52 = vld [vmem:[#allocation22_spill] sm:$0xff] }
 0x160   :  { %5041 = vst [vmem:[#allocation68_spill] sm:$0xff] %v3998_v23  ;;  %v486_v25 = vmul.f32 %v3673_v9, %v3830_v20  ;;  %v4017_v59 = vmul.f32 %v3926_v31, %v3573_v53  ;;  %v793_v24 = vadd.f32 %v761_v38, %v657_v26  ;;  %v519_v55 = vadd.f32 %v487_v36, %v383_v0  ;;  %v5050_v26 = vld [vmem:[#allocation43_spill] sm:$0xff] }
 0x161   :  { %5042 = vst [vmem:[#allocation69_spill] sm:$0xff] %v4009_v16  ;;  %v789_v35 = vadd.f32 %v757_v27, %v5045_v62  ;;  %v382_v28 = vadd.f32 %v350_v1, %v246_v50  ;;  %v893_v60 = vmul.f32 %v3940_v8, %v5046_v52  ;;  %v623_v40 = vmul.f32 %v3699_v44, %v5047_v49  ;;  %v5051_v27 = vld [vmem:[#allocation50_spill] sm:$0xff]  ;;  %v5052_v1 = vld [vmem:[#allocation37_spill] sm:$0xff]  ;;  %v5053_v62 = vld [vmem:[#allocation19_spill] sm:$0xff] }
 0x162   :  { %5044 = vst [vmem:[#allocation33_spill] sm:$0xff] %v4017_v59  ;;  %v199_v61 = vmul.f32 %v3663_v54, %v5043_v56  ;;  %v5048_v23 = vmov 8   ;;  %v897_v0 = vmul.f32 %v3940_v8, %v5050_v26  ;;  %v1033_v36 = vmul.f32 %v3945_v4, %v5051_v27  ;;  %v5055_v59 = vld [vmem:[#allocation49_spill] sm:$0xff]  ;;  %v5056_v16 = vld [vmem:[#allocation20_spill] sm:$0xff] }
 0x163   :  { %2817 = vset.pattern.permute.xlu1 %v5048_v23  ;;  %v4027_v20 = vpop.permute.xlu1 %1235  ;;  %v4029_v53 = vpop.permute.xlu0 %983  ;;  %v788_v50 = vadd.f32 %v756_v41, %v5052_v1  ;;  %v1029_v38 = vmul.f32 %v3945_v4, %v960_v33  ;;  %v1305_v56 = vmul.f32 %v3926_v31, %v5053_v62  ;;  %v5054_v23 = vld [vmem:[#allocation48_spill] sm:$0xff]  ;;  %v518_v6 = vadd.f32 %v486_v25, %v382_v28  ;;  %v5059_v28 = vld [vmem:[#allocation46_spill] sm:$0xff] }
 0x164   :  { %5049 = vst [vmem:[#allocation38_spill] sm:$0xff] %v4029_v53  ;;  %1255 = vperm.xlu1 %2817, %v3469_v18   ;;  %v892_v42 = vmul.f32 %v5054_v23, %v5046_v52  ;;  %v242_v53 = vadd.f32 %v3681_v2, %v198_v12  ;;  %v929_v46 = vadd.f32 %v897_v0, %v793_v24  ;;  %v5057_v62 = vld [vmem:[#allocation36_spill] sm:$0xff]  ;;  %v5060_v12 = vmov 1   ;;  %v5062_v24 = vld [vmem:[#allocation25_spill] sm:$0xff] }
 0x165   :  { %v655_v26 = vadd.f32 %v623_v40, %v519_v55  ;;  %v925_v58 = vadd.f32 %v893_v60, %v789_v35  ;;  %v1028_v27 = vmul.f32 %v5055_v59, %v960_v33  ;;  %v4046_v41 = vmul.f32 %v5054_v23, %v5056_v16 }
 0x166   :  { %v622_v18 = vmul.f32 %v3696_v3, %v5047_v49  ;;  %v243_v1 = vadd.f32 %v3684_v11, %v199_v61  ;;  %v759_v52 = vmul.f32 %v3923_v10, %v5057_v62  ;;  %v482_v40 = vmul.f32 %v3673_v9, %v5059_v28 }
 0x167   :  { %v4053_v29 = vpop.permute.xlu0 %995  ;;  %v1065_v35 = vadd.f32 %v1033_v36, %v929_v46  ;;  %v924_v60 = vadd.f32 %v892_v42, %v788_v50  ;;  %v1061_v33 = vadd.f32 %v1029_v38, %v925_v58  ;;  %v891_v49 = vmul.f32 %v3940_v8, %v5056_v16  ;;  %v5063_v46 = vld [vmem:[#allocation30_spill] sm:$0xff]  ;;  %v5064_v38 = vld [vmem:[#allocation35_spill] sm:$0xff] }
 0x168   :  { %5058 = vst [vmem:[#allocation22_spill] sm:$0xff] %v4053_v29  ;;  %2818 = vset.pattern.permute.xlu1 %v5060_v12  ;;  %v4058_v25 = vpop.permute.xlu1 %299  ;;  %v4064_v61 = vmul.f32 %v5055_v59, %v5062_v24  ;;  %v483_v55 = vmul.f32 %v3676_v17, %v5059_v28  ;;  %v654_v0 = vadd.f32 %v622_v18, %v518_v6 }
 0x169   :  { %5061 = vst [vmem:[#allocation27_spill] sm:$0xff] %v4058_v25  ;;  %315 = vperm.xlu1 %2818, %v3473_v19   ;;  %v1165_v58 = vmul.f32 %v3910_v14, %v5063_v46  ;;  %v378_v42 = vadd.f32 %v3931_v48, %v242_v53  ;;  %v791_v36 = vadd.f32 %v759_v52, %v655_v26  ;;  %v5066_v19 = vld [vmem:[#allocation42_spill] sm:$0xff] }
 0x16a   :  { %v1060_v50 = vadd.f32 %v1028_v27, %v924_v60  ;;  %v1164_v16 = vmul.f32 %v3815_v7, %v5063_v46  ;;  %v206_v29 = vmul.f32 %v3659_v51, %v5064_v38  ;;  %v758_v25 = vmul.f32 %v3792_v32, %v5057_v62  ;;  %v5067_v52 = vld [vmem:[#allocation26_spill] sm:$0xff] }
 0x16b   :  { %v379_v6 = vadd.f32 %v3935_v45, %v243_v1  ;;  %v4079_v18 = vpop.permute.xlu0 %1007  ;;  %v895_v28 = vmul.f32 %v3940_v8, %v5066_v19  ;;  %v514_v12 = vadd.f32 %v482_v40, %v378_v42  ;;  %v1201_v48 = vadd.f32 %v3993_v37, %v1065_v35  ;;  %v5069_v40 = vld [vmem:[#allocation39_spill] sm:$0xff] }
 0x16c   :  { %5065 = vst [vmem:[#allocation43_spill] sm:$0xff] %v4079_v18  ;;  %v1197_v53 = vadd.f32 %v1165_v58, %v1061_v33  ;;  %v4084_v26 = vpop.permute.xlu1 %303  ;;  %v1027_v27 = vmul.f32 %v3945_v4, %v5062_v24  ;;  %v4090_v60 = vmul.f32 %v3696_v3, %v5067_v52  ;;  %v790_v45 = vadd.f32 %v758_v25, %v654_v0  ;;  %v5070_v0 = vld [vmem:[#allocation47_spill] sm:$0xff] }
 0x16d   :  { %v515_v62 = vadd.f32 %v483_v55, %v379_v6  ;;  %v5068_v1 = vmov 5   ;;  %v4095_v46 = vmul.f32 %v3699_v44, %v5067_v52  ;;  %v1301_v37 = vmul.f32 %v3926_v31, %v5069_v40 }
 0x16e   :  { %2819 = vset.pattern.permute.xlu1 %v5068_v1  ;;  %v927_v35 = vadd.f32 %v895_v28, %v791_v36  ;;  %v1196_v33 = vadd.f32 %v1164_v16, %v1060_v50  ;;  %v207_v24 = vmul.f32 %v3663_v54, %v5064_v38  ;;  %v250_v58 = vadd.f32 %v3681_v2, %v206_v29 }
 0x16f   :  { %851 = vperm.xlu1 %2819, %v3493_v22   ;;  %v1300_v25 = vmul.f32 %v3826_v21, %v5069_v40  ;;  %v894_v55 = vmul.f32 %v5054_v23, %v5066_v19  ;;  %v1031_v42 = vmul.f32 %v3945_v4, %v5070_v0  ;;  %v1337_v6 = vadd.f32 %v1305_v56, %v1201_v48  ;;  %v5071_v40 = vld [vmem:[#allocation44_spill] sm:$0xff] }
 0x170   :  { %v1333_v52 = vadd.f32 %v1301_v37, %v1197_v53  ;;  %v684_v36 = vpop.permute.xlu0 %683  ;;  %v650_v50 = vadd.f32 %v3985_v30, %v514_v12  ;;  %v651_v16 = vadd.f32 %v3989_v5, %v515_v62  ;;  %v1437_v19 = vmul.f32 %v3905_v13, %v5071_v40  ;;  %v4119_v53 = vld [vmem:[#allocation3 + $0x48] sm:$0xff] }
 0x171   :  { %v926_v22 = vadd.f32 %v894_v55, %v790_v45  ;;  %v754_v38 = vmul.f32 %v3792_v32, %v684_v36  ;;  %v755_v29 = vmul.f32 %v3923_v10, %v684_v36  ;;  %v4113_v28 = vpop.permute.xlu1 %839  ;;  %v1063_v18 = vadd.f32 %v1031_v42, %v927_v35  ;;  %v5072_v30 = vld [vmem:[#allocation41_spill] sm:$0xff] }
 0x172   :  { %v1167_v56 = vmul.f32 %v3910_v14, %v3872_v15  ;;  %v1332_v48 = vadd.f32 %v1300_v25, %v1196_v33  ;;  %v354_v5 = vmul.f32 %v3655_v47, %v5072_v30  ;;  %v1030_v12 = vmul.f32 %v5055_v59, %v5070_v0 }
 0x173   :  { %855 = vperm.xlu1 %2819, %v4119_v53   ;;  %v786_v62 = vadd.f32 %v754_v38, %v650_v50  ;;  %v787_v45 = vadd.f32 %v755_v29, %v651_v16  ;;  %v1436_v37 = vmul.f32 %v3900_v57, %v5071_v40  ;;  %v1303_v35 = vmul.f32 %v3926_v31, %v4027_v20 }
 0x174   :  { %v4130_v55 = vpop.permute.xlu0 %699  ;;  %v1469_v33 = vadd.f32 %v1437_v19, %v1333_v52  ;;  %v1473_v25 = vadd.f32 %v3968_v34, %v1337_v6  ;;  %v1062_v42 = vadd.f32 %v1030_v12, %v926_v22  ;;  %v1166_v36 = vmul.f32 %v3815_v7, %v3872_v15  ;;  %v5075_v12 = vld [vmem:[#allocation45_spill] sm:$0xff] }
 0x175   :  { %v922_v1 = vadd.f32 %v4046_v41, %v786_v62  ;;  %v923_v0 = vadd.f32 %v891_v49, %v787_v45  ;;  %v251_v50 = vadd.f32 %v3684_v11, %v207_v24  ;;  %v355_v16 = vmul.f32 %v3670_v63, %v5072_v30  ;;  %v3155_v41 = vld [vmem:[#allocation3 + $0x38] sm:$0xff] }
 0x176   :  { %v1199_v38 = vadd.f32 %v1167_v56, %v1063_v18  ;;  %v1468_v29 = vadd.f32 %v1436_v37, %v1332_v48  ;;  %v5073_v40 = vmov 9   ;;  %v1372_v31 = vpop.permute.xlu1 %1371  ;;  %v4140_v52 = vadd.f32 %v354_v5, %v250_v58  ;;  %v5074_v5 = vld [vmem:[#allocation62_spill] sm:$0xff]  ;;  %v5076_v37 = vld [vmem:[#allocation69_spill] sm:$0xff] }
 0x177   :  { %2821 = vset.pattern.permute.xlu1 %v5073_v40  ;;  %v1302_v34 = vmul.f32 %v3826_v21, %v4027_v20  ;;  %v1058_v15 = vadd.f32 %v4064_v61, %v922_v1  ;;  %v1059_v6 = vadd.f32 %v1027_v27, %v923_v0  ;;  %v1439_v24 = vmul.f32 %v3905_v13, %v1372_v31  ;;  %v4164_v0 = vld [vmem:[#allocation3 + $0x50] sm:$0xff] }
 0x178   :  { %1391 = vperm.xlu1 %2821, %v3155_v41   ;;  %v1335_v49 = vadd.f32 %v1303_v35, %v1199_v38  ;;  %v712_v22 = vpop.permute.xlu0 %711  ;;  %v1501_v19 = vmul.f32 0.5, %v1469_v33  ;;  %v1505_v18 = vmul.f32 0.5, %v1473_v25  ;;  %v1198_v56 = vadd.f32 %v1166_v36, %v1062_v42  ;;  %5079 = vst [vmem:[#allocation50_spill] sm:$0xff] %v4164_v0 }
 0x179   :  { %v1194_v48 = vadd.f32 %v3972_v43, %v1058_v15  ;;  %v1195_v58 = vadd.f32 %v3976_v39, %v1059_v6  ;;  %v1438_v30 = vmul.f32 %v3900_v57, %v1372_v31  ;;  %v212_v20 = vmul.f32 %v3659_v51, %v5074_v5  ;;  %v5078_v39 = vld [vmem:[#allocation33_spill] sm:$0xff]  ;;  %v5082_v6 = vld [vmem:[#allocation64_spill] sm:$0xff] }
 0x17a   :  { %v213_v61 = vmul.f32 %v3663_v54, %v5074_v5  ;;  %v1471_v27 = vadd.f32 %v1439_v24, %v1335_v49  ;;  %v1500_v1 = vmul.f32 0.5, %v1468_v29  ;;  %v490_v62 = vmul.f32 %v3673_v9, %v5075_v12  ;;  %v5083_v5 = vld [vmem:[#allocation52_spill] sm:$0xff] }
 0x17b   :  { %v1334_v45 = vadd.f32 %v1302_v34, %v1198_v56  ;;  %v1330_v35 = vadd.f32 %v5076_v37, %v1194_v48  ;;  %v5077_v33 = vmov 2   ;;  %v4157_v43 = vpop.permute.xlu1 %435  ;;  %v1331_v31 = vadd.f32 %v5078_v39, %v1195_v58  ;;  %v5081_v34 = vld [vmem:[#allocation65_spill] sm:$0xff]  ;;  %v4183_v39 = vld [vmem:[#allocation3 + $0x40] sm:$0xff] }
 0x17c   :  { %2822 = vset.pattern.permute.xlu1 %v5077_v33  ;;  %v360_v25 = vmul.f32 %v3655_v47, %v4084_v26  ;;  %v361_v42 = vmul.f32 %v3670_v63, %v4084_v26  ;;  %v1503_v36 = vmul.f32 0.5, %v1471_v27  ;;  %v4167_v38 = vpop.permute.xlu0 %723  ;;  %2962 = vtanh.f32 %v1501_v19  ;;  %v5084_v19 = vld [vmem:[#allocation66_spill] sm:$0xff] }
 0x17d   :  { %451 = vperm.xlu1 %2822, %v4164_v0   ;;  %5080 = vst [vmem:[#allocation37_spill] sm:$0xff] %v4167_v38  ;;  %v1470_v29 = vadd.f32 %v1438_v30, %v1334_v45  ;;  %v1467_v15 = vadd.f32 %v5081_v34, %v1331_v31  ;;  %v1466_v41 = vadd.f32 %v5082_v6, %v1330_v35  ;;  %2964 = vtanh.f32 %v1505_v18 }
 0x17e   :  { %v491_v49 = vmul.f32 %v3676_v17, %v5075_v12  ;;  %v256_v24 = vadd.f32 %v3681_v2, %v212_v20  ;;  %v257_v26 = vadd.f32 %v3684_v11, %v213_v61  ;;  %2966 = vtanh.f32 %v1500_v1 }
 0x17f   :  { %2968 = vtanh.f32 %v1503_v36  ;;  %v440_v56 = vpop.permute.xlu1 %439  ;;  %v1499_v48 = vmul.f32 0.5, %v1467_v15  ;;  %v1498_v58 = vmul.f32 0.5, %v1466_v41  ;;  %v1472_v30 = vadd.f32 %v5084_v19, %v5083_v5  ;;  %v5087_v36 = vld [vmem:[#allocation24_spill] sm:$0xff] }
 0x180   :  { %v392_v27 = vadd.f32 %v360_v25, %v256_v24  ;;  %v393_v45 = vadd.f32 %v361_v42, %v257_v26  ;;  %v496_v37 = vmul.f32 %v3673_v9, %v440_v56  ;;  %v497_v18 = vmul.f32 %v3676_v17, %v440_v56  ;;  %v4180_v12 = vpop.permute.xlu0 %735  ;;  %v5089_v19 = vld [vmem:[#allocation68_spill] sm:$0xff] }
 0x181   :  { %v5085_v35 = vmov 6   ;;  %5086 = vst [vmem:[#allocation19_spill] sm:$0xff] %v4180_v12  ;;  %v387_v20 = vadd.f32 %v355_v16, %v251_v50  ;;  %v1502_v61 = vmul.f32 0.5, %v1470_v29  ;;  %v768_v1 = vmul.f32 %v3792_v32, %v712_v22 }
 0x182   :  { %2823 = vset.pattern.permute.xlu1 %v5085_v35  ;;  %2970 = vtanh.f32 %v1499_v48  ;;  %v769_v31 = vmul.f32 %v3923_v10, %v712_v22  ;;  %v528_v25 = vadd.f32 %v496_v37, %v392_v27  ;;  %v529_v42 = vadd.f32 %v497_v18, %v393_v45 }
 0x183   :  { %987 = vperm.xlu1 %2823, %v4183_v39   ;;  %2972 = vtanh.f32 %v1498_v58  ;;  %v626_v34 = vmul.f32 %v3696_v3, %v5087_v36  ;;  %v627_v15 = vmul.f32 %v3699_v44, %v5087_v36  ;;  %v1504_v50 = vmul.f32 0.5, %v1472_v30 }
 0x184   :  { %v522_v16 = vadd.f32 %v490_v62, %v4140_v52  ;;  %v523_v29 = vadd.f32 %v491_v49, %v387_v20  ;;  %v664_v6 = vadd.f32 %v4090_v60, %v528_v25  ;;  %v665_v41 = vadd.f32 %v4095_v46, %v529_v42  ;;  %v4194_v24 = vpop.permute.xlu1 %975  ;;  %v4196_v22 = vpop.permute.xlu0 %743 }
 0x185   :  { %5088 = vst [vmem:[#allocation48_spill] sm:$0xff] %v4196_v22  ;;  %2974 = vtanh.f32 %v1502_v61  ;;  %v762_v56 = vmul.f32 %v3792_v32, %v4130_v55  ;;  %v763_v48 = vmul.f32 %v3923_v10, %v4130_v55  ;;  %v1034_v30 = vmul.f32 %v5055_v59, %v5089_v19 }
 0x186   :  { %v2963_v26 = vpop.eup %2962  ;;  %v800_v52 = vadd.f32 %v768_v1, %v664_v6  ;;  %v801_v62 = vadd.f32 %v769_v31, %v665_v41  ;;  %2976 = vtanh.f32 %v1504_v50  ;;  %v658_v46 = vadd.f32 %v626_v34, %v522_v16  ;;  %v4212_v31 = vld [vmem:[#allocation3 + $0x58] sm:$0xff] }
 0x187   :  { %991 = vperm.xlu1 %2823, %v4119_v53   ;;  %v2965_v49 = vpop.eup %2964  ;;  %v659_v58 = vadd.f32 %v627_v15, %v523_v29  ;;  %v1035_v53 = vmul.f32 %v3945_v4, %v5089_v19  ;;  %v5090_v45 = vmov 3   ;;  %v1565_v55 = vmul.f32 0.5, %v2963_v26  ;;  %v5091_v15 = vld [vmem:[#allocation38_spill] sm:$0xff] }
 0x188   :  { %v2967_v60 = vpop.eup %2966  ;;  %v794_v18 = vadd.f32 %v762_v56, %v658_v46  ;;  %v1040_v50 = vmul.f32 %v5055_v59, %v5091_v15  ;;  %v1569_v6 = vmul.f32 0.5, %v2965_v49  ;;  %v1041_v41 = vmul.f32 %v3945_v4, %v5091_v15 }
 0x189   :  { %v2969_v5 = vpop.eup %2968  ;;  %v836_v27 = vpop.permute.xlu0 %835  ;;  %v795_v20 = vadd.f32 %v763_v48, %v659_v58  ;;  %v1564_v42 = vmul.f32 0.5, %v2967_v60  ;;  %v1597_v48 = vadd.f32 0.5, %v1565_v55  ;;  %v5095_v38 = vmov 0  }
 0x18a   :  { %v4208_v37 = vpop.permute.xlu1 %571  ;;  %v898_v61 = vmul.f32 %v5054_v23, %v836_v27  ;;  %v899_v1 = vmul.f32 %v3940_v8, %v836_v27  ;;  %v1567_v36 = vmul.f32 0.5, %v2969_v5  ;;  %v5092_v27 = vmov 7  }
 0x18b   :  { %2824 = vset.pattern.permute.xlu1 %v5090_v45 }
 0x18c   :  { %591 = vperm.xlu1 %2824, %v4212_v31   ;;  %v2971_v25 = vpop.eup %2970  ;;  %v930_v16 = vadd.f32 %v898_v61, %v794_v18  ;;  %v931_v29 = vadd.f32 %v899_v1, %v795_v20  ;;  %v1596_v1 = vadd.f32 0.5, %v1564_v42 }
 0x18d   :  { %v2973_v34 = vpop.eup %2972  ;;  %v848_v26 = vpop.permute.xlu0 %847  ;;  %v1563_v56 = vmul.f32 0.5, %v2971_v25  ;;  %v1599_v25 = vadd.f32 0.5, %v1567_v36  ;;  %v4235_v36 = vld [vmem:[#allocation3 + $0x68] sm:$0xff] }
 0x18e   :  { %v1562_v46 = vmul.f32 0.5, %v2973_v34  ;;  %v4219_v58 = vadd.f32 %v1034_v30, %v930_v16  ;;  %v4221_v19 = vadd.f32 %v1035_v53, %v931_v29  ;;  %v904_v60 = vmul.f32 %v5054_v23, %v848_v26  ;;  %v1108_v18 = vpop.permute.xlu1 %1107 }
 0x18f   :  { %v905_v5 = vmul.f32 %v3940_v8, %v848_v26  ;;  %v2975_v20 = vpop.eup %2974  ;;  %v1595_v49 = vadd.f32 0.5, %v1563_v56  ;;  %v1601_v16 = vadd.f32 0.5, %v1569_v6  ;;  %v5096_v56 = vld [vmem:[#allocation40_spill] sm:$0xff] }
 0x190   :  { %2825 = vset.pattern.permute.xlu1 %v5092_v27  ;;  %v1594_v61 = vadd.f32 0.5, %v1562_v46  ;;  %v936_v55 = vadd.f32 %v904_v60, %v800_v52  ;;  %v2977_v30 = vpop.eup %2976  ;;  %v1566_v12 = vmul.f32 0.5, %v2975_v20  ;;  %v5099_v46 = vmov 8  }
 0x191   :  { %1123 = vperm.xlu1 %2825, %v4183_v39   ;;  %v937_v34 = vadd.f32 %v905_v5, %v801_v62  ;;  %v1627_v15 = vpack.c.bf16 %v1597_v48, %v1595_v49  ;;  %v1629_v0 = vpack.c.bf16 %v1601_v16, %v1599_v25  ;;  %v1568_v42 = vmul.f32 0.5, %v2977_v30  ;;  %v5101_v5 = vld [vmem:[#allocation51_spill] sm:$0xff] }
 0x192   :  { %v1626_v53 = vpack.c.bf16 %v1596_v1, %v1594_v61  ;;  %v4227_v29 = vadd.f32 %v1040_v50, %v936_v55  ;;  %v1112_v26 = vpop.permute.xlu1 %1111  ;;  %v1598_v52 = vadd.f32 0.5, %v1566_v12  ;;  %v5100_v12 = vmov 1   ;;  %v5103_v1 = vld [vmem:[#allocation67_spill] sm:$0xff] }
 0x193   :  { %v4229_v22 = vadd.f32 %v1041_v41, %v937_v34  ;;  %1878 = vmatprep.mubr.bf16.mxu0 %v1627_v15  ;;  %v1600_v50 = vadd.f32 0.5, %v1568_v42  ;;  %v5098_v41 = vmov 4   ;;  %v628_v20 = vmul.f32 %v3696_v3, %v5101_v5  ;;  %v5104_v34 = vld [vmem:[#allocation53_spill] sm:$0xff]  ;;  %v5105_v15 = vld [vmem:[#allocation54_spill] sm:$0xff] }
 0x194   :  { %5093 = vst [vmem:[#allocation49_spill] sm:$0xff] %v4227_v29  ;;  %1879 = vmatmul.mubr.bf16.vlgmr.msra.gmra.mrb[0].mxu0 %v1626_v53  ;;  %v629_v49 = vmul.f32 %v3699_v44, %v5101_v5  ;;  %v764_v25 = vmul.f32 %v3792_v32, %v5103_v1  ;;  %v765_v55 = vmul.f32 %v3923_v10, %v5103_v1 }
 0x195   :  { %5094 = vst [vmem:[#allocation20_spill] sm:$0xff] %v4229_v22  ;;  %2827 = vset.pattern.permute.xlu1 %v5095_v38  ;;  %1888 = vmatprep.mubr.bf16.mxu0 %v1629_v0  ;;  %v1628_v6 = vpack.c.bf16 %v1600_v50, %v1598_v52  ;;  %v660_v30 = vadd.f32 %v628_v20, %v5104_v34  ;;  %v5107_v34 = vld [vmem:[#allocation63_spill] sm:$0xff] }
 0x196   :  { %172 = vperm.xlu1 %2827, %v5096_v56   ;;  %v661_v53 = vadd.f32 %v629_v49, %v5105_v15  ;;  %v900_v16 = vmul.f32 %v5054_v23, %v4113_v28  ;;  %v901_v42 = vmul.f32 %v3940_v8, %v4113_v28  ;;  %v1170_v52 = vmul.f32 %v3815_v7, %v1108_v18 }
 0x197   :  { %v4233_v62 = vpop.permute.xlu1 %157  ;;  %v1171_v50 = vmul.f32 %v3910_v14, %v1108_v18  ;;  %v1036_v20 = vmul.f32 %v5055_v59, %v4194_v24  ;;  %v1037_v49 = vmul.f32 %v3945_v4, %v4194_v24  ;;  %v1172_v29 = vmul.f32 %v3815_v7, %v1112_v26 }
 0x198   :  { %5097 = vst [vmem:[#allocation36_spill] sm:$0xff] %v4233_v62  ;;  %v797_v1 = vadd.f32 %v765_v55, %v661_v53  ;;  %v1173_v62 = vmul.f32 %v3910_v14, %v1112_v26  ;;  %v1202_v24 = vadd.f32 %v1170_v52, %v4219_v58  ;;  %v5109_v58 = vld [vmem:[#allocation27_spill] sm:$0xff] }
 0x199   :  { %v1203_v53 = vadd.f32 %v1171_v50, %v4221_v19  ;;  %v358_v19 = vmul.f32 %v3655_v47, %v5109_v58 }
 0x19a   :  { %177 = vperm.xlu1 %2827, %v4235_v36   ;;  %v933_v18 = vadd.f32 %v901_v42, %v797_v1 }
 0x19c   :  { %1889 = vmatmul.mubr.bf16.gmra.mrb[4].mxu0 %v1628_v6  ;;  %v4239_v48 = vpop.permute.xlu1 %707  ;;  %v5106_v6 = vmov 5  }
 0x19e   :  { %2828 = vset.pattern.permute.xlu1 %v5098_v41 }
 0x19f   :  { %727 = vperm.xlu1 %2828, %v4212_v31  }
 0x1a1   :  { %v1244_v60 = vpop.permute.xlu1 %1243 }
 0x1a2   :  { %v1306_v28 = vmul.f32 %v3826_v21, %v1244_v60  ;;  %v1307_v15 = vmul.f32 %v5107_v34, %v1244_v60 }
 0x1a3   :  { %2829 = vset.pattern.permute.xlu1 %v5099_v46 }
 0x1a4   :  { %1259 = vperm.xlu1 %2829, %v4183_v39   ;;  %v1338_v26 = vadd.f32 %v1306_v28, %v1202_v24  ;;  %v1339_v42 = vadd.f32 %v1307_v15, %v1203_v53  ;;  %v494_v15 = vmul.f32 %v3673_v9, %v4157_v43 }
 0x1a5   :  { %v1248_v0 = vpop.permute.xlu1 %1247 }
 0x1a6   :  { %v1308_v60 = vmul.f32 %v3826_v21, %v1248_v0 }
 0x1a8   :  { %2831 = vset.pattern.permute.xlu1 %v5100_v12  ;;  %v1069_v12 = vadd.f32 %v1037_v49, %v933_v18 }
 0x1a9   :  { %323 = vperm.xlu1 %2831, %v5096_v56  }
 0x1aa   :  { %v4250_v61 = vpop.permute.xlu1 %311  ;;  %v1205_v50 = vadd.f32 %v1173_v62, %v1069_v12 }
 0x1ab   :  { %5102 = vst [vmem:[#allocation46_spill] sm:$0xff] %v4250_v61  ;;  %v796_v61 = vadd.f32 %v764_v25, %v660_v30  ;;  %v5108_v25 = vld [vmem:[#allocation59_spill] sm:$0xff] }
 0x1ac   :  { %v210_v55 = vmul.f32 %v3659_v51, %v5108_v25  ;;  %v211_v30 = vmul.f32 %v3663_v54, %v5108_v25 }
 0x1ad   :  { %327 = vperm.xlu1 %2831, %v4235_v36   ;;  %v932_v22 = vadd.f32 %v900_v16, %v796_v61  ;;  %v1309_v61 = vmul.f32 %v5107_v34, %v1248_v0 }
 0x1ae   :  { %v254_v0 = vadd.f32 %v3681_v2, %v210_v55 }
 0x1af   :  { %v4266_v5 = vpop.permute.xlu1 %843  ;;  %v1341_v25 = vadd.f32 %v1309_v61, %v1205_v50 }
 0x1b0   :  { %v390_v12 = vadd.f32 %v358_v19, %v254_v0 }
 0x1b1   :  { %2832 = vset.pattern.permute.xlu1 %v5106_v6  ;;  %v1068_v6 = vadd.f32 %v1036_v20, %v932_v22  ;;  %v359_v22 = vmul.f32 %v3670_v63, %v5109_v58  ;;  %v255_v20 = vadd.f32 %v3684_v11, %v211_v30 }
 0x1b2   :  { %863 = vperm.xlu1 %2832, %v4212_v31  }
 0x1b3   :  { %v1204_v52 = vadd.f32 %v1172_v29, %v1068_v6  ;;  %v391_v6 = vadd.f32 %v359_v22, %v255_v20  ;;  %v902_v22 = vmul.f32 %v5054_v23, %v4266_v5  ;;  %v5110_v20 = vld [vmem:[#allocation17_spill] sm:$0xff] }
 0x1b4   :  { %v1380_v16 = vpop.permute.xlu1 %1379 }
 0x1b5   :  { %v1442_v1 = vmul.f32 %v3900_v57, %v1380_v16  ;;  %v1443_v51 = vmul.f32 %v3905_v13, %v1380_v16  ;;  %v1340_v18 = vadd.f32 %v1308_v60, %v1204_v52  ;;  %v526_v60 = vadd.f32 %v494_v15, %v390_v12  ;;  %v2914_v15 = vld [vmem:[#allocation9 + $0x4] ss:$8 sps:$4 sm:$0xff]  }
 0x1b6   :  { %2833 = vset.pattern.permute.xlu1 %v5073_v40  ;;  %v903_v52 = vmul.f32 %v3940_v8, %v4266_v5  ;;  %2307 = vmatprep.subr.bf16.mxu1 %v2914_v15  ;;  %v5113_v15 = vld [vmem:[#allocation50_spill] sm:$0xff] }
 0x1b7   :  { %1395 = vperm.xlu1 %2833, %v4183_v39   ;;  %v1474_v49 = vadd.f32 %v1442_v1, %v1338_v26  ;;  %v1475_v28 = vadd.f32 %v1443_v51, %v1339_v42  ;;  %v495_v39 = vmul.f32 %v3676_v17, %v4157_v43  ;;  %v630_v51 = vmul.f32 %v3696_v3, %v4208_v37 }
 0x1b8   :  { %v1384_v24 = vpop.permute.xlu1 %1383  ;;  %v631_v43 = vmul.f32 %v3699_v44, %v4208_v37  ;;  %v766_v26 = vmul.f32 %v3792_v32, %v4239_v48  ;;  %v767_v42 = vmul.f32 %v3923_v10, %v4239_v48  ;;  %v1174_v48 = vmul.f32 %v3815_v7, %v5110_v20 }
 0x1b9   :  { %v1506_v53 = vmul.f32 0.5, %v1474_v49  ;;  %v1507_v16 = vmul.f32 0.5, %v1475_v28  ;;  %v1444_v29 = vmul.f32 %v3900_v57, %v1384_v24  ;;  %v1445_v62 = vmul.f32 %v3905_v13, %v1384_v24  ;;  %v2916_v24 = vld [vmem:[#allocation9] ss:$8 sps:$4 sm:$0xff]  }
 0x1ba   :  { %v527_v61 = vadd.f32 %v495_v39, %v391_v6  ;;  %v1175_v49 = vmul.f32 %v3910_v14, %v5110_v20  ;;  %2308 = vmatpush1.bf16.msra.mxu1 %v2916_v24 }
 0x1bb   :  { %2834 = vset.pattern.permute.xlu1 %v5077_v33  ;;  %2978 = vtanh.f32 %v1506_v53  ;;  %v1476_v55 = vadd.f32 %v1444_v29, %v1340_v18  ;;  %v1477_v30 = vadd.f32 %v1445_v62, %v1341_v25 }
 0x1bc   :  { %459 = vperm.xlu1 %2834, %v5096_v56   ;;  %2980 = vtanh.f32 %v1507_v16  ;;  %v662_v56 = vadd.f32 %v630_v51, %v526_v60  ;;  %v663_v37 = vadd.f32 %v631_v43, %v527_v61  ;;  %v5111_v16 = vld [vmem:[#allocation21_spill] sm:$0xff]  ;;  %v2917_v51 = vld [vmem:[#allocation9 + $0x14] ss:$8 sps:$4 sm:$0xff]  }
 0x1bd   :  { %v1508_v1 = vmul.f32 0.5, %v1476_v55  ;;  %v1509_v58 = vmul.f32 0.5, %v1477_v30  ;;  %v4311_v19 = vpop.permute.xlu1 %447  ;;  %v1310_v29 = vmul.f32 %v3826_v21, %v5111_v16  ;;  %v1311_v62 = vmul.f32 %v5107_v34, %v5111_v16  ;;  %v2919_v43 = vld [vmem:[#allocation9 + $0x10] ss:$8 sps:$4 sm:$0xff]   ;;  %2309 = vmatprep.subr.bf16.mxu1 %v2917_v51  ;;  %v2926_v16 = vld [vmem:[#allocation9 + $0x44] ss:$8 sps:$4 sm:$0xff]  }
 0x1be   :  { %v798_v50 = vadd.f32 %v766_v26, %v662_v56  ;;  %v799_v0 = vadd.f32 %v767_v42, %v663_v37  ;;  %v4333_v26 = vld [vmem:[#allocation3 + $0x60] sm:$0xff]  ;;  %2310 = vmatpush1.bf16.msra.mxu1 %v2919_v43  ;;  %v4348_v51 = vld [vmem:[#allocation3 + $0x78] sm:$0xff] }
 0x1bf   :  { %2982 = vtanh.f32 %v1508_v1  ;;  %v2931_v43 = vld [vmem:[#allocation9 + $0x50] ss:$8 sps:$4 sm:$0xff]  }
 0x1c0   :  { %463 = vperm.xlu1 %2834, %v4235_v36   ;;  %2984 = vtanh.f32 %v1509_v58  ;;  %v934_v39 = vadd.f32 %v902_v22, %v798_v50  ;;  %v935_v18 = vadd.f32 %v903_v52, %v799_v0  ;;  %v2920_v50 = vld [vmem:[#allocation9 + $0x24] ss:$8 sps:$4 sm:$0xff]   ;;  %v2922_v0 = vld [vmem:[#allocation9 + $0x20] ss:$8 sps:$4 sm:$0xff]  }
 0x1c1   :  { %2311 = vmatprep.subr.bf16.mxu1 %v2920_v50 }
 0x1c2   :  { %v980_v28 = vpop.permute.xlu1 %979  ;;  %2312 = vmatpush1.bf16.msra.mxu1 %v2922_v0  ;;  %v2941_v0 = vld [vmem:[#allocation9 + $0x94] ss:$8 sps:$4 sm:$0xff]  }
 0x1c3   :  { %v1038_v25 = vmul.f32 %v5055_v59, %v980_v28  ;;  %v1039_v5 = vmul.f32 %v3945_v4, %v980_v28 }
 0x1c4   :  { %2835 = vset.pattern.permute.xlu1 %v5085_v35 }
 0x1c5   :  { %999 = vperm.xlu1 %2835, %v4212_v31   ;;  %v2979_v53 = vpop.eup %2978  ;;  %v1070_v12 = vadd.f32 %v1038_v25, %v934_v39  ;;  %v1071_v6 = vadd.f32 %v1039_v5, %v935_v18  ;;  %v2923_v25 = vld [vmem:[#allocation9 + $0x34] ss:$8 sps:$4 sm:$0xff]  }
 0x1c6   :  { %v2981_v55 = vpop.eup %2980  ;;  %v1570_v42 = vmul.f32 0.5, %v2979_v53  ;;  %2313 = vmatprep.subr.bf16.mxu1 %v2923_v25  ;;  %v2925_v53 = vld [vmem:[#allocation9 + $0x30] ss:$8 sps:$4 sm:$0xff]   ;;  %v5116_v25 = vld [vmem:[#allocation16_spill] sm:$0xff] }
 0x1c7   :  { %v1206_v30 = vadd.f32 %v1174_v48, %v1070_v12  ;;  %v1207_v60 = vadd.f32 %v1175_v49, %v1071_v6  ;;  %v4331_v61 = vpop.permute.xlu1 %579  ;;  %v1571_v37 = vmul.f32 0.5, %v2981_v55  ;;  %2314 = vmatpush1.bf16.msra.mxu1 %v2925_v53  ;;  %v2929_v12 = vld [vmem:[#allocation9 + $0x54] ss:$8 sps:$4 sm:$0xff]   ;;  %v2932_v55 = vld [vmem:[#allocation9 + $0x64] ss:$8 sps:$4 sm:$0xff]  }
 0x1c8   :  { %5112 = vst [vmem:[#allocation25_spill] sm:$0xff] %v4331_v61  ;;  %v1602_v49 = vadd.f32 0.5, %v1570_v42  ;;  %2315 = vmatprep.subr.bf16.mxu1 %v2926_v16  ;;  %v2935_v42 = vld [vmem:[#allocation9 + $0x74] ss:$8 sps:$4 sm:$0xff]   ;;  %v1447_v16 = vmul.f32 %v3905_v13, %v5116_v25 }
 0x1c9   :  { %2836 = vset.pattern.permute.xlu1 %v5090_v45  ;;  %v2983_v1 = vpop.eup %2982  ;;  %v4336_v58 = vadd.f32 %v1310_v29, %v1206_v30  ;;  %v4338_v56 = vadd.f32 %v1311_v62, %v1207_v60  ;;  %v1603_v39 = vadd.f32 0.5, %v1571_v37  ;;  %v2928_v62 = vld [vmem:[#allocation9 + $0x40] ss:$8 sps:$4 sm:$0xff]   ;;  %v2937_v37 = vld [vmem:[#allocation9 + $0x70] ss:$8 sps:$4 sm:$0xff]  }
 0x1ca   :  { %595 = vperm.xlu1 %2836, %v4333_v26   ;;  %v2985_v22 = vpop.eup %2984  ;;  %v1572_v52 = vmul.f32 0.5, %v2983_v1  ;;  %v2934_v60 = vld [vmem:[#allocation9 + $0x60] ss:$8 sps:$4 sm:$0xff]  }
 0x1cb   :  { %v4340_v20 = vpop.permute.xlu1 %583  ;;  %v1573_v48 = vmul.f32 0.5, %v2985_v22  ;;  %2316 = vmatpush1.bf16.msra.mxu1 %v2928_v62  ;;  %v2938_v22 = vld [vmem:[#allocation9 + $0x84] ss:$8 sps:$4 sm:$0xff]   ;;  %v2947_v62 = vld [vmem:[#allocation9 + $0xb4] ss:$8 sps:$4 sm:$0xff]  }
 0x1cc   :  { %v1604_v28 = vadd.f32 0.5, %v1572_v52  ;;  %2317 = vmatprep.subr.bf16.mxu1 %v2929_v12  ;;  %v2940_v52 = vld [vmem:[#allocation9 + $0x80] ss:$8 sps:$4 sm:$0xff]   ;;  %v2949_v12 = vld [vmem:[#allocation9 + $0xb0] ss:$8 sps:$4 sm:$0xff]  }
 0x1cd   :  { %v1605_v18 = vadd.f32 0.5, %v1573_v48  ;;  %v2943_v48 = vld [vmem:[#allocation9 + $0x90] ss:$8 sps:$4 sm:$0xff]  }
 0x1ce   :  { %2838 = vset.pattern.permute.xlu1 %v5092_v27  ;;  %v1630_v5 = vpack.c.bf16 %v1604_v28, %v1602_v49  ;;  %v5115_v49 = vmov 1  }
 0x1cf   :  { %1131 = vperm.xlu1 %2838, %v5113_v15   ;;  %v1631_v24 = vpack.c.bf16 %v1605_v18, %v1603_v39  ;;  %2318 = vmatpush1.bf16.msra.mxu1 %v2931_v43  ;;  %v2944_v39 = vld [vmem:[#allocation9 + $0xa4] ss:$8 sps:$4 sm:$0xff]   ;;  %v2946_v18 = vld [vmem:[#allocation9 + $0xa0] ss:$8 sps:$4 sm:$0xff]  }
 0x1d0   :  { %v1120_v29 = vpop.permute.xlu1 %1119  ;;  %2319 = vmatprep.subr.bf16.mxu1 %v2932_v55 }
 0x1d1   :  { %1898 = vmatprep.mubr.bf16.mxu0 %v1631_v24  ;;  %v5117_v24 = vmov 5   ;;  %v1176_v43 = vmul.f32 %v3815_v7, %v1120_v29  ;;  %v1177_v55 = vmul.f32 %v3910_v14, %v1120_v29 }
 0x1d2   :  { %1899 = vmatmul.mubr.bf16.gmra.mrb[8].mxu0 %v1630_v5  ;;  %v1446_v5 = vmul.f32 %v3900_v57, %v5116_v25  ;;  %v5122_v25 = vld [vmem:[#allocation34_spill] sm:$0xff] }
 0x1d3   :  { %1135 = vperm.xlu1 %2838, %v4212_v31   ;;  %2320 = vmatpush1.bf16.msra.mxu1 %v2934_v60 }
 0x1d4   :  { %2321 = vmatprep.subr.bf16.mxu1 %v2935_v42  ;;  %v1478_v42 = vadd.f32 %v1446_v5, %v4336_v58  ;;  %v2952_v58 = vld [vmem:[#allocation9 + $0xc0] ss:$8 sps:$4 sm:$0xff]  }
 0x1d5   :  { %v4346_v6 = vpop.permute.xlu1 %162 }
 0x1d6   :  { %v219_v61 = vmul.f32 %v3663_v54, %v4346_v6 }
 0x1d7   :  { %2840 = vset.pattern.permute.xlu1 %v5095_v38  ;;  %2322 = vmatpush1.bf16.msra.mxu1 %v2937_v37  ;;  %v218_v38 = vmul.f32 %v5122_v25, %v4346_v6 }
 0x1d8   :  { %187 = vperm.xlu1 %2840, %v4348_v51   ;;  %2323 = vmatprep.subr.bf16.mxu1 %v2938_v22  ;;  %v1479_v22 = vadd.f32 %v1447_v16, %v4338_v56  ;;  %v5121_v56 = vld [vmem:[#allocation36_spill] sm:$0xff] }
 0x1d9   :  { %v216_v5 = vmul.f32 %v5122_v25, %v5121_v56  ;;  %v217_v16 = vmul.f32 %v3663_v54, %v5121_v56 }
 0x1da   :  { %v4352_v30 = vpop.permute.xlu1 %715 }
 0x1db   :  { %5114 = vst [vmem:[#allocation30_spill] sm:$0xff] %v4352_v30  ;;  %2324 = vmatpush1.bf16.msra.mxu1 %v2940_v52  ;;  %v2950_v52 = vld [vmem:[#allocation9 + $0xc4] ss:$8 sps:$4 sm:$0xff]   ;;  %v5125_v30 = vld [vmem:[#allocation46_spill] sm:$0xff]  ;;  %v260_v25 = vadd.f32 %v3681_v2, %v216_v5 }
 0x1dc   :  { %2841 = vset.pattern.permute.xlu1 %v5098_v41  ;;  %2325 = vmatprep.subr.bf16.mxu1 %v2941_v0  ;;  %v5119_v0 = vld [vmem:[#allocation28_spill] sm:$0xff]  ;;  %v365_v6 = vmul.f32 %v3670_v63, %v5125_v30 }
 0x1dd   :  { %731 = vperm.xlu1 %2841, %v4333_v26   ;;  %v2956_v5 = vld [vmem:[#allocation9 + $0xe4] ss:$8 sps:$4 sm:$0xff]  }
 0x1de   :  { %v4355_v1 = vpop.permute.xlu1 %719 }
 0x1df   :  { %2326 = vmatpush1.bf16.msra.mxu1 %v2943_v48  ;;  %v4380_v48 = vmul.f32 %v3696_v3, %v5119_v0 }
 0x1e0   :  { %2327 = vmatprep.subr.bf16.mxu1 %v2944_v39  ;;  %v5120_v39 = vld [vmem:[#allocation37_spill] sm:$0xff] }
 0x1e1   :  { %2842 = vset.pattern.permute.xlu1 %v5099_v46  ;;  %v261_v46 = vadd.f32 %v3684_v11, %v217_v16 }
 0x1e2   :  { %1267 = vperm.xlu1 %2842, %v5113_v15  }
 0x1e3   :  { %v1256_v50 = vpop.permute.xlu1 %1255  ;;  %2328 = vmatpush1.bf16.msra.mxu1 %v2946_v18  ;;  %v4390_v18 = vmul.f32 %v3792_v32, %v5120_v39 }
 0x1e4   :  { %2329 = vmatprep.subr.bf16.mxu1 %v2947_v62  ;;  %v1312_v37 = vmul.f32 %v3826_v21, %v1256_v50  ;;  %v1313_v29 = vmul.f32 %v5107_v34, %v1256_v50  ;;  %v5123_v62 = vld [vmem:[#allocation49_spill] sm:$0xff]  ;;  %v5124_v50 = vld [vmem:[#allocation20_spill] sm:$0xff] }
 0x1e6   :  { %1271 = vperm.xlu1 %2842, %v4212_v31  }
 0x1e7   :  { %2330 = vmatpush1.bf16.msra.mxu1 %v2949_v12  ;;  %v1208_v12 = vadd.f32 %v1176_v43, %v5123_v62  ;;  %v1511_v43 = vmul.f32 0.5, %v1479_v22  ;;  %v262_v22 = vadd.f32 %v3681_v2, %v218_v38 }
 0x1e8   :  { %v316_v28 = vpop.permute.xlu1 %315  ;;  %2331 = vmatprep.subr.bf16.mxu1 %v2950_v52  ;;  %v2953_v52 = vld [vmem:[#allocation9 + $0xd4] ss:$8 sps:$4 sm:$0xff]  }
 0x1e9   :  { %v1344_v56 = vadd.f32 %v1312_v37, %v1208_v12  ;;  %v367_v37 = vmul.f32 %v3670_v63, %v316_v28 }
 0x1ea   :  { %2844 = vset.pattern.permute.xlu1 %v5115_v49  ;;  %v4384_v49 = vmul.f32 %v3699_v44, %v5119_v0  ;;  %v4399_v0 = vmul.f32 %v3923_v10, %v5120_v39  ;;  %v366_v39 = vmul.f32 %v3655_v47, %v316_v28 }
 0x1eb   :  { %335 = vperm.xlu1 %2844, %v4348_v51   ;;  %2332 = vmatpush1.bf16.msra.mxu1 %v2952_v58 }
 0x1ec   :  { %2333 = vmatprep.subr.bf16.mxu1 %v2953_v52  ;;  %v398_v16 = vadd.f32 %v366_v39, %v262_v22  ;;  %v860_v52 = vpop.permute.xlu0 %859 }
 0x1ed   :  { %v910_v39 = vmul.f32 %v5054_v23, %v860_v52 }
 0x1ee   :  { %v4365_v53 = vpop.permute.xlu1 %851 }
 0x1ef   :  { %2845 = vset.pattern.permute.xlu1 %v5117_v24  ;;  %5118 = vst [vmem:[#allocation35_spill] sm:$0xff] %v4365_v53  ;;  %v1510_v53 = vmul.f32 0.5, %v1478_v42  ;;  %v2955_v42 = vld [vmem:[#allocation9 + $0xd0] ss:$8 sps:$4 sm:$0xff]  }
 0x1f0   :  { %867 = vperm.xlu1 %2845, %v4333_v26   ;;  %2334 = vmatpush1.bf16.msra.mxu1 %v2955_v42 }
 0x1f1   :  { %2986 = vtanh.f32 %v1510_v53  ;;  %2335 = vmatprep.subr.bf16.mxu1 %v2956_v5 }
 0x1f2   :  { %v4372_v60 = vpop.permute.xlu1 %855  ;;  %2988 = vtanh.f32 %v1511_v43  ;;  %v636_v43 = vmul.f32 %v3696_v3, %v4340_v20 }
 0x1f4   :  { %2846 = vset.pattern.permute.xlu1 %v5073_v40  ;;  %v364_v40 = vmul.f32 %v3655_v47, %v5125_v30  ;;  %v501_v30 = vmul.f32 %v3676_v17, %v4311_v19 }
 0x1f5   :  { %1403 = vperm.xlu1 %2846, %v5113_v15   ;;  %v1209_v15 = vadd.f32 %v1177_v55, %v5124_v50 }
 0x1f6   :  { %v396_v12 = vadd.f32 %v364_v40, %v260_v25 }
 0x1f7   :  { %v1392_v24 = vpop.permute.xlu1 %1391  ;;  %v1345_v62 = vadd.f32 %v1313_v29, %v1209_v15 }
 0x1f8   :  { %v1448_v55 = vmul.f32 %v3900_v57, %v1392_v24  ;;  %v1449_v50 = vmul.f32 %v3905_v13, %v1392_v24  ;;  %v263_v24 = vadd.f32 %v3684_v11, %v219_v61  ;;  %v397_v61 = vadd.f32 %v365_v6, %v261_v46 }
 0x1f9   :  { %1407 = vperm.xlu1 %2846, %v4212_v31   ;;  %v500_v31 = vmul.f32 %v3673_v9, %v4311_v19  ;;  %v637_v19 = vmul.f32 %v3699_v44, %v4340_v20  ;;  %v772_v46 = vmul.f32 %v3792_v32, %v4355_v1  ;;  %v773_v6 = vmul.f32 %v3923_v10, %v4355_v1 }
 0x1fa   :  { %v1480_v29 = vadd.f32 %v1448_v55, %v1344_v56  ;;  %v1481_v58 = vadd.f32 %v1449_v50, %v1345_v62  ;;  %v2958_v56 = vld [vmem:[#allocation9 + $0xe0] ss:$8 sps:$4 sm:$0xff]   ;;  %v399_v53 = vadd.f32 %v367_v37, %v263_v24  ;;  %v2959_v55 = vld [vmem:[#allocation9 + $0xf4] ss:$8 sps:$4 sm:$0xff]   ;;  %v533_v42 = vadd.f32 %v501_v30, %v397_v61  ;;  %v2961_v37 = vld [vmem:[#allocation9 + $0xf0] ss:$8 sps:$4 sm:$0xff]  }
 0x1fb   :  { %2336 = vmatpush1.bf16.msra.mxu1 %v2958_v56  ;;  %v532_v50 = vadd.f32 %v500_v31, %v396_v12  ;;  %v908_v24 = vmul.f32 %v5054_v23, %v4372_v60  ;;  %v909_v1 = vmul.f32 %v3940_v8, %v4372_v60 }
 0x1fc   :  { %v1512_v28 = vmul.f32 0.5, %v1480_v29  ;;  %v1513_v15 = vmul.f32 0.5, %v1481_v58  ;;  %v452_v38 = vpop.permute.xlu1 %451  ;;  %v911_v29 = vmul.f32 %v3940_v8, %v860_v52  ;;  %2337 = vmatprep.subr.bf16.mxu1 %v2959_v55  ;;  %v669_v31 = vadd.f32 %v637_v19, %v533_v42  ;;  %v5127_v52 = vld [vmem:[#allocation18_spill] sm:$0xff] }
 0x1fd   :  { %2848 = vset.pattern.permute.xlu1 %v5077_v33  ;;  %v502_v40 = vmul.f32 %v3673_v9, %v452_v38  ;;  %v503_v25 = vmul.f32 %v3676_v17, %v452_v38  ;;  %v668_v12 = vadd.f32 %v636_v43, %v532_v50  ;;  %v1181_v50 = vmul.f32 %v3910_v14, %v5127_v52 }
 0x1fe   :  { %471 = vperm.xlu1 %2848, %v4348_v51   ;;  %2990 = vtanh.f32 %v1512_v28  ;;  %v2987_v28 = vpop.eup %2986  ;;  %v805_v38 = vadd.f32 %v773_v6, %v669_v31 }
 0x1ff   :  { %2992 = vtanh.f32 %v1513_v15  ;;  %v534_v33 = vadd.f32 %v502_v40, %v398_v16  ;;  %v535_v62 = vadd.f32 %v503_v25, %v399_v53  ;;  %2338 = vmatpush1.bf16.msra.mxu1 %v2961_v37  ;;  %v804_v15 = vadd.f32 %v772_v46, %v668_v12  ;;  %v2989_v56 = vpop.eup %2988  ;;  %v5128_v37 = vld [vmem:[#allocation23_spill] sm:$0xff] }
 0x200   :  { %v941_v61 = vadd.f32 %v909_v1, %v805_v38  ;;  %v1575_v6 = vmul.f32 0.5, %v2989_v56  ;;  %v5129_v56 = vld [vmem:[#allocation57_spill] sm:$0xff] }
 0x201   :  { %v670_v20 = vadd.f32 %v4380_v48, %v534_v33  ;;  %v671_v22 = vadd.f32 %v4384_v49, %v535_v62  ;;  %v5126_v48 = vld [vmem:[#allocation22_spill] sm:$0xff]  ;;  %v940_v25 = vadd.f32 %v908_v24, %v804_v15  ;;  %v1574_v33 = vmul.f32 0.5, %v2987_v28 }
 0x202   :  { %2849 = vset.pattern.permute.xlu1 %v5085_v35  ;;  %v4440_v58 = vpop.permute.xlu1 %987  ;;  %v1046_v49 = vmul.f32 %v5055_v59, %v5126_v48  ;;  %v1047_v5 = vmul.f32 %v3945_v4, %v5126_v48  ;;  %v1607_v15 = vadd.f32 0.5, %v1575_v6 }
 0x203   :  { %1003 = vperm.xlu1 %2849, %v4333_v26   ;;  %v806_v30 = vadd.f32 %v4390_v18, %v670_v20  ;;  %v807_v16 = vadd.f32 %v4399_v0, %v671_v22  ;;  %v1180_v18 = vmul.f32 %v3815_v7, %v5127_v52  ;;  %v4458_v0 = vld [vmem:[#allocation3 + $0x70] sm:$0xff]  ;;  %v1316_v20 = vmul.f32 %v3826_v21, %v5128_v37 }
 0x205   :  { %v942_v53 = vadd.f32 %v910_v39, %v806_v30  ;;  %v943_v40 = vadd.f32 %v911_v29, %v807_v16  ;;  %v1317_v29 = vmul.f32 %v5107_v34, %v5128_v37 }
 0x206   :  { %v992_v60 = vpop.permute.xlu1 %991 }
 0x207   :  { %v1044_v43 = vmul.f32 %v5055_v59, %v992_v60  ;;  %v1045_v19 = vmul.f32 %v3945_v4, %v992_v60  ;;  %2851 = vset.pattern.permute.xlu1 %v5090_v45  ;;  %v4461_v62 = vadd.f32 %v1046_v49, %v942_v53  ;;  %v4463_v39 = vadd.f32 %v1047_v5, %v943_v40  ;;  %v5130_v40 = vld [vmem:[#allocation58_spill] sm:$0xff] }
 0x208   :  { %603 = vperm.xlu1 %2851, %v4458_v0   ;;  %v2991_v55 = vpop.eup %2990  ;;  %v1606_v5 = vadd.f32 0.5, %v1574_v33  ;;  %v4486_v33 = vpop.permute.xlu0 %871 }
 0x209   :  { %v1076_v42 = vadd.f32 %v1044_v43, %v940_v25  ;;  %v1077_v46 = vadd.f32 %v1045_v19, %v941_v61  ;;  %v2993_v45 = vpop.eup %2992  ;;  %v1576_v22 = vmul.f32 0.5, %v2991_v55 }
 0x20a   :  { %v1577_v1 = vmul.f32 0.5, %v2993_v45  ;;  %v5132_v45 = vmov 5  }
 0x20b   :  { %v1212_v12 = vadd.f32 %v1180_v18, %v1076_v42  ;;  %v1213_v31 = vadd.f32 %v1181_v50, %v1077_v46  ;;  %v592_v24 = vpop.permute.xlu1 %591  ;;  %v1608_v30 = vadd.f32 0.5, %v1576_v22  ;;  %v5131_v18 = vmov 8  }
 0x20c   :  { %v640_v48 = vmul.f32 %v3696_v3, %v592_v24  ;;  %v641_v49 = vmul.f32 %v3699_v44, %v592_v24  ;;  %607 = vperm.xlu1 %2851, %v4348_v51   ;;  %v1609_v38 = vadd.f32 0.5, %v1577_v1  ;;  %v4493_v6 = vpop.permute.xlu0 %875  ;;  %v5135_v24 = vld [vmem:[#allocation34_spill] sm:$0xff] }
 0x20d   :  { %v1348_v16 = vadd.f32 %v1316_v20, %v1212_v12  ;;  %v4474_v28 = vadd.f32 %v1317_v29, %v1213_v31  ;;  %v1632_v25 = vpack.c.bf16 %v1608_v30, %v1606_v5  ;;  %v5133_v20 = vld [vmem:[#allocation25_spill] sm:$0xff]  ;;  %v5134_v31 = vmov 9  }
 0x20e   :  { %v672_v53 = vadd.f32 %v640_v48, %v5129_v56  ;;  %v673_v60 = vadd.f32 %v641_v49, %v5130_v40  ;;  %v1633_v61 = vpack.c.bf16 %v1609_v38, %v1607_v15  ;;  %v634_v22 = vmul.f32 %v3696_v3, %v5133_v20  ;;  %v5136_v49 = vld [vmem:[#allocation30_spill] sm:$0xff]  ;;  %v5137_v38 = vld [vmem:[#allocation55_spill] sm:$0xff] }
 0x20f   :  { %v635_v29 = vmul.f32 %v3699_v44, %v5133_v20  ;;  %v770_v5 = vmul.f32 %v3792_v32, %v5136_v49  ;;  %v771_v30 = vmul.f32 %v3923_v10, %v5136_v49 }
 0x210   :  { %2852 = vset.pattern.permute.xlu1 %v5092_v27  ;;  %v1124_v43 = vpop.permute.xlu1 %1123  ;;  %1908 = vmatprep.mubr.bf16.mxu0 %v1633_v61  ;;  %v1400_v12 = vpop.permute.xlu0 %1399  ;;  %v666_v56 = vadd.f32 %v634_v22, %v5137_v38 }
 0x211   :  { %1143 = vperm.xlu1 %2852, %v4235_v36   ;;  %1909 = vmatmul.mubr.bf16.gmra.mrb[12].mxu0 %v1632_v25  ;;  %v1452_v15 = vmul.f32 %v3900_v57, %v1400_v12  ;;  %v1453_v22 = vmul.f32 %v3905_v13, %v1400_v12 }
 0x213   :  { %v1484_v38 = vadd.f32 %v1452_v15, %v1348_v16  ;;  %v1485_v12 = vadd.f32 %v1453_v22, %v4474_v28 }
 0x215   :  { %2853 = vset.pattern.permute.xlu1 %v5098_v41  ;;  %v4481_v19 = vpop.permute.xlu1 %172  ;;  %v1516_v15 = vmul.f32 0.5, %v1484_v38 }
 0x216   :  { %739 = vperm.xlu1 %2853, %v4458_v0   ;;  %v222_v28 = vmul.f32 %v5135_v24, %v4481_v19 }
 0x217   :  { %2994 = vtanh.f32 %v1516_v15 }
 0x219   :  { %v178_v52 = vpop.permute.xlu1 %177 }
 0x21a   :  { %2855 = vset.pattern.permute.xlu1 %v5131_v18  ;;  %v224_v1 = vmul.f32 %v5135_v24, %v178_v52  ;;  %v225_v48 = vmul.f32 %v3663_v54, %v178_v52 }
 0x21b   :  { %1275 = vperm.xlu1 %2855, %v4333_v26  }
 0x21e   :  { %v728_v55 = vpop.permute.xlu1 %727 }
 0x21f   :  { %v776_v50 = vmul.f32 %v3792_v32, %v728_v55  ;;  %v777_v42 = vmul.f32 %v3923_v10, %v728_v55  ;;  %1279 = vperm.xlu1 %2855, %v4235_v36   ;;  %v269_v55 = vadd.f32 %v3684_v11, %v225_v48 }
 0x221   :  { %v808_v46 = vadd.f32 %v776_v50, %v672_v53  ;;  %v4491_v41 = vadd.f32 %v777_v42, %v673_v60  ;;  %v5138_v53 = vld [vmem:[#allocation56_spill] sm:$0xff]  ;;  %v5139_v60 = vld [vmem:[#allocation35_spill] sm:$0xff] }
 0x222   :  { %v667_v40 = vadd.f32 %v635_v29, %v5138_v53  ;;  %v906_v25 = vmul.f32 %v5054_v23, %v5139_v60  ;;  %v907_v61 = vmul.f32 %v3940_v8, %v5139_v60  ;;  %v1042_v29 = vmul.f32 %v5055_v59, %v4440_v58 }
 0x223   :  { %2857 = vset.pattern.permute.xlu1 %v5132_v45  ;;  %v1260_v37 = vpop.permute.xlu1 %1259  ;;  %v802_v45 = vadd.f32 %v770_v5, %v666_v56 }
 0x224   :  { %879 = vperm.xlu1 %2857, %v4348_v51   ;;  %v803_v20 = vadd.f32 %v771_v30, %v667_v40  ;;  %v1314_v40 = vmul.f32 %v3826_v21, %v1260_v37  ;;  %v1315_v16 = vmul.f32 %v5107_v34, %v1260_v37 }
 0x225   :  { %v938_v53 = vadd.f32 %v906_v25, %v802_v45 }
 0x226   :  { %v939_v60 = vadd.f32 %v907_v61, %v803_v20 }
 0x227   :  { %v1074_v56 = vadd.f32 %v1042_v29, %v938_v53 }
 0x228   :  { %2858 = vset.pattern.permute.xlu1 %v5134_v31  ;;  %v324_v36 = vpop.permute.xlu1 %323 }
 0x229   :  { %1411 = vperm.xlu1 %2858, %v4333_v26   ;;  %v268_v26 = vadd.f32 %v3681_v2, %v224_v1  ;;  %v1043_v1 = vmul.f32 %v3945_v4, %v4440_v58  ;;  %v371_v22 = vmul.f32 %v3670_v63, %v324_v36 }
 0x22b   :  { %v1075_v58 = vadd.f32 %v1043_v1, %v939_v60 }
 0x22c   :  { %v328_v52 = vpop.permute.xlu1 %327 }
 0x22d   :  { %v372_v50 = vmul.f32 %v3655_v47, %v328_v52  ;;  %v373_v42 = vmul.f32 %v3670_v63, %v328_v52  ;;  %2860 = vset.pattern.permute.xlu1 %v5085_v35  ;;  %v1178_v52 = vmul.f32 %v3815_v7, %v1124_v43  ;;  %v1179_v35 = vmul.f32 %v3910_v14, %v1124_v43 }
 0x22e   :  { %1011 = vperm.xlu1 %2860, %v4458_v0  }
 0x22f   :  { %v404_v49 = vadd.f32 %v372_v50, %v268_v26  ;;  %v405_v48 = vadd.f32 %v373_v42, %v269_v55  ;;  %v1210_v61 = vadd.f32 %v1178_v52, %v1074_v56  ;;  %v1211_v43 = vadd.f32 %v1179_v35, %v1075_v58 }
 0x230   :  { %v1517_v26 = vmul.f32 0.5, %v1485_v12  ;;  %v223_v55 = vmul.f32 %v3663_v54, %v4481_v19  ;;  %v266_v19 = vadd.f32 %v3681_v2, %v222_v28 }
 0x231   :  { %v4529_v5 = vpop.permute.xlu1 %863  ;;  %v1346_v42 = vadd.f32 %v1314_v40, %v1210_v61  ;;  %v1347_v45 = vadd.f32 %v1315_v16, %v1211_v43  ;;  %v2995_v43 = vpop.eup %2994 }
 0x232   :  { %v912_v30 = vmul.f32 %v5054_v23, %v4529_v5  ;;  %1015 = vperm.xlu1 %2860, %v4348_v51   ;;  %2996 = vtanh.f32 %v1517_v26  ;;  %v5141_v26 = vld [vmem:[#allocation19_spill] sm:$0xff] }
 0x233   :  { %v780_v28 = vmul.f32 %v3792_v32, %v5141_v26 }
 0x234   :  { %v4537_v25 = vadd.f32 %v912_v30, %v808_v46  ;;  %v370_v46 = vmul.f32 %v3655_v47, %v324_v36 }
 0x236   :  { %2861 = vset.pattern.permute.xlu1 %v5092_v27  ;;  %v1396_v50 = vpop.permute.xlu1 %1395  ;;  %v267_v27 = vadd.f32 %v3684_v11, %v223_v55  ;;  %v402_v52 = vadd.f32 %v370_v46, %v266_v19  ;;  %v781_v55 = vmul.f32 %v3923_v10, %v5141_v26 }
 0x237   :  { %v1450_v20 = vmul.f32 %v3900_v57, %v1396_v50  ;;  %v1451_v37 = vmul.f32 %v3905_v13, %v1396_v50  ;;  %1151 = vperm.xlu1 %2861, %v4348_v51  }
 0x238   :  { %v403_v35 = vadd.f32 %v371_v22, %v267_v27 }
 0x239   :  { %v1482_v29 = vadd.f32 %v1450_v20, %v1346_v42  ;;  %v1483_v1 = vadd.f32 %v1451_v37, %v1347_v45  ;;  %v917_v20 = vmul.f32 %v3940_v8, %v4486_v33 }
 0x23b   :  { %v1514_v38 = vmul.f32 0.5, %v1482_v29  ;;  %v1515_v53 = vmul.f32 0.5, %v1483_v1  ;;  %2862 = vset.pattern.permute.xlu1 %v5131_v18  ;;  %v460_v60 = vpop.permute.xlu1 %459  ;;  %v5140_v18 = vld [vmem:[#allocation29_spill] sm:$0xff]  ;;  %v5142_v29 = vld [vmem:[#allocation43_spill] sm:$0xff] }
 0x23c   :  { %v506_v12 = vmul.f32 %v3673_v9, %v460_v60  ;;  %v507_v30 = vmul.f32 %v3676_v17, %v460_v60  ;;  %1283 = vperm.xlu1 %2862, %v4458_v0   ;;  %v644_v15 = vmul.f32 %v3696_v3, %v5140_v18  ;;  %v645_v61 = vmul.f32 %v3699_v44, %v5140_v18  ;;  %v2997_v45 = vpop.eup %2996 }
 0x23d   :  { %2998 = vtanh.f32 %v1514_v38  ;;  %v1052_v1 = vmul.f32 %v5055_v59, %v5142_v29  ;;  %v1053_v27 = vmul.f32 %v3945_v4, %v5142_v29  ;;  %v1581_v38 = vmul.f32 0.5, %v2997_v45 }
 0x23e   :  { %3000 = vtanh.f32 %v1515_v53  ;;  %v538_v36 = vadd.f32 %v506_v12, %v402_v52  ;;  %v539_v56 = vadd.f32 %v507_v30, %v403_v35 }
 0x23f   :  { %v464_v58 = vpop.permute.xlu1 %463 }
 0x240   :  { %v508_v40 = vmul.f32 %v3673_v9, %v464_v58  ;;  %v509_v16 = vmul.f32 %v3676_v17, %v464_v58  ;;  %2864 = vset.pattern.permute.xlu1 %v5134_v31  ;;  %v916_v31 = vmul.f32 %v5054_v23, %v4486_v33 }
 0x241   :  { %1419 = vperm.xlu1 %2864, %v4458_v0   ;;  %v1580_v0 = vmul.f32 0.5, %v2995_v43 }
 0x242   :  { %v540_v50 = vadd.f32 %v508_v40, %v404_v49  ;;  %v541_v42 = vadd.f32 %v509_v16, %v405_v48 }
 0x243   :  { %v1612_v30 = vadd.f32 0.5, %v1580_v0  ;;  %v5143_v0 = vld [vmem:[#allocation32_spill] sm:$0xff] }
 0x244   :  { %v676_v37 = vadd.f32 %v644_v15, %v540_v50  ;;  %v677_v46 = vadd.f32 %v645_v61, %v541_v42  ;;  %v4571_v22 = vpop.permute.xlu1 %999  ;;  %v1613_v15 = vadd.f32 0.5, %v1581_v38 }
 0x245   :  { %1423 = vperm.xlu1 %2864, %v4348_v51  }
 0x246   :  { %v812_v19 = vadd.f32 %v780_v28, %v676_v37  ;;  %v813_v49 = vadd.f32 %v781_v55, %v677_v46  ;;  %v1674_v37 = vld [vmem:[%s4877_s4] sm:$0x3] }
 0x247   :  { %v2999_v48 = vpop.eup %2998 }
 0x248   :  { %v3001_v53 = vpop.eup %3000  ;;  %v1578_v60 = vmul.f32 0.5, %v2999_v48  ;;  %v948_v33 = vadd.f32 %v916_v31, %v812_v19  ;;  %v949_v52 = vadd.f32 %v917_v20, %v813_v49 }
 0x249   :  { %v596_v35 = vpop.permute.xlu1 %595  ;;  %v1579_v12 = vmul.f32 0.5, %v3001_v53 }
 0x24a   :  { %v642_v51 = vmul.f32 %v3696_v3, %v596_v35  ;;  %v643_v58 = vmul.f32 %v3699_v44, %v596_v35  ;;  %v1610_v40 = vadd.f32 0.5, %v1578_v60  ;;  %v4580_v16 = vadd.f32 %v1052_v1, %v948_v33  ;;  %v5144_v1 = vld [vmem:[#allocation31_spill] sm:$0xff] }
 0x24b   :  { %v1611_v18 = vadd.f32 0.5, %v1579_v12  ;;  %v4582_v61 = vadd.f32 %v1053_v27, %v949_v52  ;;  %v4599_v19 = vrot.slane %v1674_v37, %v5144_v1  ;;  %v1048_v12 = vmul.f32 %v5055_v59, %v4571_v22 }
 0x24c   :  { %v4584_v43 = vadd.f32 %v642_v51, %v538_v36  ;;  %v4586_v26 = vadd.f32 %v643_v58, %v539_v56  ;;  %v1634_v28 = vpack.c.bf16 %v1612_v30, %v1610_v40  ;;  %v4595_v56 = vrot.slane %v1674_v37, %v5143_v0 }
 0x24d   :  { %v1635_v55 = vpack.c.bf16 %v1613_v15, %v1611_v18  ;;  %v1049_v15 = vmul.f32 %v3945_v4, %v4571_v22 }
 0x24e   :  { %v1132_v50 = vpop.permute.xlu1 %1131 }
 0x24f   :  { %1918 = vmatprep.mubr.bf16.mxu0 %v1635_v55 }
 0x250   :  { %1919 = vmatmul.mubr.bf16.gmra.mrb[16].mxu0 %v1634_v28 }
 0x252   :  { %v1136_v42 = vpop.permute.xlu1 %1135 }
 0x257   :  { %v188_v45 = vpop.permute.xlu1 %187 }
 0x258   :  { %v228_v36 = vmul.f32 %v5135_v24, %v188_v45  ;;  %v229_v29 = vmul.f32 %v3663_v54, %v188_v45  ;;  %v913_v54 = vmul.f32 %v3940_v8, %v4529_v5 }
 0x25a   :  { %v272_v48 = vadd.f32 %v3681_v2, %v228_v36  ;;  %v273_v60 = vadd.f32 %v3684_v11, %v229_v29  ;;  %v945_v36 = vadd.f32 %v913_v54, %v4491_v41 }
 0x25c   :  { %v4588_v31 = vpop.permute.xlu1 %731 }
 0x261   :  { %v1268_v20 = vpop.permute.xlu1 %1267 }
 0x262   :  { %v1318_v45 = vmul.f32 %v3826_v21, %v1268_v20  ;;  %v1319_v37 = vmul.f32 %v5107_v34, %v1268_v20 }
 0x265   :  { %v1272_v46 = vpop.permute.xlu1 %1271 }
 0x267   :  { %v1880_v49 = vpop.f32.mrb[0].mxu0 }
 0x268   :  { %v1881_v27 = vadd.f32 %v1880_v49, %v4595_v56  ;;  %v1882_v38 = vpop.f32.mrb[1].mxu0 }
 0x269   :  { %v1883_v33 = vadd.f32 %v1882_v38, %v4599_v19  ;;  %v1884_v24 = vpop.f32.mrb[2].mxu0  ;;  %v1081_v38 = vadd.f32 %v1049_v15, %v945_v36 }
 0x26a   :  { %v336_v53 = vpop.permute.xlu1 %335  ;;  %v1959_v2 = vmul.f32 0.5, %v1881_v27  ;;  %v1885_v30 = vadd.f32 %v1884_v24, %v4595_v56  ;;  %v1886_v51 = vpop.f32.mrb[3].mxu0 }
 0x26b   :  { %v376_v52 = vmul.f32 %v3655_v47, %v336_v53  ;;  %v377_v35 = vmul.f32 %v3670_v63, %v336_v53  ;;  %v1960_v58 = vmul.f32 0.5, %v1883_v33  ;;  %v1887_v18 = vadd.f32 %v1886_v51, %v4599_v19 }
 0x26c   :  { %v1182_v47 = vmul.f32 %v3815_v7, %v1132_v50  ;;  %v1183_v63 = vmul.f32 %v3910_v14, %v1132_v50  ;;  %3002 = vtanh.f32 %v1959_v2  ;;  %v1961_v5 = vmul.f32 0.5, %v1885_v30 }
 0x26d   :  { %v4612_v40 = vadd.f32 %v376_v52, %v272_v48  ;;  %v4614_v11 = vadd.f32 %v377_v35, %v273_v60  ;;  %3004 = vtanh.f32 %v1960_v58  ;;  %v1962_v28 = vmul.f32 0.5, %v1887_v18 }
 0x26e   :  { %3006 = vtanh.f32 %v1961_v5  ;;  %v1080_v50 = vadd.f32 %v1048_v12, %v4537_v25  ;;  %v1214_v49 = vadd.f32 %v1182_v47, %v4461_v62  ;;  %v1215_v48 = vadd.f32 %v1183_v63, %v4463_v39 }
 0x26f   :  { %v4621_v55 = vpop.permute.xlu1 %867  ;;  %3008 = vtanh.f32 %v1962_v28  ;;  %v1890_v29 = vpop.f32.mrb[4].mxu0  ;;  %v1184_v53 = vmul.f32 %v3815_v7, %v1136_v42  ;;  %v1185_v60 = vmul.f32 %v3910_v14, %v1136_v42  ;;  %v1320_v30 = vmul.f32 %v3826_v21, %v1272_v46 }
 0x270   :  { %v1891_v22 = vadd.f32 %v1890_v29, %v4595_v56  ;;  %v1892_v27 = vpop.f32.mrb[5].mxu0  ;;  %v1350_v41 = vadd.f32 %v1318_v45, %v1214_v49  ;;  %v1351_v24 = vadd.f32 %v1319_v37, %v1215_v48  ;;  %v1321_v42 = vmul.f32 %v5107_v34, %v1272_v46 }
 0x271   :  { %v1893_v20 = vadd.f32 %v1892_v27, %v4599_v19  ;;  %v1894_v33 = vpop.f32.mrb[6].mxu0  ;;  %v1216_v5 = vadd.f32 %v1184_v53, %v1080_v50  ;;  %v1217_v15 = vadd.f32 %v1185_v60, %v1081_v38 }
 0x272   :  { %v1963_v52 = vmul.f32 0.5, %v1891_v22  ;;  %v1895_v25 = vadd.f32 %v1894_v33, %v4595_v56  ;;  %v1896_v35 = vpop.f32.mrb[7].mxu0 }
 0x273   :  { %v1964_v54 = vmul.f32 0.5, %v1893_v20  ;;  %v1897_v39 = vadd.f32 %v1896_v35, %v4599_v19  ;;  %v1352_v48 = vadd.f32 %v1320_v30, %v1216_v5  ;;  %v1353_v22 = vadd.f32 %v1321_v42, %v1217_v15 }
 0x274   :  { %v1404_v62 = vpop.permute.xlu1 %1403  ;;  %3010 = vtanh.f32 %v1963_v52  ;;  %v1965_v51 = vmul.f32 0.5, %v1895_v25 }
 0x275   :  { %v1454_v12 = vmul.f32 %v3900_v57, %v1404_v62  ;;  %v1455_v2 = vmul.f32 %v3905_v13, %v1404_v62  ;;  %3012 = vtanh.f32 %v1964_v54  ;;  %v1966_v58 = vmul.f32 0.5, %v1897_v39 }
 0x276   :  { %v3003_v63 = vpop.eup %3002  ;;  %3014 = vtanh.f32 %v1965_v51 }
 0x277   :  { %v1486_v18 = vadd.f32 %v1454_v12, %v1350_v41  ;;  %v1487_v47 = vadd.f32 %v1455_v2, %v1351_v24  ;;  %v3005_v45 = vpop.eup %3004  ;;  %v2023_v37 = vmul.f32 0.5, %v3003_v63  ;;  %3016 = vtanh.f32 %v1966_v58 }
 0x278   :  { %v1408_v28 = vpop.permute.xlu1 %1407  ;;  %v3007_v49 = vpop.eup %3006  ;;  %v2024_v41 = vmul.f32 0.5, %v3005_v45 }
 0x279   :  { %v1518_v36 = vmul.f32 0.5, %v1486_v18  ;;  %v1519_v29 = vmul.f32 0.5, %v1487_v47  ;;  %v1456_v46 = vmul.f32 %v3900_v57, %v1408_v28  ;;  %v1457_v27 = vmul.f32 %v3905_v13, %v1408_v28  ;;  %v3009_v20 = vpop.eup %3008 }
 0x27a   :  { %v2025_v33 = vmul.f32 0.5, %v3007_v49  ;;  %v2026_v53 = vmul.f32 0.5, %v3009_v20  ;;  %v2055_v60 = vadd.f32 0.5, %v2023_v37  ;;  %v2056_v62 = vadd.f32 0.5, %v2024_v41 }
 0x27b   :  { %3018 = vtanh.f32 %v1518_v36  ;;  %v1488_v50 = vadd.f32 %v1456_v46, %v1352_v48  ;;  %v1489_v38 = vadd.f32 %v1457_v27, %v1353_v22 }
 0x27c   :  { %v2057_v24 = vadd.f32 0.5, %v2025_v33  ;;  %3020 = vtanh.f32 %v1519_v29  ;;  %v2058_v54 = vadd.f32 0.5, %v2026_v53 }
 0x27d   :  { %v472_v52 = vpop.permute.xlu1 %471  ;;  %v1520_v25 = vmul.f32 0.5, %v1488_v50  ;;  %v1521_v35 = vmul.f32 0.5, %v1489_v38 }
 0x27e   :  { %v2087_v39 = vpack.c.bf16 %v2057_v24, %v2055_v60  ;;  %v3011_v12 = vpop.eup %3010  ;;  %v2088_v42 = vpack.c.bf16 %v2058_v54, %v2056_v62  ;;  %v512_v49 = vmul.f32 %v3673_v9, %v472_v52  ;;  %v513_v46 = vmul.f32 %v3676_v17, %v472_v52  ;;  %v5145_v62 = vld [vmem:[#allocation48_spill] sm:$0xff] }
 0x27f   :  { %3022 = vtanh.f32 %v1520_v25  ;;  %v3013_v2 = vpop.eup %3012  ;;  %v2027_v30 = vmul.f32 0.5, %v3011_v12  ;;  %v784_v17 = vmul.f32 %v3792_v32, %v5145_v62  ;;  %v785_v52 = vmul.f32 %v3923_v10, %v5145_v62 }
 0x280   :  { %3024 = vtanh.f32 %v1521_v35  ;;  %v3015_v51 = vpop.eup %3014  ;;  %v2028_v58 = vmul.f32 0.5, %v3013_v2  ;;  %2339 = vmatprep.mubr.bf16.mxu1 %v2088_v42  ;;  %v544_v38 = vadd.f32 %v512_v49, %v4612_v40  ;;  %v545_v24 = vadd.f32 %v513_v46, %v4614_v11 }
 0x281   :  { %v3017_v47 = vpop.eup %3016  ;;  %v2029_v63 = vmul.f32 0.5, %v3015_v51  ;;  %2340 = vmatmul.mubr.bf16.vlgmr.msra.gmra.mrb[0].mxu1 %v2087_v39  ;;  %v2059_v15 = vadd.f32 0.5, %v2027_v30  ;;  %v919_v46 = vmul.f32 %v3940_v8, %v4493_v6 }
 0x282   :  { %v4641_v18 = vpop.permute.xlu1 %1003  ;;  %v2030_v5 = vmul.f32 0.5, %v3017_v47  ;;  %v2060_v37 = vadd.f32 0.5, %v2028_v58 }
 0x283   :  { %v2061_v28 = vadd.f32 0.5, %v2029_v63 }
 0x284   :  { %v2062_v36 = vadd.f32 0.5, %v2030_v5 }
 0x285   :  { %v3019_v45 = vpop.eup %3018  ;;  %v2089_v22 = vpack.c.bf16 %v2061_v28, %v2059_v15  ;;  %v5146_v28 = vld [vmem:[#allocation60_spill] sm:$0xff] }
 0x286   :  { %v3021_v29 = vpop.eup %3020  ;;  %v2090_v27 = vpack.c.bf16 %v2062_v36, %v2060_v37  ;;  %v1582_v20 = vmul.f32 0.5, %v3019_v45  ;;  %v5147_v37 = vld [vmem:[#allocation61_spill] sm:$0xff] }
 0x287   :  { %v604_v48 = vpop.permute.xlu1 %603  ;;  %v1583_v41 = vmul.f32 0.5, %v3021_v29 }
 0x288   :  { %2349 = vmatprep.mubr.bf16.mxu1 %v2090_v27  ;;  %v1614_v54 = vadd.f32 0.5, %v1582_v20  ;;  %v646_v63 = vmul.f32 %v3696_v3, %v604_v48  ;;  %v647_v5 = vmul.f32 %v3699_v44, %v604_v48  ;;  %v778_v48 = vmul.f32 %v3792_v32, %v4588_v31 }
 0x289   :  { %v3023_v33 = vpop.eup %3022  ;;  %2350 = vmatmul.mubr.bf16.gmra.mrb[4].mxu1 %v2089_v22  ;;  %v1615_v2 = vadd.f32 0.5, %v1583_v41  ;;  %v918_v22 = vmul.f32 %v5054_v23, %v4493_v6  ;;  %v779_v20 = vmul.f32 %v3923_v10, %v4588_v31  ;;  %v914_v6 = vmul.f32 %v5054_v23, %v4621_v55 }
 0x28a   :  { %v3025_v50 = vpop.eup %3024  ;;  %v1584_v60 = vmul.f32 0.5, %v3023_v33  ;;  %v678_v45 = vadd.f32 %v646_v63, %v5146_v28  ;;  %v679_v36 = vadd.f32 %v647_v5, %v5147_v37 }
 0x28b   :  { %v608_v53 = vpop.permute.xlu1 %607  ;;  %v1585_v35 = vmul.f32 0.5, %v3025_v50  ;;  %v811_v31 = vadd.f32 %v779_v20, %v4586_v26 }
 0x28c   :  { %v648_v25 = vmul.f32 %v3696_v3, %v608_v53  ;;  %v649_v9 = vmul.f32 %v3699_v44, %v608_v53  ;;  %v1616_v39 = vadd.f32 0.5, %v1584_v60  ;;  %v1416_v44 = vpop.permute.xlu0 %1415  ;;  %v915_v60 = vmul.f32 %v3940_v8, %v4621_v55 }
 0x28d   :  { %v1617_v30 = vadd.f32 0.5, %v1585_v35 }
 0x28e   :  { %v680_v12 = vadd.f32 %v648_v25, %v544_v38  ;;  %v681_v40 = vadd.f32 %v649_v9, %v545_v24  ;;  %v1636_v42 = vpack.c.bf16 %v1616_v39, %v1614_v54  ;;  %v1461_v24 = vmul.f32 %v3905_v13, %v1416_v44 }
 0x28f   :  { %v1637_v11 = vpack.c.bf16 %v1617_v30, %v1615_v2  ;;  %v1050_v25 = vmul.f32 %v5055_v59, %v4641_v18  ;;  %v1051_v9 = vmul.f32 %v3945_v4, %v4641_v18 }
 0x290   :  { %v1144_v51 = vpop.permute.xlu1 %1143  ;;  %v4653_v58 = vadd.f32 %v784_v17, %v680_v12  ;;  %v4655_v47 = vadd.f32 %v785_v52, %v681_v40  ;;  %v1140_v62 = vpop.permute.xlu0 %1139 }
 0x291   :  { %1928 = vmatprep.mubr.bf16.mxu0 %v1637_v11  ;;  %v1188_v38 = vmul.f32 %v3815_v7, %v1144_v51  ;;  %v1189_v53 = vmul.f32 %v3910_v14, %v1144_v51  ;;  %v1186_v30 = vmul.f32 %v3815_v7, %v1140_v62  ;;  %v1187_v18 = vmul.f32 %v3910_v14, %v1140_v62 }
 0x292   :  { %1929 = vmatmul.mubr.bf16.gmra.mrb[20].mxu0 %v1636_v42 }
 0x293   :  { %v1220_v17 = vadd.f32 %v1188_v38, %v4580_v16  ;;  %v1221_v55 = vadd.f32 %v1189_v53, %v4582_v61 }
 0x295   :  { %v740_v15 = vpop.permute.xlu1 %739 }
 0x296   :  { %v782_v29 = vmul.f32 %v3792_v32, %v740_v15  ;;  %v783_v49 = vmul.f32 %v3923_v10, %v740_v15  ;;  %v1460_v32 = vmul.f32 %v3900_v57, %v1416_v44  ;;  %v810_v10 = vadd.f32 %v778_v48, %v4584_v43 }
 0x297   :  { %v947_v43 = vadd.f32 %v915_v60, %v811_v31 }
 0x298   :  { %v814_v3 = vadd.f32 %v782_v29, %v678_v45  ;;  %v815_v27 = vadd.f32 %v783_v49, %v679_v36  ;;  %v946_v39 = vadd.f32 %v914_v6, %v810_v10 }
 0x299   :  { %v1083_v2 = vadd.f32 %v1051_v9, %v947_v43 }
 0x29a   :  { %v1276_v33 = vpop.permute.xlu1 %1275  ;;  %v4671_v41 = vadd.f32 %v918_v22, %v814_v3  ;;  %v4673_v50 = vadd.f32 %v919_v46, %v815_v27  ;;  %v1082_v40 = vadd.f32 %v1050_v25, %v946_v39  ;;  %v1148_v39 = vpop.permute.xlu0 %1147 }
 0x29b   :  { %v1322_v16 = vmul.f32 %v3826_v21, %v1276_v33  ;;  %v1323_v61 = vmul.f32 %v5107_v34, %v1276_v33  ;;  %v1219_v15 = vadd.f32 %v1187_v18, %v1083_v2 }
 0x29c   :  { %v1218_v5 = vadd.f32 %v1186_v30, %v1082_v40 }
 0x29d   :  { %v1355_v36 = vadd.f32 %v1323_v61, %v1219_v15 }
 0x29e   :  { %v1280_v35 = vpop.permute.xlu1 %1279  ;;  %v1354_v37 = vadd.f32 %v1322_v16, %v1218_v5 }
 0x29f   :  { %v1324_v52 = vmul.f32 %v3826_v21, %v1280_v35  ;;  %v1325_v54 = vmul.f32 %v5107_v34, %v1280_v35 }
 0x2a1   :  { %v1356_v12 = vadd.f32 %v1324_v52, %v1220_v17  ;;  %v1357_v26 = vadd.f32 %v1325_v54, %v1221_v55 }
 0x2a3   :  { %v1492_v42 = vadd.f32 %v1460_v32, %v1356_v12  ;;  %v1493_v11 = vadd.f32 %v1461_v24, %v1357_v26  ;;  %v880_v51 = vpop.permute.xlu1 %879 }
 0x2a4   :  { %v920_v17 = vmul.f32 %v5054_v23, %v880_v51  ;;  %v921_v55 = vmul.f32 %v3940_v8, %v880_v51  ;;  %v1190_v8 = vmul.f32 %v3815_v7, %v1148_v39  ;;  %v1191_v51 = vmul.f32 %v3910_v14, %v1148_v39 }
 0x2a5   :  { %v1525_v63 = vmul.f32 0.5, %v1493_v11  ;;  %v1524_v28 = vmul.f32 0.5, %v1492_v42  ;;  %v1900_v45 = vpop.f32.mrb[8].mxu0 }
 0x2a6   :  { %v1901_v29 = vadd.f32 %v1900_v45, %v4595_v56  ;;  %v1902_v49 = vpop.f32.mrb[9].mxu0  ;;  %v952_v11 = vadd.f32 %v920_v17, %v4653_v58  ;;  %v953_v23 = vadd.f32 %v921_v55, %v4655_v47 }
 0x2a7   :  { %3026 = vtanh.f32 %v1525_v63  ;;  %v1903_v46 = vadd.f32 %v1902_v49, %v4599_v19  ;;  %v1904_v3 = vpop.f32.mrb[10].mxu0 }
 0x2a8   :  { %v1412_v22 = vpop.permute.xlu1 %1411  ;;  %3028 = vtanh.f32 %v1524_v28  ;;  %v1967_v48 = vmul.f32 0.5, %v1901_v29  ;;  %v1905_v20 = vadd.f32 %v1904_v3, %v4595_v56  ;;  %v1906_v33 = vpop.f32.mrb[11].mxu0 }
 0x2a9   :  { %v1458_v27 = vmul.f32 %v3900_v57, %v1412_v22  ;;  %v1459_v44 = vmul.f32 %v3905_v13, %v1412_v22  ;;  %v1968_v38 = vmul.f32 0.5, %v1903_v46  ;;  %v1907_v60 = vadd.f32 %v1906_v33, %v4599_v19 }
 0x2aa   :  { %3030 = vtanh.f32 %v1967_v48  ;;  %v1969_v32 = vmul.f32 0.5, %v1905_v20 }
 0x2ab   :  { %v1490_v53 = vadd.f32 %v1458_v27, %v1354_v37  ;;  %v1491_v6 = vadd.f32 %v1459_v44, %v1355_v36  ;;  %3032 = vtanh.f32 %v1968_v38  ;;  %v1970_v31 = vmul.f32 0.5, %v1907_v60  ;;  %v1288_v44 = vpop.permute.xlu0 %1287 }
 0x2ac   :  { %3034 = vtanh.f32 %v1969_v32 }
 0x2ad   :  { %v1522_v24 = vmul.f32 0.5, %v1490_v53  ;;  %v1523_v10 = vmul.f32 0.5, %v1491_v6  ;;  %v1012_v25 = vpop.permute.xlu1 %1011 }
 0x2ae   :  { %v1054_v52 = vmul.f32 %v5055_v59, %v1012_v25  ;;  %v1055_v54 = vmul.f32 %v3945_v4, %v1012_v25 }
 0x2af   :  { %3036 = vtanh.f32 %v1522_v24 }
 0x2b0   :  { %3038 = vtanh.f32 %v1523_v10  ;;  %v1086_v63 = vadd.f32 %v1054_v52, %v4671_v41  ;;  %v1328_v10 = vmul.f32 %v3826_v21, %v1288_v44 }
 0x2b1   :  { %3040 = vtanh.f32 %v1970_v31  ;;  %v1016_v9 = vpop.permute.xlu1 %1015  ;;  %v3027_v35 = vpop.eup %3026 }
 0x2b2   :  { %v3029_v62 = vpop.eup %3028  ;;  %v1056_v12 = vmul.f32 %v5055_v59, %v1016_v9  ;;  %v1589_v40 = vmul.f32 0.5, %v3027_v35  ;;  %v1087_v59 = vadd.f32 %v1055_v54, %v4673_v50  ;;  %v1057_v5 = vmul.f32 %v3945_v4, %v1016_v9 }
 0x2b3   :  { %v1588_v18 = vmul.f32 0.5, %v3029_v62  ;;  %v1222_v32 = vadd.f32 %v1190_v8, %v1086_v63 }
 0x2b4   :  { %v3031_v43 = vpop.eup %3030  ;;  %v1088_v45 = vadd.f32 %v1056_v12, %v952_v11  ;;  %v1621_v37 = vadd.f32 0.5, %v1589_v40  ;;  %v1089_v6 = vadd.f32 %v1057_v5, %v953_v23  ;;  %v1223_v24 = vadd.f32 %v1191_v51, %v1087_v59 }
 0x2b5   :  { %v3033_v2 = vpop.eup %3032  ;;  %v2031_v30 = vmul.f32 0.5, %v3031_v43  ;;  %v1620_v46 = vadd.f32 0.5, %v1588_v18 }
 0x2b6   :  { %v1152_v26 = vpop.permute.xlu1 %1151  ;;  %v3035_v42 = vpop.eup %3034  ;;  %v2032_v28 = vmul.f32 0.5, %v3033_v2 }
 0x2b7   :  { %v2033_v61 = vmul.f32 0.5, %v3035_v42  ;;  %v2063_v29 = vadd.f32 0.5, %v2031_v30  ;;  %v1192_v27 = vmul.f32 %v3815_v7, %v1152_v26  ;;  %v1193_v41 = vmul.f32 %v3910_v14, %v1152_v26 }
 0x2b8   :  { %v2064_v38 = vadd.f32 0.5, %v2032_v28  ;;  %v1329_v14 = vmul.f32 %v5107_v34, %v1288_v44 }
 0x2b9   :  { %v3037_v16 = vpop.eup %3036  ;;  %v2065_v47 = vadd.f32 0.5, %v2033_v61  ;;  %v1224_v7 = vadd.f32 %v1192_v27, %v1088_v45  ;;  %v1225_v25 = vadd.f32 %v1193_v41, %v1089_v6 }
 0x2ba   :  { %v3039_v15 = vpop.eup %3038  ;;  %v1586_v36 = vmul.f32 0.5, %v3037_v16 }
 0x2bb   :  { %v3041_v58 = vpop.eup %3040  ;;  %v1284_v49 = vpop.permute.xlu1 %1283  ;;  %v1587_v22 = vmul.f32 0.5, %v3039_v15  ;;  %v2091_v33 = vpack.c.bf16 %v2065_v47, %v2063_v29  ;;  %v1361_v43 = vadd.f32 %v1329_v14, %v1225_v25 }
 0x2bc   :  { %v2034_v3 = vmul.f32 0.5, %v3041_v58  ;;  %v1618_v50 = vadd.f32 0.5, %v1586_v36  ;;  %v1326_v4 = vmul.f32 %v3826_v21, %v1284_v49  ;;  %v1327_v48 = vmul.f32 %v5107_v34, %v1284_v49 }
 0x2bd   :  { %v1619_v20 = vadd.f32 0.5, %v1587_v22  ;;  %v1360_v21 = vadd.f32 %v1328_v10, %v1224_v7 }
 0x2be   :  { %v2066_v53 = vadd.f32 0.5, %v2034_v3  ;;  %v1638_v60 = vpack.c.bf16 %v1620_v46, %v1618_v50  ;;  %v1358_v62 = vadd.f32 %v1326_v4, %v1222_v32  ;;  %v1359_v17 = vadd.f32 %v1327_v48, %v1223_v24 }
 0x2bf   :  { %v1639_v31 = vpack.c.bf16 %v1621_v37, %v1619_v20 }
 0x2c0   :  { %v2092_v9 = vpack.c.bf16 %v2066_v53, %v2064_v38  ;;  %v1420_v35 = vpop.permute.xlu1 %1419 }
 0x2c1   :  { %1938 = vmatprep.mubr.bf16.mxu0 %v1639_v31  ;;  %v1462_v55 = vmul.f32 %v3900_v57, %v1420_v35  ;;  %v1463_v52 = vmul.f32 %v3905_v13, %v1420_v35 }
 0x2c2   :  { %2359 = vmatprep.mubr.bf16.mxu1 %v2092_v9  ;;  %1939 = vmatmul.mubr.bf16.gmra.mrb[24].mxu0 %v1638_v60 }
 0x2c3   :  { %2360 = vmatmul.mubr.bf16.gmra.mrb[8].mxu1 %v2091_v33  ;;  %v1494_v54 = vadd.f32 %v1462_v55, %v1358_v62  ;;  %v1495_v39 = vadd.f32 %v1463_v52, %v1359_v17 }
 0x2c4   :  { %v1424_v12 = vpop.permute.xlu1 %1423 }
 0x2c5   :  { %v1526_v26 = vmul.f32 0.5, %v1494_v54  ;;  %v1527_v40 = vmul.f32 0.5, %v1495_v39  ;;  %v1464_v34 = vmul.f32 %v3900_v57, %v1424_v12  ;;  %v1465_v2 = vmul.f32 %v3905_v13, %v1424_v12 }
 0x2c7   :  { %3042 = vtanh.f32 %v1526_v26  ;;  %v1496_v30 = vadd.f32 %v1464_v34, %v1360_v21  ;;  %v1497_v18 = vadd.f32 %v1465_v2, %v1361_v43 }
 0x2c8   :  { %3044 = vtanh.f32 %v1527_v40 }
 0x2c9   :  { %v1528_v42 = vmul.f32 0.5, %v1496_v30  ;;  %v1529_v11 = vmul.f32 0.5, %v1497_v18 }
 0x2cb   :  { %3046 = vtanh.f32 %v1528_v42 }
 0x2cc   :  { %3048 = vtanh.f32 %v1529_v11 }
 0x2d1   :  { %v3043_v23 = vpop.eup %3042 }
 0x2d2   :  { %v3045_v8 = vpop.eup %3044  ;;  %v1590_v51 = vmul.f32 0.5, %v3043_v23 }
 0x2d3   :  { %v1591_v61 = vmul.f32 0.5, %v3045_v8 }
 0x2d4   :  { %v1622_v15 = vadd.f32 0.5, %v1590_v51 }
 0x2d5   :  { %v3047_v16 = vpop.eup %3046  ;;  %v1623_v28 = vadd.f32 0.5, %v1591_v61 }
 0x2d6   :  { %v3049_v63 = vpop.eup %3048  ;;  %v1592_v59 = vmul.f32 0.5, %v3047_v16 }
 0x2d7   :  { %v1593_v5 = vmul.f32 0.5, %v3049_v63 }
 0x2d8   :  { %v1624_v57 = vadd.f32 0.5, %v1592_v59  ;;  %v2135_v59 = vld [vmem:[%s4879_s6] sm:$0x3] }
 0x2d9   :  { %v1625_v13 = vadd.f32 0.5, %v1593_v5  ;;  %v4737_v5 = vrot.slane %v2135_v59, %v5143_v0 }
 0x2da   :  { %v1640_v45 = vpack.c.bf16 %v1624_v57, %v1622_v15  ;;  %v4740_v15 = vrot.slane %v2135_v59, %v5144_v1 }
 0x2db   :  { %v1641_v37 = vpack.c.bf16 %v1625_v13, %v1623_v28 }
 0x2dd   :  { %1948 = vmatprep.mubr.bf16.mxu0 %v1641_v37 }
 0x2de   :  { %1949 = vmatmul.mubr.bf16.gmra.mrb[28].mxu0 %v1640_v45 }
 0x2e4   :  { %v1910_v36 = vpop.f32.mrb[12].mxu0 }
 0x2e5   :  { %v1911_v58 = vadd.f32 %v1910_v36, %v4595_v56  ;;  %v1912_v29 = vpop.f32.mrb[13].mxu0 }
 0x2e6   :  { %v1913_v47 = vadd.f32 %v1912_v29, %v4599_v19  ;;  %v1914_v49 = vpop.f32.mrb[14].mxu0 }
 0x2e7   :  { %v1971_v22 = vmul.f32 0.5, %v1911_v58  ;;  %v1915_v46 = vadd.f32 %v1914_v49, %v4595_v56  ;;  %v1916_v3 = vpop.f32.mrb[15].mxu0 }
 0x2e8   :  { %v1972_v27 = vmul.f32 0.5, %v1913_v47  ;;  %v1917_v41 = vadd.f32 %v1916_v3, %v4599_v19 }
 0x2e9   :  { %3050 = vtanh.f32 %v1971_v22  ;;  %v1973_v44 = vmul.f32 0.5, %v1915_v46 }
 0x2ea   :  { %3052 = vtanh.f32 %v1972_v27  ;;  %v1974_v50 = vmul.f32 0.5, %v1917_v41 }
 0x2eb   :  { %3054 = vtanh.f32 %v1973_v44  ;;  %v2420_v44 = vld [vmem:[%s4880_s7] sm:$0x3]  ;;  %s3299_s7 = smov [#allocation11]  }
 0x2ec   :  { %3056 = vtanh.f32 %v1974_v50  ;;  %s2679_s8 = sshll.u32 %s3299_s7, 4  ;;  %s2680_s8 = int_to_ptr.vmem [resolvable:$true] %s2679_s8 }
 0x2ed   :  { %s3251_s20 = scalar_lea.vmem %s2680_s8, 16  ;;  %s3255_s21 = scalar_lea.vmem %s2680_s8, 32 }
 0x2ee   :  { %p3252_p4 = scmp.ne.s32.totalorder %s2680_s8, %s3251_s20  ;;  %p3256_p5 = scmp.lt.s32.totalorder %s2680_s8, %s2680_s8 }
 0x2ef   :  { %p3257_p6 = scmp.lt.s32.totalorder %s3255_s21, %s3251_s20 }
 0x2f1   :  { %p3258_p7 = por %p3257_p6, %p3256_p5 }
 0x2f3   :  { %v3051_v4 = vpop.eup %3050  ;;  %p3259_p8 = pnand %p3258_p7, %p3252_p4 }
 0x2f4   :  { %v3053_v48 = vpop.eup %3052  ;;  %v2035_v20 = vmul.f32 0.5, %v3051_v4 }
 0x2f5   :  { %v3055_v33 = vpop.eup %3054  ;;  %v2036_v38 = vmul.f32 0.5, %v3053_v48 }
 0x2f6   :  { %v3057_v53 = vpop.eup %3056  ;;  %v2037_v6 = vmul.f32 0.5, %v3055_v33  ;;  %v2067_v32 = vadd.f32 0.5, %v2035_v20 }
 0x2f7   :  { %v2038_v60 = vmul.f32 0.5, %v3057_v53  ;;  %v2068_v10 = vadd.f32 0.5, %v2036_v38 }
 0x2f8   :  { %v2069_v24 = vadd.f32 0.5, %v2037_v6  ;;  %v4754_v6 = vrot.slane %v2420_v44, %v5143_v0 }
 0x2f9   :  { %v2070_v31 = vadd.f32 0.5, %v2038_v60 }
 0x2fa   :  { %v2093_v7 = vpack.c.bf16 %v2069_v24, %v2067_v32  ;;  %v4757_v32 = vrot.slane %v2420_v44, %v5144_v1 }
 0x2fb   :  { %v2094_v25 = vpack.c.bf16 %v2070_v31, %v2068_v10 }
 0x2fd   :  { %2369 = vmatprep.mubr.bf16.mxu1 %v2094_v25 }
 0x2fe   :  { %2370 = vmatmul.mubr.bf16.gmra.mrb[12].mxu1 %v2093_v7 }
 0x323   :  { %v1920_v14 = vpop.f32.mrb[16].mxu0 }
 0x324   :  { %v1921_v9 = vadd.f32 %v1920_v14, %v4595_v56  ;;  %v1922_v35 = vpop.f32.mrb[17].mxu0 }
 0x325   :  { %v1923_v62 = vadd.f32 %v1922_v35, %v4599_v19  ;;  %v1924_v17 = vpop.f32.mrb[18].mxu0 }
 0x326   :  { %v1975_v55 = vmul.f32 0.5, %v1921_v9  ;;  %v1925_v52 = vadd.f32 %v1924_v17, %v4595_v56  ;;  %v1926_v54 = vpop.f32.mrb[19].mxu0 }
 0x327   :  { %v1976_v39 = vmul.f32 0.5, %v1923_v62  ;;  %v1927_v21 = vadd.f32 %v1926_v54, %v4599_v19 }
 0x328   :  { %3058 = vtanh.f32 %v1975_v55  ;;  %v1977_v43 = vmul.f32 0.5, %v1925_v52 }
 0x329   :  { %3060 = vtanh.f32 %v1976_v39  ;;  %v1978_v12 = vmul.f32 0.5, %v1927_v21 }
 0x32a   :  { %3062 = vtanh.f32 %v1977_v43 }
 0x32b   :  { %3064 = vtanh.f32 %v1978_v12 }
 0x332   :  { %v3059_v26 = vpop.eup %3058 }
 0x333   :  { %v3061_v40 = vpop.eup %3060  ;;  %v2039_v34 = vmul.f32 0.5, %v3059_v26 }
 0x334   :  { %v3063_v2 = vpop.eup %3062  ;;  %v2040_v30 = vmul.f32 0.5, %v3061_v40 }
 0x335   :  { %v3065_v18 = vpop.eup %3064  ;;  %v2041_v42 = vmul.f32 0.5, %v3063_v2  ;;  %v2071_v23 = vadd.f32 0.5, %v2039_v34 }
 0x336   :  { %v2042_v11 = vmul.f32 0.5, %v3065_v18  ;;  %v2072_v51 = vadd.f32 0.5, %v2040_v30 }
 0x337   :  { %v2073_v8 = vadd.f32 0.5, %v2041_v42 }
 0x338   :  { %v2074_v16 = vadd.f32 0.5, %v2042_v11 }
 0x339   :  { %v2095_v61 = vpack.c.bf16 %v2073_v8, %v2071_v23 }
 0x33a   :  { %v2096_v63 = vpack.c.bf16 %v2074_v16, %v2072_v51 }
 0x33c   :  { %2379 = vmatprep.mubr.bf16.mxu1 %v2096_v63 }
 0x33d   :  { %2380 = vmatmul.mubr.bf16.gmra.mrb[16].mxu1 %v2095_v61 }
 0x354   :  { %v2341_v57 = vpop.f32.mrb[0].mxu1 }
 0x355   :  { %v2342_v28 = vadd.f32 %v2341_v57, %v4737_v5  ;;  %v2343_v13 = vpop.f32.mrb[1].mxu1 }
 0x356   :  { %v2344_v45 = vadd.f32 %v2343_v13, %v4740_v15  ;;  %v2345_v37 = vpop.f32.mrb[2].mxu1 }
 0x357   :  { %v2421_v36 = vmul.f32 0.5, %v2342_v28  ;;  %v2346_v58 = vadd.f32 %v2345_v37, %v4737_v5  ;;  %v2347_v29 = vpop.f32.mrb[3].mxu1 }
 0x358   :  { %v2422_v47 = vmul.f32 0.5, %v2344_v45  ;;  %v2348_v49 = vadd.f32 %v2347_v29, %v4740_v15 }
 0x359   :  { %3066 = vtanh.f32 %v2421_v36  ;;  %v2423_v22 = vmul.f32 0.5, %v2346_v58 }
 0x35a   :  { %3068 = vtanh.f32 %v2422_v47  ;;  %v2424_v46 = vmul.f32 0.5, %v2348_v49 }
 0x35b   :  { %3070 = vtanh.f32 %v2423_v22 }
 0x35c   :  { %3072 = vtanh.f32 %v2424_v46  ;;  %v2351_v3 = vpop.f32.mrb[4].mxu1 }
 0x35d   :  { %v2352_v27 = vadd.f32 %v2351_v3, %v4737_v5  ;;  %v2353_v41 = vpop.f32.mrb[5].mxu1 }
 0x35e   :  { %v2354_v50 = vadd.f32 %v2353_v41, %v4740_v15  ;;  %v2355_v4 = vpop.f32.mrb[6].mxu1 }
 0x35f   :  { %v2425_v48 = vmul.f32 0.5, %v2352_v27  ;;  %v2356_v20 = vadd.f32 %v2355_v4, %v4737_v5  ;;  %v2357_v33 = vpop.f32.mrb[7].mxu1 }
 0x360   :  { %v2426_v38 = vmul.f32 0.5, %v2354_v50  ;;  %v2358_v53 = vadd.f32 %v2357_v33, %v4740_v15 }
 0x361   :  { %3074 = vtanh.f32 %v2425_v48  ;;  %v2427_v60 = vmul.f32 0.5, %v2356_v20 }
 0x362   :  { %3076 = vtanh.f32 %v2426_v38  ;;  %v2428_v24 = vmul.f32 0.5, %v2358_v53 }
 0x363   :  { %v3067_v10 = vpop.eup %3066  ;;  %3078 = vtanh.f32 %v2427_v60 }
 0x364   :  { %v3069_v7 = vpop.eup %3068  ;;  %3080 = vtanh.f32 %v2428_v24  ;;  %v2496_v9 = vmul.f32 %v3067_v10, %v4754_v6 }
 0x365   :  { %v1930_v31 = vpop.f32.mrb[20].mxu0  ;;  %v3071_v35 = vpop.eup %3070  ;;  %v2497_v55 = vmul.f32 %v3069_v7, %v4757_v32 }
 0x366   :  { %v1931_v25 = vadd.f32 %v1930_v31, %v4595_v56  ;;  %v1932_v14 = vpop.f32.mrb[21].mxu0  ;;  %v3073_v1 = vpop.eup %3072  ;;  %v2528_v21 = vadd.f32 %v2496_v9, %v4754_v6  ;;  %v2498_v43 = vmul.f32 %v3071_v35, %v4754_v6 }
 0x367   :  { %v1933_v62 = vadd.f32 %v1932_v14, %v4599_v19  ;;  %v1934_v17 = vpop.f32.mrb[22].mxu0  ;;  %v2529_v40 = vadd.f32 %v2497_v55, %v4757_v32  ;;  %v2499_v34 = vmul.f32 %v3073_v1, %v4757_v32 }
 0x368   :  { %v1979_v52 = vmul.f32 0.5, %v1931_v25  ;;  %v1935_v54 = vadd.f32 %v1934_v17, %v4595_v56  ;;  %v1936_v39 = vpop.f32.mrb[23].mxu0  ;;  %2561 = vxpose.xlu0.b32.start [1/16] %v2528_v21, 128  ;;  %v2530_v18 = vadd.f32 %v2498_v43, %v4754_v6 }
 0x369   :  { %v1980_v12 = vmul.f32 0.5, %v1933_v62  ;;  %v1937_v26 = vadd.f32 %v1936_v39, %v4599_v19  ;;  %2593 = vxpose.xlu1.b32.start [1/16] %v2529_v40, 128  ;;  %v2531_v11 = vadd.f32 %v2499_v34, %v4757_v32 }
 0x36a   :  { %3082 = vtanh.f32 %v1979_v52  ;;  %v1981_v2 = vmul.f32 0.5, %v1935_v54 }
 0x36b   :  { %3084 = vtanh.f32 %v1980_v12  ;;  %v1982_v30 = vmul.f32 0.5, %v1937_v26  ;;  %v3075_v42 = vpop.eup %3074 }
 0x36c   :  { %3086 = vtanh.f32 %v1981_v2  ;;  %v3077_v23 = vpop.eup %3076  ;;  %2562 = vxpose.xlu0.b32.cont [2/16] %v2530_v18, 128  ;;  %v2500_v8 = vmul.f32 %v3075_v42, %v4754_v6 }
 0x36d   :  { %3088 = vtanh.f32 %v1982_v30  ;;  %v3079_v51 = vpop.eup %3078  ;;  %2594 = vxpose.xlu1.b32.cont [2/16] %v2531_v11, 128  ;;  %v2501_v16 = vmul.f32 %v3077_v23, %v4757_v32 }
 0x36e   :  { %v3081_v61 = vpop.eup %3080  ;;  %v2532_v63 = vadd.f32 %v2500_v8, %v4754_v6  ;;  %v2502_v59 = vmul.f32 %v3079_v51, %v4754_v6 }
 0x36f   :  { %v2533_v57 = vadd.f32 %v2501_v16, %v4757_v32  ;;  %v2503_v28 = vmul.f32 %v3081_v61, %v4757_v32 }
 0x370   :  { %2563 = vxpose.xlu0.b32.cont [3/16] %v2532_v63, 128  ;;  %v2534_v45 = vadd.f32 %v2502_v59, %v4754_v6 }
 0x371   :  { %2595 = vxpose.xlu1.b32.cont [3/16] %v2533_v57, 128  ;;  %v2535_v58 = vadd.f32 %v2503_v28, %v4757_v32 }
 0x374   :  { %v3083_v13 = vpop.eup %3082  ;;  %2564 = vxpose.xlu0.b32.cont [4/16] %v2534_v45, 128 }
 0x375   :  { %v3085_v37 = vpop.eup %3084  ;;  %v2043_v36 = vmul.f32 0.5, %v3083_v13  ;;  %2596 = vxpose.xlu1.b32.cont [4/16] %v2535_v58, 128 }
 0x376   :  { %v3087_v29 = vpop.eup %3086  ;;  %v2044_v47 = vmul.f32 0.5, %v3085_v37 }
 0x377   :  { %v3089_v49 = vpop.eup %3088  ;;  %v2045_v22 = vmul.f32 0.5, %v3087_v29  ;;  %v2075_v3 = vadd.f32 0.5, %v2043_v36 }
 0x378   :  { %v2046_v46 = vmul.f32 0.5, %v3089_v49  ;;  %v2076_v41 = vadd.f32 0.5, %v2044_v47 }
 0x379   :  { %v2077_v27 = vadd.f32 0.5, %v2045_v22 }
 0x37a   :  { %v2078_v44 = vadd.f32 0.5, %v2046_v46 }
 0x37b   :  { %v2097_v50 = vpack.c.bf16 %v2077_v27, %v2075_v3 }
 0x37c   :  { %v2098_v4 = vpack.c.bf16 %v2078_v44, %v2076_v41 }
 0x37e   :  { %2389 = vmatprep.mubr.bf16.mxu1 %v2098_v4 }
 0x37f   :  { %2390 = vmatmul.mubr.bf16.gmra.mrb[20].mxu1 %v2097_v50 }
 0x395   :  { %v1940_v48 = vpop.f32.mrb[24].mxu0 }
 0x396   :  { %v2361_v20 = vpop.f32.mrb[8].mxu1  ;;  %v1941_v33 = vadd.f32 %v1940_v48, %v4595_v56  ;;  %v1942_v38 = vpop.f32.mrb[25].mxu0 }
 0x397   :  { %v2362_v53 = vadd.f32 %v2361_v20, %v4737_v5  ;;  %v2363_v60 = vpop.f32.mrb[9].mxu1  ;;  %v1943_v24 = vadd.f32 %v1942_v38, %v4599_v19  ;;  %v1944_v10 = vpop.f32.mrb[26].mxu0 }
 0x398   :  { %v1983_v31 = vmul.f32 0.5, %v1941_v33  ;;  %v2364_v7 = vadd.f32 %v2363_v60, %v4740_v15  ;;  %v2365_v25 = vpop.f32.mrb[10].mxu1  ;;  %v1945_v14 = vadd.f32 %v1944_v10, %v4595_v56  ;;  %v1946_v9 = vpop.f32.mrb[27].mxu0 }
 0x399   :  { %v2429_v35 = vmul.f32 0.5, %v2362_v53  ;;  %v1984_v62 = vmul.f32 0.5, %v1943_v24  ;;  %v2366_v17 = vadd.f32 %v2365_v25, %v4737_v5  ;;  %v2367_v55 = vpop.f32.mrb[11].mxu1  ;;  %v1947_v1 = vadd.f32 %v1946_v9, %v4599_v19 }
 0x39a   :  { %3090 = vtanh.f32 %v1983_v31  ;;  %v2430_v52 = vmul.f32 0.5, %v2364_v7  ;;  %v2368_v54 = vadd.f32 %v2367_v55, %v4740_v15  ;;  %v1985_v21 = vmul.f32 0.5, %v1945_v14 }
 0x39b   :  { %3092 = vtanh.f32 %v2429_v35  ;;  %v2431_v39 = vmul.f32 0.5, %v2366_v17  ;;  %v1986_v12 = vmul.f32 0.5, %v1947_v1 }
 0x39c   :  { %3094 = vtanh.f32 %v2430_v52  ;;  %v2432_v43 = vmul.f32 0.5, %v2368_v54 }
 0x39d   :  { %3096 = vtanh.f32 %v1984_v62 }
 0x39e   :  { %3098 = vtanh.f32 %v2431_v39 }
 0x39f   :  { %3100 = vtanh.f32 %v1985_v21 }
 0x3a0   :  { %3102 = vtanh.f32 %v2432_v43 }
 0x3a1   :  { %3104 = vtanh.f32 %v1986_v12 }
 0x3a4   :  { %v3091_v26 = vpop.eup %3090 }
 0x3a5   :  { %v3093_v40 = vpop.eup %3092  ;;  %v2047_v11 = vmul.f32 0.5, %v3091_v26 }
 0x3a6   :  { %v3095_v34 = vpop.eup %3094  ;;  %v2504_v2 = vmul.f32 %v3093_v40, %v4754_v6 }
 0x3a7   :  { %v3097_v30 = vpop.eup %3096  ;;  %v2505_v18 = vmul.f32 %v3095_v34, %v4757_v32  ;;  %v2079_v13 = vadd.f32 0.5, %v2047_v11 }
 0x3a8   :  { %v3099_v42 = vpop.eup %3098  ;;  %v2536_v23 = vadd.f32 %v2504_v2, %v4754_v6  ;;  %v2048_v63 = vmul.f32 0.5, %v3097_v30 }
 0x3a9   :  { %v3101_v8 = vpop.eup %3100  ;;  %v2537_v51 = vadd.f32 %v2505_v18, %v4757_v32  ;;  %v2506_v16 = vmul.f32 %v3099_v42, %v4754_v6 }
 0x3aa   :  { %v3103_v61 = vpop.eup %3102  ;;  %v2049_v59 = vmul.f32 0.5, %v3101_v8  ;;  %2565 = vxpose.xlu0.b32.cont [5/16] %v2536_v23, 128  ;;  %v2080_v29 = vadd.f32 0.5, %v2048_v63 }
 0x3ab   :  { %v3105_v57 = vpop.eup %3104  ;;  %2597 = vxpose.xlu1.b32.cont [5/16] %v2537_v51, 128  ;;  %v2507_v28 = vmul.f32 %v3103_v61, %v4757_v32  ;;  %v2538_v36 = vadd.f32 %v2506_v16, %v4754_v6 }
 0x3ac   :  { %v2081_v45 = vadd.f32 0.5, %v2049_v59  ;;  %v2050_v37 = vmul.f32 0.5, %v3105_v57 }
 0x3ad   :  { %v2539_v58 = vadd.f32 %v2507_v28, %v4757_v32 }
 0x3ae   :  { %v2082_v47 = vadd.f32 0.5, %v2050_v37  ;;  %2566 = vxpose.xlu0.b32.cont [6/16] %v2538_v36, 128  ;;  %v2099_v49 = vpack.c.bf16 %v2081_v45, %v2079_v13 }
 0x3af   :  { %2598 = vxpose.xlu1.b32.cont [6/16] %v2539_v58, 128 }
 0x3b0   :  { %v2100_v22 = vpack.c.bf16 %v2082_v47, %v2080_v29 }
 0x3b1   :  { %v1950_v46 = vpop.f32.mrb[28].mxu0 }
 0x3b2   :  { %2399 = vmatprep.mubr.bf16.mxu1 %v2100_v22  ;;  %v1951_v3 = vadd.f32 %v1950_v46, %v4595_v56  ;;  %v1952_v27 = vpop.f32.mrb[29].mxu0 }
 0x3b3   :  { %2400 = vmatmul.mubr.bf16.gmra.mrb[24].mxu1 %v2099_v49  ;;  %v1953_v41 = vadd.f32 %v1952_v27, %v4599_v19  ;;  %v1954_v44 = vpop.f32.mrb[30].mxu0 }
 0x3b4   :  { %v1987_v50 = vmul.f32 0.5, %v1951_v3  ;;  %v1955_v4 = vadd.f32 %v1954_v44, %v4595_v56  ;;  %v1956_v48 = vpop.f32.mrb[31].mxu0 }
 0x3b5   :  { %v1988_v20 = vmul.f32 0.5, %v1953_v41  ;;  %v1957_v33 = vadd.f32 %v1956_v48, %v4599_v19 }
 0x3b6   :  { %3106 = vtanh.f32 %v1987_v50  ;;  %v1989_v38 = vmul.f32 0.5, %v1955_v4 }
 0x3b7   :  { %3108 = vtanh.f32 %v1988_v20  ;;  %v1990_v53 = vmul.f32 0.5, %v1957_v33 }
 0x3b8   :  { %3110 = vtanh.f32 %v1989_v38 }
 0x3b9   :  { %3112 = vtanh.f32 %v1990_v53 }
 0x3c0   :  { %v3107_v60 = vpop.eup %3106 }
 0x3c1   :  { %v3109_v24 = vpop.eup %3108  ;;  %v2051_v10 = vmul.f32 0.5, %v3107_v60 }
 0x3c2   :  { %v3111_v31 = vpop.eup %3110  ;;  %v2052_v7 = vmul.f32 0.5, %v3109_v24 }
 0x3c3   :  { %v3113_v25 = vpop.eup %3112  ;;  %v2053_v14 = vmul.f32 0.5, %v3111_v31  ;;  %v2083_v35 = vadd.f32 0.5, %v2051_v10 }
 0x3c4   :  { %v2054_v9 = vmul.f32 0.5, %v3113_v25  ;;  %v2084_v62 = vadd.f32 0.5, %v2052_v7 }
 0x3c5   :  { %v2085_v56 = vadd.f32 0.5, %v2053_v14 }
 0x3c6   :  { %v2086_v17 = vadd.f32 0.5, %v2054_v9 }
 0x3c7   :  { %v2101_v55 = vpack.c.bf16 %v2085_v56, %v2083_v35 }
 0x3c8   :  { %v2102_v19 = vpack.c.bf16 %v2086_v17, %v2084_v62 }
 0x3ca   :  { %2409 = vmatprep.mubr.bf16.mxu1 %v2102_v19 }
 0x3cb   :  { %2410 = vmatmul.mubr.bf16.gmra.mrb[28].mxu1 %v2101_v55 }
 0x3d1   :  { %v2371_v1 = vpop.f32.mrb[12].mxu1 }
 0x3d2   :  { %v2372_v52 = vadd.f32 %v2371_v1, %v4737_v5  ;;  %v2373_v54 = vpop.f32.mrb[13].mxu1 }
 0x3d3   :  { %v2374_v39 = vadd.f32 %v2373_v54, %v4740_v15  ;;  %v2375_v21 = vpop.f32.mrb[14].mxu1 }
 0x3d4   :  { %v2433_v43 = vmul.f32 0.5, %v2372_v52  ;;  %v2376_v12 = vadd.f32 %v2375_v21, %v4737_v5  ;;  %v2377_v26 = vpop.f32.mrb[15].mxu1 }
 0x3d5   :  { %v2434_v40 = vmul.f32 0.5, %v2374_v39  ;;  %v2378_v34 = vadd.f32 %v2377_v26, %v4740_v15 }
 0x3d6   :  { %3114 = vtanh.f32 %v2433_v43  ;;  %v2435_v2 = vmul.f32 0.5, %v2376_v12 }
 0x3d7   :  { %3116 = vtanh.f32 %v2434_v40  ;;  %v2436_v30 = vmul.f32 0.5, %v2378_v34 }
 0x3d8   :  { %3118 = vtanh.f32 %v2435_v2 }
 0x3d9   :  { %3120 = vtanh.f32 %v2436_v30 }
 0x3e0   :  { %v3115_v18 = vpop.eup %3114 }
 0x3e1   :  { %v3117_v42 = vpop.eup %3116  ;;  %v2508_v11 = vmul.f32 %v3115_v18, %v4754_v6 }
 0x3e2   :  { %v3119_v23 = vpop.eup %3118  ;;  %v2509_v8 = vmul.f32 %v3117_v42, %v4757_v32 }
 0x3e3   :  { %v3121_v51 = vpop.eup %3120  ;;  %v2540_v16 = vadd.f32 %v2508_v11, %v4754_v6  ;;  %v2510_v61 = vmul.f32 %v3119_v23, %v4754_v6 }
 0x3e4   :  { %v2541_v63 = vadd.f32 %v2509_v8, %v4757_v32  ;;  %v2511_v59 = vmul.f32 %v3121_v51, %v4757_v32 }
 0x3e5   :  { %2567 = vxpose.xlu0.b32.cont [7/16] %v2540_v16, 128  ;;  %v2542_v57 = vadd.f32 %v2510_v61, %v4754_v6 }
 0x3e6   :  { %2599 = vxpose.xlu1.b32.cont [7/16] %v2541_v63, 128  ;;  %v2543_v28 = vadd.f32 %v2511_v59, %v4757_v32 }
 0x3e9   :  { %2568 = vxpose.xlu0.b32.cont [8/16] %v2542_v57, 128 }
 0x3ea   :  { %2600 = vxpose.xlu1.b32.cont [8/16] %v2543_v28, 128 }
 0x410   :  { %v2381_v13 = vpop.f32.mrb[16].mxu1 }
 0x411   :  { %v2382_v45 = vadd.f32 %v2381_v13, %v4737_v5  ;;  %v2383_v37 = vpop.f32.mrb[17].mxu1 }
 0x412   :  { %v2384_v36 = vadd.f32 %v2383_v37, %v4740_v15  ;;  %v2385_v58 = vpop.f32.mrb[18].mxu1 }
 0x413   :  { %v2437_v29 = vmul.f32 0.5, %v2382_v45  ;;  %v2386_v47 = vadd.f32 %v2385_v58, %v4737_v5  ;;  %v2387_v49 = vpop.f32.mrb[19].mxu1 }
 0x414   :  { %v2438_v22 = vmul.f32 0.5, %v2384_v36  ;;  %v2388_v46 = vadd.f32 %v2387_v49, %v4740_v15 }
 0x415   :  { %3122 = vtanh.f32 %v2437_v29  ;;  %v2439_v3 = vmul.f32 0.5, %v2386_v47 }
 0x416   :  { %3124 = vtanh.f32 %v2438_v22  ;;  %v2440_v27 = vmul.f32 0.5, %v2388_v46 }
 0x417   :  { %3126 = vtanh.f32 %v2439_v3 }
 0x418   :  { %3128 = vtanh.f32 %v2440_v27 }
 0x41f   :  { %v3123_v41 = vpop.eup %3122 }
 0x420   :  { %v3125_v44 = vpop.eup %3124  ;;  %v2512_v50 = vmul.f32 %v3123_v41, %v4754_v6 }
 0x421   :  { %v3127_v4 = vpop.eup %3126  ;;  %v2513_v48 = vmul.f32 %v3125_v44, %v4757_v32 }
 0x422   :  { %v3129_v20 = vpop.eup %3128  ;;  %v2544_v33 = vadd.f32 %v2512_v50, %v4754_v6  ;;  %v2514_v38 = vmul.f32 %v3127_v4, %v4754_v6 }
 0x423   :  { %v2545_v53 = vadd.f32 %v2513_v48, %v4757_v32  ;;  %v2515_v60 = vmul.f32 %v3129_v20, %v4757_v32 }
 0x424   :  { %2569 = vxpose.xlu0.b32.cont [9/16] %v2544_v33, 128  ;;  %v2546_v24 = vadd.f32 %v2514_v38, %v4754_v6 }
 0x425   :  { %2601 = vxpose.xlu1.b32.cont [9/16] %v2545_v53, 128  ;;  %v2547_v10 = vadd.f32 %v2515_v60, %v4757_v32 }
 0x428   :  { %2570 = vxpose.xlu0.b32.cont [10/16] %v2546_v24, 128 }
 0x429   :  { %2602 = vxpose.xlu1.b32.cont [10/16] %v2547_v10, 128 }
 0x452   :  { %v2391_v31 = vpop.f32.mrb[20].mxu1 }
 0x453   :  { %v2392_v7 = vadd.f32 %v2391_v31, %v4737_v5  ;;  %v2393_v25 = vpop.f32.mrb[21].mxu1 }
 0x454   :  { %v2394_v14 = vadd.f32 %v2393_v25, %v4740_v15  ;;  %v2395_v9 = vpop.f32.mrb[22].mxu1 }
 0x455   :  { %v2441_v35 = vmul.f32 0.5, %v2392_v7  ;;  %v2396_v56 = vadd.f32 %v2395_v9, %v4737_v5  ;;  %v2397_v62 = vpop.f32.mrb[23].mxu1 }
 0x456   :  { %v2442_v17 = vmul.f32 0.5, %v2394_v14  ;;  %v2398_v55 = vadd.f32 %v2397_v62, %v4740_v15 }
 0x457   :  { %3130 = vtanh.f32 %v2441_v35  ;;  %v2443_v19 = vmul.f32 0.5, %v2396_v56 }
 0x458   :  { %3132 = vtanh.f32 %v2442_v17  ;;  %v2444_v1 = vmul.f32 0.5, %v2398_v55 }
 0x459   :  { %3134 = vtanh.f32 %v2443_v19 }
 0x45a   :  { %3136 = vtanh.f32 %v2444_v1  ;;  %v2560_v1 = vld [vmem:[#allocation2] sm:$0x1] }
 0x461   :  { %v3131_v52 = vpop.eup %3130 }
 0x462   :  { %v3133_v54 = vpop.eup %3132  ;;  %v2516_v39 = vmul.f32 %v3131_v52, %v4754_v6  ;;  %v5148_v52 = vmov 0  }
 0x463   :  { %v3135_v21 = vpop.eup %3134  ;;  %v2517_v43 = vmul.f32 %v3133_v54, %v4757_v32 }
 0x464   :  { %v3137_v12 = vpop.eup %3136  ;;  %v2548_v26 = vadd.f32 %v2516_v39, %v4754_v6  ;;  %v2518_v40 = vmul.f32 %v3135_v21, %v4754_v6 }
 0x465   :  { %v2549_v34 = vadd.f32 %v2517_v43, %v4757_v32  ;;  %v2519_v2 = vmul.f32 %v3137_v12, %v4757_v32 }
 0x466   :  { %2571 = vxpose.xlu0.b32.cont [11/16] %v2548_v26, 128  ;;  %v2550_v30 = vadd.f32 %v2518_v40, %v4754_v6 }
 0x467   :  { %2603 = vxpose.xlu1.b32.cont [11/16] %v2549_v34, 128  ;;  %v2551_v18 = vadd.f32 %v2519_v2, %v4757_v32 }
 0x46a   :  { %2572 = vxpose.xlu0.b32.cont [12/16] %v2550_v30, 128 }
 0x46b   :  { %2604 = vxpose.xlu1.b32.cont [12/16] %v2551_v18, 128 }
 0x486   :  { %v2401_v42 = vpop.f32.mrb[24].mxu1 }
 0x487   :  { %v2402_v11 = vadd.f32 %v2401_v42, %v4737_v5  ;;  %v2403_v23 = vpop.f32.mrb[25].mxu1 }
 0x488   :  { %v2404_v8 = vadd.f32 %v2403_v23, %v4740_v15  ;;  %v2405_v51 = vpop.f32.mrb[26].mxu1 }
 0x489   :  { %v2445_v16 = vmul.f32 0.5, %v2402_v11  ;;  %v2406_v61 = vadd.f32 %v2405_v51, %v4737_v5  ;;  %v2407_v63 = vpop.f32.mrb[27].mxu1 }
 0x48a   :  { %v2446_v59 = vmul.f32 0.5, %v2404_v8  ;;  %v2408_v57 = vadd.f32 %v2407_v63, %v4740_v15 }
 0x48b   :  { %3138 = vtanh.f32 %v2445_v16  ;;  %v2447_v28 = vmul.f32 0.5, %v2406_v61 }
 0x48c   :  { %3140 = vtanh.f32 %v2446_v59  ;;  %v2448_v13 = vmul.f32 0.5, %v2408_v57 }
 0x48d   :  { %3142 = vtanh.f32 %v2447_v28 }
 0x48e   :  { %3144 = vtanh.f32 %v2448_v13 }
 0x495   :  { %v3139_v45 = vpop.eup %3138 }
 0x496   :  { %v3141_v37 = vpop.eup %3140  ;;  %v2520_v36 = vmul.f32 %v3139_v45, %v4754_v6 }
 0x497   :  { %v3143_v58 = vpop.eup %3142  ;;  %v2521_v29 = vmul.f32 %v3141_v37, %v4757_v32 }
 0x498   :  { %v3145_v47 = vpop.eup %3144  ;;  %v2552_v49 = vadd.f32 %v2520_v36, %v4754_v6  ;;  %v2522_v22 = vmul.f32 %v3143_v58, %v4754_v6 }
 0x499   :  { %v2553_v46 = vadd.f32 %v2521_v29, %v4757_v32  ;;  %v2523_v3 = vmul.f32 %v3145_v47, %v4757_v32 }
 0x49a   :  { %2573 = vxpose.xlu0.b32.cont [13/16] %v2552_v49, 128  ;;  %v2554_v27 = vadd.f32 %v2522_v22, %v4754_v6 }
 0x49b   :  { %2605 = vxpose.xlu1.b32.cont [13/16] %v2553_v46, 128  ;;  %v2555_v41 = vadd.f32 %v2523_v3, %v4757_v32 }
 0x49e   :  { %2574 = vxpose.xlu0.b32.cont [14/16] %v2554_v27, 128  ;;  %v2411_v44 = vpop.f32.mrb[28].mxu1 }
 0x49f   :  { %2606 = vxpose.xlu1.b32.cont [14/16] %v2555_v41, 128  ;;  %v2412_v50 = vadd.f32 %v2411_v44, %v4737_v5  ;;  %v2413_v4 = vpop.f32.mrb[29].mxu1 }
 0x4a0   :  { %v2414_v48 = vadd.f32 %v2413_v4, %v4740_v15  ;;  %v2415_v20 = vpop.f32.mrb[30].mxu1 }
 0x4a1   :  { %v2449_v33 = vmul.f32 0.5, %v2412_v50  ;;  %v2416_v38 = vadd.f32 %v2415_v20, %v4737_v5  ;;  %v2417_v53 = vpop.f32.mrb[31].mxu1 }
 0x4a2   :  { %v2450_v60 = vmul.f32 0.5, %v2414_v48  ;;  %v2418_v24 = vadd.f32 %v2417_v53, %v4740_v15 }
 0x4a3   :  { %3146 = vtanh.f32 %v2449_v33  ;;  %v2451_v10 = vmul.f32 0.5, %v2416_v38 }
 0x4a4   :  { %3148 = vtanh.f32 %v2450_v60  ;;  %v2452_v31 = vmul.f32 0.5, %v2418_v24 }
 0x4a5   :  { %3150 = vtanh.f32 %v2451_v10 }
 0x4a6   :  { %3152 = vtanh.f32 %v2452_v31 }
 0x4ad   :  { %v3147_v7 = vpop.eup %3146 }
 0x4ae   :  { %v3149_v25 = vpop.eup %3148  ;;  %v2524_v14 = vmul.f32 %v3147_v7, %v4754_v6 }
 0x4af   :  { %v3151_v9 = vpop.eup %3150  ;;  %v2525_v35 = vmul.f32 %v3149_v25, %v4757_v32 }
 0x4b0   :  { %v3153_v56 = vpop.eup %3152  ;;  %v2556_v5 = vadd.f32 %v2524_v14, %v4754_v6  ;;  %v2526_v62 = vmul.f32 %v3151_v9, %v4754_v6 }
 0x4b1   :  { %v2557_v15 = vadd.f32 %v2525_v35, %v4757_v32  ;;  %v2527_v17 = vmul.f32 %v3153_v56, %v4757_v32 }
 0x4b2   :  { %2575 = vxpose.xlu0.b32.cont [15/16] %v2556_v5, 128  ;;  %v2558_v55 = vadd.f32 %v2526_v62, %v4754_v6 }
 0x4b3   :  { %2607 = vxpose.xlu1.b32.cont [15/16] %v2557_v15, 128  ;;  %v2559_v19 = vadd.f32 %v2527_v17, %v4757_v32 }
 0x4b6   :  { %2576 = vxpose.xlu0.b32.end [16/16] %v2558_v55, 128 }
 0x4b7   :  { %2608 = vxpose.xlu1.b32.end [16/16] %v2559_v19, 128 }
 0x4df   :  { %2865 = vset.pattern.permute.xlu0 %v5148_v52 }
 0x4e0   :  { %2664 = vperm.xlu0 %2865, %v2560_v1  }
 0x4fa   :  { %v2577_v54 = vpop.trf.xlu0 }
 0x4fb   :  { %v2609_v39 = vpop.trf.xlu1 }
 0x4fe   :  { %v2578_v21 = vpop.trf.xlu0 }
 0x4ff   :  { %v2610_v43 = vpop.trf.xlu1  ;;  %v2625_v23 = vadd.f32 %v2578_v21, %v2577_v54 }
 0x502   :  { %v2579_v12 = vpop.trf.xlu0 }
 0x503   :  { %v2611_v40 = vpop.trf.xlu1  ;;  %v2626_v8 = vadd.f32 %v2625_v23, %v2579_v12 }
 0x506   :  { %v2580_v26 = vpop.trf.xlu0 }
 0x507   :  { %v2612_v2 = vpop.trf.xlu1  ;;  %v2627_v61 = vadd.f32 %v2626_v8, %v2580_v26 }
 0x50a   :  { %v2581_v34 = vpop.trf.xlu0 }
 0x50b   :  { %v2613_v6 = vpop.trf.xlu1  ;;  %v2628_v63 = vadd.f32 %v2627_v61, %v2581_v34 }
 0x50e   :  { %v2582_v30 = vpop.trf.xlu0 }
 0x50f   :  { %v2614_v32 = vpop.trf.xlu1  ;;  %v2629_v57 = vadd.f32 %v2628_v63, %v2582_v30 }
 0x512   :  { %v2583_v18 = vpop.trf.xlu0 }
 0x513   :  { %v2615_v16 = vpop.trf.xlu1  ;;  %v2630_v13 = vadd.f32 %v2629_v57, %v2583_v18 }
 0x516   :  { %v2584_v42 = vpop.trf.xlu0 }
 0x517   :  { %v2616_v28 = vpop.trf.xlu1  ;;  %v2631_v37 = vadd.f32 %v2630_v13, %v2584_v42 }
 0x51a   :  { %v2585_v11 = vpop.trf.xlu0 }
 0x51b   :  { %v2632_v36 = vadd.f32 %v2631_v37, %v2585_v11  ;;  %v2617_v29 = vpop.trf.xlu1 }
 0x51e   :  { %v2586_v51 = vpop.trf.xlu0 }
 0x51f   :  { %v2633_v47 = vadd.f32 %v2632_v36, %v2586_v51  ;;  %v2618_v3 = vpop.trf.xlu1 }
 0x522   :  { %v2587_v59 = vpop.trf.xlu0 }
 0x523   :  { %v2634_v49 = vadd.f32 %v2633_v47, %v2587_v59  ;;  %v2619_v48 = vpop.trf.xlu1 }
 0x526   :  { %v2588_v45 = vpop.trf.xlu0 }
 0x527   :  { %v2635_v46 = vadd.f32 %v2634_v49, %v2588_v45  ;;  %v2620_v53 = vpop.trf.xlu1 }
 0x52a   :  { %v2589_v58 = vpop.trf.xlu0 }
 0x52b   :  { %v2636_v27 = vadd.f32 %v2635_v46, %v2589_v58  ;;  %v2621_v31 = vpop.trf.xlu1 }
 0x52e   :  { %v2590_v22 = vpop.trf.xlu0 }
 0x52f   :  { %v2637_v44 = vadd.f32 %v2636_v27, %v2590_v22  ;;  %v2622_v9 = vpop.trf.xlu1 }
 0x532   :  { %v2591_v41 = vpop.trf.xlu0 }
 0x533   :  { %v2638_v50 = vadd.f32 %v2637_v44, %v2591_v41  ;;  %v2623_v62 = vpop.trf.xlu1 }
 0x536   :  { %v2592_v4 = vpop.trf.xlu0 }
 0x537   :  { %v2639_v20 = vadd.f32 %v2638_v50, %v2592_v4  ;;  %v2624_v19 = vpop.trf.xlu1 }
 0x539   :  { %v2640_v33 = vadd.f32 %v2639_v20, %v2609_v39 }
 0x53b   :  { %v2641_v38 = vadd.f32 %v2640_v33, %v2610_v43 }
 0x53d   :  { %v2642_v60 = vadd.f32 %v2641_v38, %v2611_v40 }
 0x53f   :  { %v2643_v24 = vadd.f32 %v2642_v60, %v2612_v2 }
 0x541   :  { %v2644_v10 = vadd.f32 %v2643_v24, %v2613_v6 }
 0x543   :  { %v2645_v7 = vadd.f32 %v2644_v10, %v2614_v32 }
 0x545   :  { %v2646_v25 = vadd.f32 %v2645_v7, %v2615_v16 }
 0x547   :  { %v2647_v14 = vadd.f32 %v2646_v25, %v2616_v28 }
 0x549   :  { %v2648_v35 = vadd.f32 %v2647_v14, %v2617_v29 }
 0x54b   :  { %v2649_v56 = vadd.f32 %v2648_v35, %v2618_v3 }
 0x54d   :  { %v2650_v5 = vadd.f32 %v2649_v56, %v2619_v48 }
 0x54f   :  { %v2651_v15 = vadd.f32 %v2650_v5, %v2620_v53 }
 0x551   :  { %v2652_v17 = vadd.f32 %v2651_v15, %v2621_v31 }
 0x553   :  { %v2653_v55 = vadd.f32 %v2652_v17, %v2622_v9 }
 0x555   :  { %v2654_v1 = vadd.f32 %v2653_v55, %v2623_v62 }
 0x557   :  { %v2655_v52 = vadd.f32 %v2654_v1, %v2624_v19 }
 0x559   :  { %v2656_v54 = vrot.slane %v2655_v52, 4 }
 0x55b   :  { %v2657_v39 = vadd.f32 %v2656_v54, %v2655_v52 }
 0x55d   :  { %v2658_v21 = vrot.slane %v2657_v39, 2 }
 0x55f   :  { %v2659_v43 = vadd.f32 %v2658_v21, %v2657_v39  ;;  %v2665_v12 = vpop.permute.xlu0 %2664 }
 0x560   :  { %v2670_v40 = vrot.slane %v2665_v12, %v5143_v0 }
 0x561   :  { %v2660_v26 = vrot.slane %v2659_v43, 1 }
 0x563   :  { %v2661_v34 = vadd.f32 %v2660_v26, %v2659_v43 }
 0x565   :  { %v2671_v2 = vadd.f32 %v2670_v40, %v2661_v34 }
 0x567   :  { %2672 = vst [vmem:[#allocation11] sm:$0x1] %v2671_v2 }
 0x568   :  { %3262 = shalt.err (!%p3259_p8)
}
 0x569   :  { %s3263_s24 = scalar_lea.hbm %s4882_s9, 16 }
 0x56a   :  { %p3264_p9 = scmp.ne.s32.totalorder %s4882_s9, %s3263_s24  ;;  %p3267_p10 = scmp.lt.u32.totalorder %s3263_s24, %s4882_s9 }
 0x56c   :  { %p3269_p11 = pnand %p3267_p10, %p3264_p9 }
 0x56e   :  { %3272 = shalt.err (!%p3269_p11)
}
 0x56f   :  { %2682 = dma.vmem_to_hbm [thread:$0]  %s2680_s8, 16, %s4882_s9, [#allocation5]  }
 0x570   :  { %3279 = dma.done.wait [#allocation5], 16  }
 0x571   :  { %3280 = vsyncadd [#allocation5], 4294967280 }
 0x572   :  { %2686 = vsyncpa [#allocation4], 1 }
 0x573   :  { %2687 = vsyncpa [#allocation7], 1 }
 0x574   :  { %2688 = vsyncpa [#allocation10], 1 }
 0x575   :  { %2689 = vsyncpa [#allocation5], 1 }

</bundles_post_ra>
